<compile_context>
chip_gen: v7x
topology: tpu7x:2x2x1
jax: 0.10.0
libtpu: 0.0.40
codegen_flags: <defaults>
</compile_context>

<pallas_src>
import jax
import jax.numpy as jnp
from jax.experimental import pallas as pl
from jax.experimental.pallas import tpu as pltpu

# ---------------------------------------------------------------------------
# Static network configuration (matches DeformNetwork defaults).
# ---------------------------------------------------------------------------
D = 8
W = 256
T_MULTIRES = 6          # argument passed to get_embedder for time
XYZ_MULTIRES = 10
TIME_CH = 1 + 2 * T_MULTIRES * 1      # 13
XYZ_CH = 3 + 2 * XYZ_MULTIRES * 3     # 63
IN_CH = XYZ_CH + TIME_CH              # 76
SKIP = D // 2                         # 4
IN_PAD = 128                          # embedding padded to one full lane tile
HEAD_PAD = 128                        # packed heads padded to one lane tile
TM = 256                              # rows (points) per grid step (sweep 256-1024)


# ---------------------------------------------------------------------------
# Positional embedding (cheap elementwise glue; done in plain JAX).
# TODO(synk): could be moved in-kernel (EUP is idle) to save ~1 KB/point HBM traffic.
# ---------------------------------------------------------------------------
def positional_embed(x, multires):
    # log-sampled freq bands: 2**linspace(0, multires-1, multires)
    freqs = 2.0 ** jnp.arange(multires, dtype=jnp.float32)
    parts = [x]
    for f in freqs:                      # per-freq: sin, then cos (PyTorch order)
        parts.append(jnp.sin(x * f))
        parts.append(jnp.cos(x * f))
    return jnp.concatenate(parts, axis=-1)


# ---------------------------------------------------------------------------
# Pallas kernel: the full 8-layer MLP + packed heads for one row-tile.
#   emb_ref : (TM, 128)  bf16   zero-padded [x_emb | t_emb]
#   w05_ref : (128, 512) bf16   [w0_padded | w5_emb_part_padded]
#   wm_ref  : (7, 256, 256) bf16  [w1,w2,w3,w4,w5_h,w6,w7]
#   bs_ref  : (8, 256)   f32    hidden biases
#   wh_ref  : (256, 128) bf16   packed heads (warp|rot|scale, zero-padded)
#   bh_ref  : (1, 128)   f32    packed head bias
#   out_ref : (TM, 128)  f32
#   e5_ref  : (TM, 256)  f32    VMEM scratch: emb @ w5_emb (skip-branch pre-act)
# ---------------------------------------------------------------------------
def mlp_kernel(emb_ref, w05_ref, wm_ref, bs_ref, wh_ref, bh_ref, out_ref, e5_ref):
    emb = emb_ref[...]                                     # (TM, 128) bf16

    # fused layer-0 + layer-5-embedding matmul (one LHS push, 512-wide RHS)
    e01 = jnp.dot(emb, w05_ref[...], preferred_element_type=jnp.float32)  # (TM, 512)
    e5_ref[...] = e01[:, W:]                               # stash skip-branch part
    h = jnp.maximum(e01[:, :W] + bs_ref[pl.ds(0, 1), :], 0.0)

    # layers 1..4
    for i in range(1, SKIP + 1):
        h = jnp.dot(h.astype(jnp.bfloat16), wm_ref[i - 1],
                    preferred_element_type=jnp.float32) + bs_ref[pl.ds(i, 1), :]
        h = jnp.maximum(h, 0.0)

    # layer 5 consumes cat([x_emb, t_emb, h]):  emb@w5[:76] (stashed) + h@w5[76:]
    h = (jnp.dot(h.astype(jnp.bfloat16), wm_ref[SKIP],
                 preferred_element_type=jnp.float32)
         + e5_ref[...] + bs_ref[pl.ds(SKIP + 1, 1), :])
    h = jnp.maximum(h, 0.0)

    # layers 6..7   (fixed: wm_ref[i-1], i.e. w6 / w7)
    for i in range(SKIP + 2, D):
        h = jnp.dot(h.astype(jnp.bfloat16), wm_ref[i - 1],
                    preferred_element_type=jnp.float32) + bs_ref[pl.ds(i, 1), :]
        h = jnp.maximum(h, 0.0)

    # packed heads: cols 0:3 warp, 3:7 rotation, 7:10 scaling (rest zero-padded)
    out = jnp.dot(h.astype(jnp.bfloat16), wh_ref[...],
                  preferred_element_type=jnp.float32) + bh_ref[...]
    out_ref[...] = out.astype(out_ref.dtype)


# ---------------------------------------------------------------------------
# Parameter construction (deterministic, PyTorch-Linear-style uniform init).
# ---------------------------------------------------------------------------
def init_params(key):
    def linear(k, fan_in, fan_out):
        k1, k2 = jax.random.split(k)
        bound = 1.0 / jnp.sqrt(jnp.float32(fan_in))
        w = jax.random.uniform(k1, (fan_in, fan_out), jnp.float32, -bound, bound)
        b = jax.random.uniform(k2, (fan_out,), jnp.float32, -bound, bound)
        return w, b

    keys = jax.random.split(key, D + 3)
    raw = {}
    raw["w0"], raw["b0"] = linear(keys[0], IN_CH, W)
    for i in range(1, D):
        fan_in = W + IN_CH if i == SKIP + 1 else W
        raw[f"w{i}"], raw[f"b{i}"] = linear(keys[i], fan_in, W)
    raw["w_warp"], raw["b_warp"] = linear(keys[D], W, 3)
    raw["w_rot"], raw["b_rot"] = linear(keys[D + 1], W, 4)
    raw["w_scale"], raw["b_scale"] = linear(keys[D + 2], W, 3)

    # Packed / padded tensors fed to the kernel (weights in bf16, biases f32).
    w0p = jnp.zeros((IN_PAD, W), jnp.float32).at[:IN_CH].set(raw["w0"])
    w5 = raw[f"w{SKIP + 1}"]                       # (IN_CH + W, W); rows 0:IN_CH = emb part
    w5e = jnp.zeros((IN_PAD, W), jnp.float32).at[:IN_CH].set(w5[:IN_CH])
    w05 = jnp.concatenate([w0p, w5e], axis=1).astype(jnp.bfloat16)   # (128, 512)

    mids = ([raw[f"w{i}"] for i in range(1, SKIP + 1)] + [w5[IN_CH:]]
            + [raw[f"w{i}"] for i in range(SKIP + 2, D)])
    wm = jnp.stack(mids).astype(jnp.bfloat16)                        # (7, 256, 256)
    bs = jnp.stack([raw[f"b{i}"] for i in range(D)])                 # (8, 256) f32
    wh = (jnp.zeros((W, HEAD_PAD), jnp.float32)
          .at[:, 0:3].set(raw["w_warp"])
          .at[:, 3:7].set(raw["w_rot"])
          .at[:, 7:10].set(raw["w_scale"])).astype(jnp.bfloat16)
    bh = (jnp.zeros((1, HEAD_PAD), jnp.float32)
          .at[0, 0:3].set(raw["b_warp"])
          .at[0, 3:7].set(raw["b_rot"])
          .at[0, 7:10].set(raw["b_scale"]))
    packed = dict(w05=w05, wm=wm, bs=bs, wh=wh, bh=bh)
    return raw, packed


# ---------------------------------------------------------------------------
# Wrapper: embedding + pallas_call + head slicing.
# ---------------------------------------------------------------------------
@jax.jit
def deform_forward(packed, x, t):
    x_emb = positional_embed(x, XYZ_MULTIRES)          # (N, 63)
    t_emb = positional_embed(t, T_MULTIRES)            # (N, 13)
    emb = jnp.concatenate([x_emb, t_emb], axis=-1)     # (N, 76)

    n = emb.shape[0]
    n_pad = (-n) % TM
    emb_p = jnp.pad(emb, ((0, n_pad), (0, IN_PAD - IN_CH))).astype(jnp.bfloat16)
    n_tot = emb_p.shape[0]

    flops = 2 * n_tot * (IN_PAD * 2 * W + (D - 1) * W * W + W * HEAD_PAD)
    bytes_accessed = (emb_p.size * 2 + n_tot * HEAD_PAD * 4
                      + packed["w05"].size * 2 + packed["wm"].size * 2
                      + packed["wh"].size * 2 + packed["bs"].size * 4
                      + packed["bh"].size * 4)

    out = pl.pallas_call(
        mlp_kernel,
        out_shape=jax.ShapeDtypeStruct((n_tot, HEAD_PAD), jnp.float32),
        grid=(n_tot // TM,),
        in_specs=[
            pl.BlockSpec((TM, IN_PAD), lambda i: (i, 0)),          # emb tile
            pl.BlockSpec((IN_PAD, 2 * W), lambda i: (0, 0)),       # fused w0|w5_emb
            pl.BlockSpec((D - 1, W, W), lambda i: (0, 0, 0)),      # 7 hidden (256,256) mats
            pl.BlockSpec((D, W), lambda i: (0, 0)),                # 8 biases
            pl.BlockSpec((W, HEAD_PAD), lambda i: (0, 0)),         # packed heads
            pl.BlockSpec((1, HEAD_PAD), lambda i: (0, 0)),         # packed head bias
        ],
        out_specs=pl.BlockSpec((TM, HEAD_PAD), lambda i: (i, 0)),
        scratch_shapes=[pltpu.VMEM((TM, W), jnp.float32)],         # skip-branch stash
        compiler_params=pltpu.CompilerParams(
            dimension_semantics=("parallel",),
            vmem_limit_bytes=32 * 1024 * 1024),
        cost_estimate=pl.CostEstimate(
            flops=flops, transcendentals=0, bytes_accessed=bytes_accessed),
    )(emb_p, packed["w05"], packed["wm"], packed["bs"], packed["wh"], packed["bh"])

    out = out[:n]
    d_xyz = out[:, 0:3]
    rotation = out[:, 3:7]
    scaling = out[:, 7:10]
    return d_xyz, rotation, scaling


# ---------------------------------------------------------------------------
# Pure-JAX f32 reference (mirrors the PyTorch forward exactly) for verification.
# ---------------------------------------------------------------------------
def ref_forward(raw, x, t):
    x_emb = positional_embed(x, XYZ_MULTIRES)
    t_emb = positional_embed(t, T_MULTIRES)
    h = jnp.concatenate([x_emb, t_emb], axis=-1)
    emb = h
    for i in range(D):
        h = jax.nn.relu(h @ raw[f"w{i}"] + raw[f"b{i}"])
        if i == SKIP:
            h = jnp.concatenate([emb, h], axis=-1)   # [x_emb, t_emb, h]
    d_xyz = h @ raw["w_warp"] + raw["b_warp"]
    rotation = h @ raw["w_rot"] + raw["b_rot"]
    scaling = h @ raw["w_scale"] + raw["b_scale"]
    return d_xyz, rotation, scaling


if __name__ == "__main__":
    key = jax.random.PRNGKey(0)
    k_param, k_x, k_t = jax.random.split(key, 3)

    raw, packed = init_params(k_param)

    N = 256
    x = jax.random.normal(k_x, (N, 3), jnp.float32)        # gaussian xyz
    t = jax.random.uniform(k_t, (N, 1), jnp.float32)       # per-point time

    d_xyz, rotation, scaling = deform_forward(packed, x, t)
    jax.block_until_ready((d_xyz, rotation, scaling))

    # Sanity check against the plain-JAX f32 reference of the PyTorch forward.
    # Kernel runs bf16 MXU matmuls with f32 accumulation -> relaxed tolerance.
    r_xyz, r_rot, r_scale = ref_forward(raw, x, t)
    assert d_xyz.shape == (N, 3) and rotation.shape == (N, 4) and scaling.shape == (N, 3)
    assert jnp.allclose(d_xyz, r_xyz, atol=2e-2, rtol=2e-2), \
        f"d_xyz max err {float(jnp.max(jnp.abs(d_xyz - r_xyz)))}"
    assert jnp.allclose(rotation, r_rot, atol=2e-2, rtol=2e-2), \
        f"rotation max err {float(jnp.max(jnp.abs(rotation - r_rot)))}"
    assert jnp.allclose(scaling, r_scale, atol=2e-2, rtol=2e-2), \
        f"scaling max err {float(jnp.max(jnp.abs(scaling - r_scale)))}"

    print("KERNEL_OK")
</pallas_src>

<mosaic_0001>
module attributes {stable_mosaic.version = 11 : i64} {
  func.func @mlp_kernel(%arg0: i32, %arg1: memref<256x128xbf16, #tpu.memory_space<vmem>>, %arg2: memref<128x512xbf16, #tpu.memory_space<vmem>>, %arg3: memref<7x256x256xbf16, #tpu.memory_space<vmem>>, %arg4: memref<8x256xf32, #tpu.memory_space<vmem>>, %arg5: memref<256x128xbf16, #tpu.memory_space<vmem>>, %arg6: memref<1x128xf32, #tpu.memory_space<vmem>>, %arg7: memref<256x128xf32, #tpu.memory_space<vmem>>, %arg8: memref<256x256xf32, #tpu.memory_space<vmem>>) attributes {dimension_semantics = [#tpu.dimension_semantics<parallel>], iteration_bounds = array<i64: 1>, scalar_prefetch = 0 : i64, scratch_operands = 1 : i64, tpu.core_type = #tpu.core_type<tc>, window_params = [{transform_indices = @transform_0, window_bounds = array<i64: 256, 128>}, {pipeline_mode = #tpu.pipeline_mode<synchronous>, transform_indices = @transform_1, window_bounds = array<i64: 128, 512>}, {pipeline_mode = #tpu.pipeline_mode<synchronous>, transform_indices = @transform_2, window_bounds = array<i64: 7, 256, 256>}, {pipeline_mode = #tpu.pipeline_mode<synchronous>, transform_indices = @transform_3, window_bounds = array<i64: 8, 256>}, {pipeline_mode = #tpu.pipeline_mode<synchronous>, transform_indices = @transform_4, window_bounds = array<i64: 256, 128>}, {pipeline_mode = #tpu.pipeline_mode<synchronous>, transform_indices = @transform_5, window_bounds = array<i64: 1, 128>}, {transform_indices = @transform_6, window_bounds = array<i64: 256, 128>}]} {
    %c0 = arith.constant 0 : index
    %c0_0 = arith.constant 0 : index
    %0 = vector.load %arg1[%c0, %c0_0] : memref<256x128xbf16, #tpu.memory_space<vmem>>, vector<256x128xbf16>
    %c0_1 = arith.constant 0 : index
    %c0_2 = arith.constant 0 : index
    %1 = vector.load %arg2[%c0_1, %c0_2] : memref<128x512xbf16, #tpu.memory_space<vmem>>, vector<128x512xbf16>
    %cst = arith.constant dense<0.000000e+00> : vector<256x512xf32>
    %2 = tpu.matmul %0, %1, %cst {dimension_numbers = #tpu.dot_dimension_numbers<[1], [0], [0], [1], [0, 0, 1, 1], [], []>} : vector<256x128xbf16>, vector<128x512xbf16>, vector<256x512xf32> -> vector<256x512xf32>
    %3 = vector.extract_strided_slice %2 {offsets = [0, 256], sizes = [256, 256], strides = [1, 1]} : vector<256x512xf32> to vector<256x256xf32>
    %c0_3 = arith.constant 0 : index
    %c0_4 = arith.constant 0 : index
    %4 = vector.load %arg8[%c0_3, %c0_4] : memref<256x256xf32, #tpu.memory_space<vmem>>, vector<256x256xf32>
    tpu.vector_store %arg8[%c0_3, %c0_4], %3 {strides = array<i32>} : memref<256x256xf32, #tpu.memory_space<vmem>>, vector<256x256xf32>,
    %5 = vector.extract_strided_slice %2 {offsets = [0, 0], sizes = [256, 256], strides = [1, 1]} : vector<256x512xf32> to vector<256x256xf32>
    %c0_5 = arith.constant 0 : index
    %c0_6 = arith.constant 0 : index
    %6 = vector.load %arg4[%c0_5, %c0_6] : memref<8x256xf32, #tpu.memory_space<vmem>>, vector<1x256xf32>
    %7 = vector.broadcast %6 : vector<1x256xf32> to vector<256x256xf32>
    %8 = arith.addf %5, %7 : vector<256x256xf32>
    %cst_7 = arith.constant 0.000000e+00 : f32
    %9 = vector.broadcast %cst_7 : f32 to vector<256x256xf32>
    %10 = arith.maximumf %8, %9 : vector<256x256xf32>
    %11 = arith.truncf %10 : vector<256x256xf32> to vector<256x256xbf16>
    %c0_8 = arith.constant 0 : index
    %c0_9 = arith.constant 0 : index
    %c0_10 = arith.constant 0 : index
    %12 = vector.load %arg3[%c0_8, %c0_9, %c0_10] : memref<7x256x256xbf16, #tpu.memory_space<vmem>>, vector<1x256x256xbf16>
    %13 = vector.shape_cast %12 : vector<1x256x256xbf16> to vector<256x256xbf16>
    %cst_11 = arith.constant dense<0.000000e+00> : vector<256x256xf32>
    %14 = tpu.matmul %11, %13, %cst_11 {dimension_numbers = #tpu.dot_dimension_numbers<[1], [0], [0], [1], [0, 0, 1, 1], [], []>} : vector<256x256xbf16>, vector<256x256xbf16>, vector<256x256xf32> -> vector<256x256xf32>
    %c1 = arith.constant 1 : index
    %c0_12 = arith.constant 0 : index
    %15 = vector.load %arg4[%c1, %c0_12] : memref<8x256xf32, #tpu.memory_space<vmem>>, vector<1x256xf32>
    %16 = vector.broadcast %15 : vector<1x256xf32> to vector<256x256xf32>
    %17 = arith.addf %14, %16 : vector<256x256xf32>
    %cst_13 = arith.constant 0.000000e+00 : f32
    %18 = vector.broadcast %cst_13 : f32 to vector<256x256xf32>
    %19 = arith.maximumf %17, %18 : vector<256x256xf32>
    %20 = arith.truncf %19 : vector<256x256xf32> to vector<256x256xbf16>
    %c1_14 = arith.constant 1 : index
    %c0_15 = arith.constant 0 : index
    %c0_16 = arith.constant 0 : index
    %21 = vector.load %arg3[%c1_14, %c0_15, %c0_16] : memref<7x256x256xbf16, #tpu.memory_space<vmem>>, vector<1x256x256xbf16>
    %22 = vector.shape_cast %21 : vector<1x256x256xbf16> to vector<256x256xbf16>
    %cst_17 = arith.constant dense<0.000000e+00> : vector<256x256xf32>
    %23 = tpu.matmul %20, %22, %cst_17 {dimension_numbers = #tpu.dot_dimension_numbers<[1], [0], [0], [1], [0, 0, 1, 1], [], []>} : vector<256x256xbf16>, vector<256x256xbf16>, vector<256x256xf32> -> vector<256x256xf32>
    %c2 = arith.constant 2 : index
    %c0_18 = arith.constant 0 : index
    %24 = vector.load %arg4[%c2, %c0_18] : memref<8x256xf32, #tpu.memory_space<vmem>>, vector<1x256xf32>
    %25 = vector.broadcast %24 : vector<1x256xf32> to vector<256x256xf32>
    %26 = arith.addf %23, %25 : vector<256x256xf32>
    %cst_19 = arith.constant 0.000000e+00 : f32
    %27 = vector.broadcast %cst_19 : f32 to vector<256x256xf32>
    %28 = arith.maximumf %26, %27 : vector<256x256xf32>
    %29 = arith.truncf %28 : vector<256x256xf32> to vector<256x256xbf16>
    %c2_20 = arith.constant 2 : index
    %c0_21 = arith.constant 0 : index
    %c0_22 = arith.constant 0 : index
    %30 = vector.load %arg3[%c2_20, %c0_21, %c0_22] : memref<7x256x256xbf16, #tpu.memory_space<vmem>>, vector<1x256x256xbf16>
    %31 = vector.shape_cast %30 : vector<1x256x256xbf16> to vector<256x256xbf16>
    %cst_23 = arith.constant dense<0.000000e+00> : vector<256x256xf32>
    %32 = tpu.matmul %29, %31, %cst_23 {dimension_numbers = #tpu.dot_dimension_numbers<[1], [0], [0], [1], [0, 0, 1, 1], [], []>} : vector<256x256xbf16>, vector<256x256xbf16>, vector<256x256xf32> -> vector<256x256xf32>
    %c3 = arith.constant 3 : index
    %c0_24 = arith.constant 0 : index
    %33 = vector.load %arg4[%c3, %c0_24] : memref<8x256xf32, #tpu.memory_space<vmem>>, vector<1x256xf32>
    %34 = vector.broadcast %33 : vector<1x256xf32> to vector<256x256xf32>
    %35 = arith.addf %32, %34 : vector<256x256xf32>
    %cst_25 = arith.constant 0.000000e+00 : f32
    %36 = vector.broadcast %cst_25 : f32 to vector<256x256xf32>
    %37 = arith.maximumf %35, %36 : vector<256x256xf32>
    %38 = arith.truncf %37 : vector<256x256xf32> to vector<256x256xbf16>
    %c3_26 = arith.constant 3 : index
    %c0_27 = arith.constant 0 : index
    %c0_28 = arith.constant 0 : index
    %39 = vector.load %arg3[%c3_26, %c0_27, %c0_28] : memref<7x256x256xbf16, #tpu.memory_space<vmem>>, vector<1x256x256xbf16>
    %40 = vector.shape_cast %39 : vector<1x256x256xbf16> to vector<256x256xbf16>
    %cst_29 = arith.constant dense<0.000000e+00> : vector<256x256xf32>
    %41 = tpu.matmul %38, %40, %cst_29 {dimension_numbers = #tpu.dot_dimension_numbers<[1], [0], [0], [1], [0, 0, 1, 1], [], []>} : vector<256x256xbf16>, vector<256x256xbf16>, vector<256x256xf32> -> vector<256x256xf32>
    %c4 = arith.constant 4 : index
    %c0_30 = arith.constant 0 : index
    %42 = vector.load %arg4[%c4, %c0_30] : memref<8x256xf32, #tpu.memory_space<vmem>>, vector<1x256xf32>
    %43 = vector.broadcast %42 : vector<1x256xf32> to vector<256x256xf32>
    %44 = arith.addf %41, %43 : vector<256x256xf32>
    %cst_31 = arith.constant 0.000000e+00 : f32
    %45 = vector.broadcast %cst_31 : f32 to vector<256x256xf32>
    %46 = arith.maximumf %44, %45 : vector<256x256xf32>
    %47 = arith.truncf %46 : vector<256x256xf32> to vector<256x256xbf16>
    %c4_32 = arith.constant 4 : index
    %c0_33 = arith.constant 0 : index
    %c0_34 = arith.constant 0 : index
    %48 = vector.load %arg3[%c4_32, %c0_33, %c0_34] : memref<7x256x256xbf16, #tpu.memory_space<vmem>>, vector<1x256x256xbf16>
    %49 = vector.shape_cast %48 : vector<1x256x256xbf16> to vector<256x256xbf16>
    %cst_35 = arith.constant dense<0.000000e+00> : vector<256x256xf32>
    %50 = tpu.matmul %47, %49, %cst_35 {dimension_numbers = #tpu.dot_dimension_numbers<[1], [0], [0], [1], [0, 0, 1, 1], [], []>} : vector<256x256xbf16>, vector<256x256xbf16>, vector<256x256xf32> -> vector<256x256xf32>
    %c0_36 = arith.constant 0 : index
    %c0_37 = arith.constant 0 : index
    %51 = vector.load %arg8[%c0_36, %c0_37] : memref<256x256xf32, #tpu.memory_space<vmem>>, vector<256x256xf32>
    %52 = arith.addf %50, %51 : vector<256x256xf32>
    %c5 = arith.constant 5 : index
    %c0_38 = arith.constant 0 : index
    %53 = vector.load %arg4[%c5, %c0_38] : memref<8x256xf32, #tpu.memory_space<vmem>>, vector<1x256xf32>
    %54 = vector.broadcast %53 : vector<1x256xf32> to vector<256x256xf32>
    %55 = arith.addf %52, %54 : vector<256x256xf32>
    %cst_39 = arith.constant 0.000000e+00 : f32
    %56 = vector.broadcast %cst_39 : f32 to vector<256x256xf32>
    %57 = arith.maximumf %55, %56 : vector<256x256xf32>
    %58 = arith.truncf %57 : vector<256x256xf32> to vector<256x256xbf16>
    %c5_40 = arith.constant 5 : index
    %c0_41 = arith.constant 0 : index
    %c0_42 = arith.constant 0 : index
    %59 = vector.load %arg3[%c5_40, %c0_41, %c0_42] : memref<7x256x256xbf16, #tpu.memory_space<vmem>>, vector<1x256x256xbf16>
    %60 = vector.shape_cast %59 : vector<1x256x256xbf16> to vector<256x256xbf16>
    %cst_43 = arith.constant dense<0.000000e+00> : vector<256x256xf32>
    %61 = tpu.matmul %58, %60, %cst_43 {dimension_numbers = #tpu.dot_dimension_numbers<[1], [0], [0], [1], [0, 0, 1, 1], [], []>} : vector<256x256xbf16>, vector<256x256xbf16>, vector<256x256xf32> -> vector<256x256xf32>
    %c6 = arith.constant 6 : index
    %c0_44 = arith.constant 0 : index
    %62 = vector.load %arg4[%c6, %c0_44] : memref<8x256xf32, #tpu.memory_space<vmem>>, vector<1x256xf32>
    %63 = vector.broadcast %62 : vector<1x256xf32> to vector<256x256xf32>
    %64 = arith.addf %61, %63 : vector<256x256xf32>
    %cst_45 = arith.constant 0.000000e+00 : f32
    %65 = vector.broadcast %cst_45 : f32 to vector<256x256xf32>
    %66 = arith.maximumf %64, %65 : vector<256x256xf32>
    %67 = arith.truncf %66 : vector<256x256xf32> to vector<256x256xbf16>
    %c6_46 = arith.constant 6 : index
    %c0_47 = arith.constant 0 : index
    %c0_48 = arith.constant 0 : index
    %68 = vector.load %arg3[%c6_46, %c0_47, %c0_48] : memref<7x256x256xbf16, #tpu.memory_space<vmem>>, vector<1x256x256xbf16>
    %69 = vector.shape_cast %68 : vector<1x256x256xbf16> to vector<256x256xbf16>
    %cst_49 = arith.constant dense<0.000000e+00> : vector<256x256xf32>
    %70 = tpu.matmul %67, %69, %cst_49 {dimension_numbers = #tpu.dot_dimension_numbers<[1], [0], [0], [1], [0, 0, 1, 1], [], []>} : vector<256x256xbf16>, vector<256x256xbf16>, vector<256x256xf32> -> vector<256x256xf32>
    %c7 = arith.constant 7 : index
    %c0_50 = arith.constant 0 : index
    %71 = vector.load %arg4[%c7, %c0_50] : memref<8x256xf32, #tpu.memory_space<vmem>>, vector<1x256xf32>
    %72 = vector.broadcast %71 : vector<1x256xf32> to vector<256x256xf32>
    %73 = arith.addf %70, %72 : vector<256x256xf32>
    %cst_51 = arith.constant 0.000000e+00 : f32
    %74 = vector.broadcast %cst_51 : f32 to vector<256x256xf32>
    %75 = arith.maximumf %73, %74 : vector<256x256xf32>
    %76 = arith.truncf %75 : vector<256x256xf32> to vector<256x256xbf16>
    %c0_52 = arith.constant 0 : index
    %c0_53 = arith.constant 0 : index
    %77 = vector.load %arg5[%c0_52, %c0_53] : memref<256x128xbf16, #tpu.memory_space<vmem>>, vector<256x128xbf16>
    %cst_54 = arith.constant dense<0.000000e+00> : vector<256x128xf32>
    %78 = tpu.matmul %76, %77, %cst_54 {dimension_numbers = #tpu.dot_dimension_numbers<[1], [0], [0], [1], [0, 0, 1, 1], [], []>} : vector<256x256xbf16>, vector<256x128xbf16>, vector<256x128xf32> -> vector<256x128xf32>
    %c0_55 = arith.constant 0 : index
    %c0_56 = arith.constant 0 : index
    %79 = vector.load %arg6[%c0_55, %c0_56] : memref<1x128xf32, #tpu.memory_space<vmem>>, vector<1x128xf32>
    %80 = vector.broadcast %79 : vector<1x128xf32> to vector<256x128xf32>
    %81 = arith.addf %78, %80 : vector<256x128xf32>
    %c0_57 = arith.constant 0 : index
    %c0_58 = arith.constant 0 : index
    %82 = vector.load %arg7[%c0_57, %c0_58] : memref<256x128xf32, #tpu.memory_space<vmem>>, vector<256x128xf32>
    tpu.vector_store %arg7[%c0_57, %c0_58], %81 {strides = array<i32>} : memref<256x128xf32, #tpu.memory_space<vmem>>, vector<256x128xf32>,
    return
  }
  func.func @transform_0(%arg0: i32) -> (i32, i32) {
    %c0_i32 = arith.constant 0 : i32
    %c0_i32_0 = arith.constant 0 : i32
    return %arg0, %c0_i32 : i32, i32
  }
  func.func @transform_1(%arg0: i32) -> (i32, i32) {
    %c0_i32 = arith.constant 0 : i32
    %c0_i32_0 = arith.constant 0 : i32
    %c0_i32_1 = arith.constant 0 : i32
    return %c0_i32, %c0_i32_0 : i32, i32
  }
  func.func @transform_2(%arg0: i32) -> (i32, i32, i32) {
    %c0_i32 = arith.constant 0 : i32
    %c0_i32_0 = arith.constant 0 : i32
    %c0_i32_1 = arith.constant 0 : i32
    %c0_i32_2 = arith.constant 0 : i32
    return %c0_i32, %c0_i32_0, %c0_i32_1 : i32, i32, i32
  }
  func.func @transform_3(%arg0: i32) -> (i32, i32) {
    %c0_i32 = arith.constant 0 : i32
    %c0_i32_0 = arith.constant 0 : i32
    %c0_i32_1 = arith.constant 0 : i32
    return %c0_i32, %c0_i32_0 : i32, i32
  }
  func.func @transform_4(%arg0: i32) -> (i32, i32) {
    %c0_i32 = arith.constant 0 : i32
    %c0_i32_0 = arith.constant 0 : i32
    %c0_i32_1 = arith.constant 0 : i32
    return %c0_i32, %c0_i32_0 : i32, i32
  }
  func.func @transform_5(%arg0: i32) -> (i32, i32) {
    %c0_i32 = arith.constant 0 : i32
    %c0_i32_0 = arith.constant 0 : i32
    %c0_i32_1 = arith.constant 0 : i32
    return %c0_i32, %c0_i32_0 : i32, i32
  }
  func.func @transform_6(%arg0: i32) -> (i32, i32) {
    %c0_i32 = arith.constant 0 : i32
    %c0_i32_0 = arith.constant 0 : i32
    return %arg0, %c0_i32 : i32, i32
  }
}

</mosaic_0001>

<bundles_post_ra>
// kernel: deform_forward.1
= control target key start
LH: loop header
LB: loop body
LE: loop exit
PB: predicated region body
PF: predicated region fallthrough
CT: control target
= control target key end

     0   :  { %v5971_v1 = vmov 0   ;;  %s7688_s1 = inlined_call_operand.vmem [shape: bf16[128,512], index: 1, kind: input, shape index: {}]   ;;  %s7689_s0 = inlined_call_operand.vmem [shape: bf16[256,128], index: 0, kind: input, shape index: {}]   ;;  %s7690_s2 = inlined_call_operand.vmem [shape: bf16[7,256,256], index: 2, kind: input, shape index: {}]   ;;  %s7691_s3 = inlined_call_operand.vmem [shape: f32[8,256], index: 3, kind: input, shape index: {}]   ;;  %s7692_s4 = inlined_call_operand.vmem [shape: bf16[256,128], index: 4, kind: input, shape index: {}]   ;;  %s7693_s5 = inlined_call_operand.vmem [shape: f32[1,128], index: 5, kind: input, shape index: {}]   ;;  %s7694_s6 = inlined_call_operand.vmem [shape: f32[256,128], index: 6, kind: output, shape index: {}]  }
   0x1   :  { %v5555_v0 = vld [vmem:[%s7688_s1 + $0x4] ss:$16 sps:$4 sm:$0xff]   ;;  %376 = vmatprep.mubr.bf16.mxu0 %v5971_v1  ;;  %569 = vmatprep.mubr.bf16.mxu1 %v5971_v1  ;;  %v5557_v2 = vld [vmem:[%s7688_s1] ss:$16 sps:$4 sm:$0xff]   ;;  %v6082_v23 = vld [vmem:[%s7689_s0 + $0x8] sm:$0xff]  }
   0x2   :  { %344 = vmatprep.subr.bf16.mxu0 %v5555_v0  ;;  %v5558_v3 = vld [vmem:[%s7688_s1 + $0x24] ss:$16 sps:$4 sm:$0xff]   ;;  %v5560_v4 = vld [vmem:[%s7688_s1 + $0x20] ss:$16 sps:$4 sm:$0xff]   ;;  %v6120_v33 = vld [vmem:[%s7689_s0 + $0x18] sm:$0xff]  }
   0x3   :  { %345 = vmatpush1.bf16.msra.mxu0 %v5557_v2  ;;  %v5561_v5 = vld [vmem:[%s7688_s1 + $0x44] ss:$16 sps:$4 sm:$0xff]   ;;  %v5563_v6 = vld [vmem:[%s7688_s1 + $0x40] ss:$16 sps:$4 sm:$0xff]   ;;  %v6158_v43 = vld [vmem:[%s7689_s0 + $0x28] sm:$0xff]  }
   0x4   :  { %346 = vmatprep.subr.bf16.mxu0 %v5558_v3  ;;  %v5564_v7 = vld [vmem:[%s7688_s1 + $0x64] ss:$16 sps:$4 sm:$0xff]   ;;  %v5566_v8 = vld [vmem:[%s7688_s1 + $0x60] ss:$16 sps:$4 sm:$0xff]   ;;  %v6196_v53 = vld [vmem:[%s7689_s0 + $0x38] sm:$0xff]  }
   0x5   :  { %v5567_v9 = vld [vmem:[%s7688_s1 + $0x84] ss:$16 sps:$4 sm:$0xff]   ;;  %v5569_v10 = vld [vmem:[%s7688_s1 + $0x80] ss:$16 sps:$4 sm:$0xff]   ;;  %v6213_v56 = vld [vmem:[%s7689_s0 + $0x48] sm:$0xff]  }
   0x6   :  { %v5570_v11 = vld [vmem:[%s7688_s1 + $0xa4] ss:$16 sps:$4 sm:$0xff]   ;;  %v5572_v12 = vld [vmem:[%s7688_s1 + $0xa0] ss:$16 sps:$4 sm:$0xff]   ;;  %v6227_v58 = vld [vmem:[%s7689_s0 + $0x58] sm:$0xff]  }
   0x7   :  { %347 = vmatpush1.bf16.msra.mxu0 %v5560_v4  ;;  %v5573_v13 = vld [vmem:[%s7688_s1 + $0xc4] ss:$16 sps:$4 sm:$0xff]   ;;  %v5575_v14 = vld [vmem:[%s7688_s1 + $0xc0] ss:$16 sps:$4 sm:$0xff]   ;;  %v6247_v62 = vld [vmem:[%s7689_s0 + $0x68] sm:$0xff]  }
   0x8   :  { %348 = vmatprep.subr.bf16.mxu0 %v5561_v5  ;;  %v5576_v15 = vld [vmem:[%s7688_s1 + $0xe4] ss:$16 sps:$4 sm:$0xff]   ;;  %v5578_v16 = vld [vmem:[%s7688_s1 + $0xe0] ss:$16 sps:$4 sm:$0xff]   ;;  %v6261_v0 = vld [vmem:[%s7689_s0 + $0x78] sm:$0xff]  }
   0x9   :  { %v5593_v17 = vld [vmem:[%s7690_s2 + $0x4] ss:$8 sps:$4 sm:$0xff]   ;;  %v5591_v19 = vld [vmem:[%s7690_s2] ss:$8 sps:$4 sm:$0xff]   ;;  %v5597_v20 = vld [vmem:[%s7690_s2 + $0x14] ss:$8 sps:$4 sm:$0xff]  }
   0xa   :  { %v6063_v18 = vld [vmem:[%s7689_s0] sm:$0xff]   ;;  %v5595_v21 = vld [vmem:[%s7690_s2 + $0x10] ss:$8 sps:$4 sm:$0xff]   ;;  %v5605_v25 = vld [vmem:[%s7690_s2 + $0x34] ss:$8 sps:$4 sm:$0xff]  }
   0xb   :  { %349 = vmatpush1.bf16.msra.mxu0 %v5563_v6  ;;  %v5601_v22 = vld [vmem:[%s7690_s2 + $0x24] ss:$8 sps:$4 sm:$0xff]   ;;  %v5599_v24 = vld [vmem:[%s7690_s2 + $0x20] ss:$8 sps:$4 sm:$0xff]   ;;  %v5603_v26 = vld [vmem:[%s7690_s2 + $0x30] ss:$8 sps:$4 sm:$0xff]  }
   0xc   :  { %350 = vmatprep.subr.bf16.mxu0 %v5564_v7  ;;  %v5609_v27 = vld [vmem:[%s7690_s2 + $0x44] ss:$8 sps:$4 sm:$0xff]   ;;  %v6101_v28 = vld [vmem:[%s7689_s0 + $0x10] sm:$0xff]   ;;  %v5607_v29 = vld [vmem:[%s7690_s2 + $0x40] ss:$8 sps:$4 sm:$0xff]  }
   0xd   :  { %v5612_v30 = vld [vmem:[%s7690_s2 + $0x54] ss:$8 sps:$4 sm:$0xff]   ;;  %v5610_v31 = vld [vmem:[%s7690_s2 + $0x50] ss:$8 sps:$4 sm:$0xff]   ;;  %v5615_v32 = vld [vmem:[%s7690_s2 + $0x64] ss:$8 sps:$4 sm:$0xff]  }
   0xe   :  { %v5613_v34 = vld [vmem:[%s7690_s2 + $0x60] ss:$8 sps:$4 sm:$0xff]   ;;  %v5618_v35 = vld [vmem:[%s7690_s2 + $0x74] ss:$8 sps:$4 sm:$0xff]   ;;  %v5616_v36 = vld [vmem:[%s7690_s2 + $0x70] ss:$8 sps:$4 sm:$0xff]  }
   0xf   :  { %351 = vmatpush1.bf16.msra.mxu0 %v5566_v8  ;;  %v5621_v37 = vld [vmem:[%s7690_s2 + $0x84] ss:$8 sps:$4 sm:$0xff]   ;;  %v5619_v39 = vld [vmem:[%s7690_s2 + $0x80] ss:$8 sps:$4 sm:$0xff]   ;;  %v5624_v40 = vld [vmem:[%s7690_s2 + $0x94] ss:$8 sps:$4 sm:$0xff]  }
  0x10   :  { %352 = vmatprep.subr.bf16.mxu0 %v5567_v9  ;;  %v6139_v38 = vld [vmem:[%s7689_s0 + $0x20] sm:$0xff]   ;;  %v5622_v41 = vld [vmem:[%s7690_s2 + $0x90] ss:$8 sps:$4 sm:$0xff]   ;;  %v5630_v45 = vld [vmem:[%s7690_s2 + $0xb4] ss:$8 sps:$4 sm:$0xff]  }
  0x11   :  { %v5627_v42 = vld [vmem:[%s7690_s2 + $0xa4] ss:$8 sps:$4 sm:$0xff]   ;;  %v5625_v44 = vld [vmem:[%s7690_s2 + $0xa0] ss:$8 sps:$4 sm:$0xff]   ;;  %v5628_v46 = vld [vmem:[%s7690_s2 + $0xb0] ss:$8 sps:$4 sm:$0xff]  }
  0x12   :  { %v5633_v47 = vld [vmem:[%s7690_s2 + $0xc4] ss:$8 sps:$4 sm:$0xff]   ;;  %v6177_v48 = vld [vmem:[%s7689_s0 + $0x30] sm:$0xff]   ;;  %v5631_v49 = vld [vmem:[%s7690_s2 + $0xc0] ss:$8 sps:$4 sm:$0xff]  }
  0x13   :  { %353 = vmatpush1.bf16.msra.mxu0 %v5569_v10  ;;  %v5636_v50 = vld [vmem:[%s7690_s2 + $0xd4] ss:$8 sps:$4 sm:$0xff]   ;;  %v5634_v51 = vld [vmem:[%s7690_s2 + $0xd0] ss:$8 sps:$4 sm:$0xff]   ;;  %v5639_v52 = vld [vmem:[%s7690_s2 + $0xe4] ss:$8 sps:$4 sm:$0xff]  }
  0x14   :  { %354 = vmatprep.subr.bf16.mxu0 %v5570_v11  ;;  %v5637_v54 = vld [vmem:[%s7690_s2 + $0xe0] ss:$8 sps:$4 sm:$0xff]   ;;  %v6220_v57 = vld [vmem:[%s7689_s0 + $0x50] sm:$0xff]   ;;  %v5643_v2 = vld [vmem:[%s7688_s1 + $0xc] ss:$16 sps:$4 sm:$0xff]  }
  0x15   :  { %v6206_v55 = vld [vmem:[%s7689_s0 + $0x40] sm:$0xff]   ;;  %v5642_v59 = vld [vmem:[%s7690_s2 + $0xf4] ss:$8 sps:$4 sm:$0xff]   ;;  %v5640_v60 = vld [vmem:[%s7690_s2 + $0xf0] ss:$8 sps:$4 sm:$0xff]   ;;  %537 = vmatprep.subr.bf16.mxu1 %v5643_v2 }
  0x16   :  { %v6240_v61 = vld [vmem:[%s7689_s0 + $0x60] sm:$0xff]   ;;  %v6254_v63 = vld [vmem:[%s7689_s0 + $0x70] sm:$0xff]   ;;  %v5645_v3 = vld [vmem:[%s7688_s1 + $0x8] ss:$16 sps:$4 sm:$0xff]  }
  0x17   :  { %355 = vmatpush1.bf16.msra.mxu0 %v5572_v12  ;;  %538 = vmatpush1.bf16.msra.mxu1 %v5645_v3  ;;  %v5646_v4 = vld [vmem:[%s7688_s1 + $0x2c] ss:$16 sps:$4 sm:$0xff]   ;;  %v5648_v5 = vld [vmem:[%s7688_s1 + $0x28] ss:$16 sps:$4 sm:$0xff]  }
  0x18   :  { %356 = vmatprep.subr.bf16.mxu0 %v5573_v13  ;;  %539 = vmatprep.subr.bf16.mxu1 %v5646_v4  ;;  %v5649_v6 = vld [vmem:[%s7688_s1 + $0x4c] ss:$16 sps:$4 sm:$0xff]   ;;  %v5651_v7 = vld [vmem:[%s7688_s1 + $0x48] ss:$16 sps:$4 sm:$0xff]  }
  0x19   :  { %v5652_v8 = vld [vmem:[%s7688_s1 + $0x6c] ss:$16 sps:$4 sm:$0xff]   ;;  %v5654_v9 = vld [vmem:[%s7688_s1 + $0x68] ss:$16 sps:$4 sm:$0xff]  }
  0x1a   :  { %v5655_v10 = vld [vmem:[%s7688_s1 + $0x8c] ss:$16 sps:$4 sm:$0xff]   ;;  %v5657_v11 = vld [vmem:[%s7688_s1 + $0x88] ss:$16 sps:$4 sm:$0xff]  }
  0x1b   :  { %357 = vmatpush1.bf16.msra.mxu0 %v5575_v14  ;;  %540 = vmatpush1.bf16.msra.mxu1 %v5648_v5  ;;  %v5658_v12 = vld [vmem:[%s7688_s1 + $0xac] ss:$16 sps:$4 sm:$0xff]   ;;  %v5660_v13 = vld [vmem:[%s7688_s1 + $0xa8] ss:$16 sps:$4 sm:$0xff]  }
  0x1c   :  { %358 = vmatprep.subr.bf16.mxu0 %v5576_v15  ;;  %541 = vmatprep.subr.bf16.mxu1 %v5649_v6  ;;  %v5661_v14 = vld [vmem:[%s7688_s1 + $0xcc] ss:$16 sps:$4 sm:$0xff]   ;;  %v5663_v15 = vld [vmem:[%s7688_s1 + $0xc8] ss:$16 sps:$4 sm:$0xff]  }
  0x1f   :  { %359 = vmatpush1.bf16.msra.mxu0 %v5578_v16  ;;  %542 = vmatpush1.bf16.msra.mxu1 %v5651_v7  ;;  %v5664_v16 = vld [vmem:[%s7688_s1 + $0xec] ss:$16 sps:$4 sm:$0xff]  }
  0x20   :  { %1171 = vmatprep.subr.bf16.mxu0 %v5593_v17  ;;  %543 = vmatprep.subr.bf16.mxu1 %v5652_v8  ;;  %v5666_v17 = vld [vmem:[%s7688_s1 + $0xe8] ss:$16 sps:$4 sm:$0xff]  }
  0x21   :  { %v5685_v8 = vld [vmem:[%s7690_s2 + $0x160] ss:$8 sps:$4 sm:$0xff]  }
  0x22   :  { %377 = vmatmul.mubr.bf16.vlgmr.msra.gmra.mrb[0].mxu0 %v6063_v18 }
  0x23   :  { %386 = vmatprep.mubr.bf16.mxu0 %v5971_v1  ;;  %1172 = vmatpush1.bf16.msra.mxu0 %v5591_v19  ;;  %v5667_v19 = vld [vmem:[%s7690_s2 + $0x100] ss:$8 sps:$4 sm:$0xff]  }
  0x24   :  { %1173 = vmatprep.subr.bf16.mxu0 %v5597_v20  ;;  %544 = vmatpush1.bf16.msra.mxu1 %v5654_v9  ;;  %v5669_v20 = vld [vmem:[%s7690_s2 + $0x104] ss:$8 sps:$4 sm:$0xff]  }
  0x25   :  { %545 = vmatprep.subr.bf16.mxu1 %v5655_v10 }
  0x27   :  { %1174 = vmatpush1.bf16.msra.mxu0 %v5595_v21  ;;  %v796_v21 = vlaneseq }
  0x28   :  { %1175 = vmatprep.subr.bf16.mxu0 %v5601_v22  ;;  %546 = vmatpush1.bf16.msra.mxu1 %v5657_v11  ;;  %v5672_v22 = vld [vmem:[%s7690_s2 + $0x114] ss:$8 sps:$4 sm:$0xff]  }
  0x29   :  { %547 = vmatprep.subr.bf16.mxu1 %v5658_v12 }
  0x2a   :  { %387 = vmatmul.mubr.bf16.gmra.mrb[4].mxu0 %v6082_v23 }
  0x2b   :  { %396 = vmatprep.mubr.bf16.mxu0 %v5971_v1  ;;  %1176 = vmatpush1.bf16.msra.mxu0 %v5599_v24  ;;  %v797_v24 = vshrl.u32 %v796_v21, 7 }
  0x2c   :  { %1177 = vmatprep.subr.bf16.mxu0 %v5605_v25  ;;  %548 = vmatpush1.bf16.msra.mxu1 %v5660_v13 }
  0x2d   :  { %549 = vmatprep.subr.bf16.mxu1 %v5661_v14  ;;  %v6328_v25 = vsub.s32 0, %v797_v24 }
  0x2f   :  { %1178 = vmatpush1.bf16.msra.mxu0 %v5603_v26  ;;  %v6334_v26 = vsub.s32 1, %v797_v24 }
  0x30   :  { %1179 = vmatprep.subr.bf16.mxu0 %v5609_v27  ;;  %550 = vmatpush1.bf16.msra.mxu1 %v5663_v15  ;;  %v5673_v27 = vld [vmem:[%s7690_s2 + $0x120] ss:$8 sps:$4 sm:$0xff]   ;;  %v5688_v15 = vld [vmem:[%s7690_s2 + $0x170] ss:$8 sps:$4 sm:$0xff]  }
  0x31   :  { %551 = vmatprep.subr.bf16.mxu1 %v5664_v16 }
  0x32   :  { %397 = vmatmul.mubr.bf16.gmra.mrb[8].mxu0 %v6101_v28 }
  0x33   :  { %406 = vmatprep.mubr.bf16.mxu0 %v5971_v1  ;;  %1180 = vmatpush1.bf16.msra.mxu0 %v5607_v29  ;;  %v5675_v29 = vld [vmem:[%s7690_s2 + $0x124] ss:$8 sps:$4 sm:$0xff]  }
  0x34   :  { %1181 = vmatprep.subr.bf16.mxu0 %v5612_v30  ;;  %552 = vmatpush1.bf16.msra.mxu1 %v5666_v17 }
  0x35   :  { %1666 = vmatprep.subr.bf16.mxu1 %v5669_v20 }
  0x37   :  { %1182 = vmatpush1.bf16.msra.mxu0 %v5610_v31  ;;  %570 = vmatmul.mubr.bf16.vlgmr.msra.gmra.mrb[0].mxu1 %v6063_v18  ;;  %v5670_v18 = vld [vmem:[%s7690_s2 + $0x110] ss:$8 sps:$4 sm:$0xff]  }
  0x38   :  { %1183 = vmatprep.subr.bf16.mxu0 %v5615_v32  ;;  %579 = vmatprep.mubr.bf16.mxu1 %v5971_v1  ;;  %v5676_v31 = vld [vmem:[%s7690_s2 + $0x130] ss:$8 sps:$4 sm:$0xff]   ;;  %v5678_v32 = vld [vmem:[%s7690_s2 + $0x134] ss:$8 sps:$4 sm:$0xff]  }
  0x39   :  { %1667 = vmatpush1.bf16.msra.mxu1 %v5667_v19  ;;  %v5693_v19 = vld [vmem:[%s7690_s2 + $0x184] ss:$8 sps:$4 sm:$0xff]  }
  0x3a   :  { %407 = vmatmul.mubr.bf16.gmra.mrb[12].mxu0 %v6120_v33  ;;  %1668 = vmatprep.subr.bf16.mxu1 %v5672_v22 }
  0x3b   :  { %416 = vmatprep.mubr.bf16.mxu0 %v5971_v1  ;;  %1184 = vmatpush1.bf16.msra.mxu0 %v5613_v34 }
  0x3c   :  { %1185 = vmatprep.subr.bf16.mxu0 %v5618_v35 }
  0x3d   :  { %1669 = vmatpush1.bf16.msra.mxu1 %v5670_v18 }
  0x3e   :  { %1670 = vmatprep.subr.bf16.mxu1 %v5675_v29 }
  0x3f   :  { %1186 = vmatpush1.bf16.msra.mxu0 %v5616_v36  ;;  %580 = vmatmul.mubr.bf16.gmra.mrb[4].mxu1 %v6082_v23  ;;  %v794_v23 = vld [vmem:[%s7691_s3] ss:$8 sm:$0x3] }
  0x40   :  { %1187 = vmatprep.subr.bf16.mxu0 %v5621_v37  ;;  %589 = vmatprep.mubr.bf16.mxu1 %v5971_v1  ;;  %v6344_v30 = vrot.slane %v794_v23, %v6328_v25 }
  0x41   :  { %1671 = vmatpush1.bf16.msra.mxu1 %v5673_v27  ;;  %v5691_v27 = vld [vmem:[%s7690_s2 + $0x180] ss:$8 sps:$4 sm:$0xff]  }
  0x42   :  { %417 = vmatmul.mubr.bf16.gmra.mrb[16].mxu0 %v6139_v38  ;;  %1672 = vmatprep.subr.bf16.mxu1 %v5678_v32 }
  0x43   :  { %426 = vmatprep.mubr.bf16.mxu0 %v5971_v1  ;;  %1188 = vmatpush1.bf16.msra.mxu0 %v5619_v39 }
  0x44   :  { %1189 = vmatprep.subr.bf16.mxu0 %v5624_v40 }
  0x45   :  { %1673 = vmatpush1.bf16.msra.mxu1 %v5676_v31 }
  0x47   :  { %1190 = vmatpush1.bf16.msra.mxu0 %v5622_v41  ;;  %590 = vmatmul.mubr.bf16.gmra.mrb[8].mxu1 %v6101_v28  ;;  %v6347_v28 = vrot.slane %v794_v23, %v6334_v26 }
  0x48   :  { %1191 = vmatprep.subr.bf16.mxu0 %v5627_v42  ;;  %599 = vmatprep.mubr.bf16.mxu1 %v5971_v1  ;;  %v5679_v42 = vld [vmem:[%s7690_s2 + $0x140] ss:$8 sps:$4 sm:$0xff]  }
  0x4a   :  { %427 = vmatmul.mubr.bf16.gmra.mrb[20].mxu0 %v6158_v43 }
  0x4b   :  { %436 = vmatprep.mubr.bf16.mxu0 %v5971_v1  ;;  %1192 = vmatpush1.bf16.msra.mxu0 %v5625_v44  ;;  %v5681_v44 = vld [vmem:[%s7690_s2 + $0x144] ss:$8 sps:$4 sm:$0xff]  }
  0x4c   :  { %1193 = vmatprep.subr.bf16.mxu0 %v5630_v45  ;;  %1674 = vmatprep.subr.bf16.mxu1 %v5681_v44 }
  0x4d   :  { %1675 = vmatpush1.bf16.msra.mxu1 %v5679_v42 }
  0x4f   :  { %1194 = vmatpush1.bf16.msra.mxu0 %v5628_v46  ;;  %600 = vmatmul.mubr.bf16.gmra.mrb[12].mxu1 %v6120_v33  ;;  %v5684_v33 = vld [vmem:[%s7690_s2 + $0x154] ss:$8 sps:$4 sm:$0xff]  }
  0x50   :  { %1195 = vmatprep.subr.bf16.mxu0 %v5633_v47  ;;  %609 = vmatprep.mubr.bf16.mxu1 %v5971_v1 }
  0x51   :  { %1676 = vmatprep.subr.bf16.mxu1 %v5684_v33 }
  0x52   :  { %437 = vmatmul.mubr.bf16.gmra.mrb[24].mxu0 %v6177_v48 }
  0x53   :  { %446 = vmatprep.mubr.bf16.mxu0 %v5971_v1  ;;  %1196 = vmatpush1.bf16.msra.mxu0 %v5631_v49 }
  0x54   :  { %1197 = vmatprep.subr.bf16.mxu0 %v5636_v50 }
  0x57   :  { %1198 = vmatpush1.bf16.msra.mxu0 %v5634_v51  ;;  %610 = vmatmul.mubr.bf16.gmra.mrb[16].mxu1 %v6139_v38  ;;  %v5690_v38 = vld [vmem:[%s7690_s2 + $0x174] ss:$8 sps:$4 sm:$0xff]  }
  0x58   :  { %1199 = vmatprep.subr.bf16.mxu0 %v5639_v52  ;;  %v5682_v52 = vld [vmem:[%s7690_s2 + $0x150] ss:$8 sps:$4 sm:$0xff]   ;;  %619 = vmatprep.mubr.bf16.mxu1 %v5971_v1 }
  0x59   :  { %1677 = vmatpush1.bf16.msra.mxu1 %v5682_v52 }
  0x5a   :  { %447 = vmatmul.mubr.bf16.gmra.mrb[28].mxu0 %v6196_v53 }
  0x5b   :  { %456 = vmatprep.mubr.bf16.mxu0 %v5971_v1  ;;  %1200 = vmatpush1.bf16.msra.mxu0 %v5637_v54 }
  0x5c   :  { %1201 = vmatprep.subr.bf16.mxu0 %v5642_v59 }
  0x5f   :  { %1202 = vmatpush1.bf16.msra.mxu0 %v5640_v60  ;;  %v5687_v60 = vld [vmem:[%s7690_s2 + $0x164] ss:$8 sps:$4 sm:$0xff]   ;;  %620 = vmatmul.mubr.bf16.gmra.mrb[20].mxu1 %v6158_v43  ;;  %v5696_v43 = vld [vmem:[%s7690_s2 + $0x194] ss:$8 sps:$4 sm:$0xff]  }
  0x60   :  { %1678 = vmatprep.subr.bf16.mxu1 %v5687_v60  ;;  %629 = vmatprep.mubr.bf16.mxu1 %v5971_v1 }
  0x61   :  { %1679 = vmatpush1.bf16.msra.mxu1 %v5685_v8 }
  0x62   :  { %457 = vmatmul.mubr.bf16.gmra.mrb[32].mxu0 %v6206_v55  ;;  %1680 = vmatprep.subr.bf16.mxu1 %v5690_v38 }
  0x63   :  { %466 = vmatprep.mubr.bf16.mxu0 %v5971_v1 }
  0x65   :  { %1681 = vmatpush1.bf16.msra.mxu1 %v5688_v15 }
  0x66   :  { %1682 = vmatprep.subr.bf16.mxu1 %v5693_v19  ;;  %v5706_v19 = vld [vmem:[%s7690_s2 + $0x1d0] ss:$8 sps:$4 sm:$0xff]  }
  0x67   :  { %630 = vmatmul.mubr.bf16.gmra.mrb[24].mxu1 %v6177_v48  ;;  %v5702_v48 = vld [vmem:[%s7690_s2 + $0x1b4] ss:$8 sps:$4 sm:$0xff]  }
  0x68   :  { %639 = vmatprep.mubr.bf16.mxu1 %v5971_v1 }
  0x69   :  { %1683 = vmatpush1.bf16.msra.mxu1 %v5691_v27 }
  0x6a   :  { %467 = vmatmul.mubr.bf16.gmra.mrb[36].mxu0 %v6213_v56  ;;  %1684 = vmatprep.subr.bf16.mxu1 %v5696_v43 }
  0x6b   :  { %476 = vmatprep.mubr.bf16.mxu0 %v5971_v1 }
  0x6f   :  { %640 = vmatmul.mubr.bf16.gmra.mrb[28].mxu1 %v6196_v53  ;;  %v5708_v53 = vld [vmem:[%s7690_s2 + $0x1d4] ss:$8 sps:$4 sm:$0xff]  }
  0x70   :  { %649 = vmatprep.mubr.bf16.mxu1 %v5971_v1 }
  0x72   :  { %477 = vmatmul.mubr.bf16.gmra.mrb[40].mxu0 %v6220_v57 }
  0x73   :  { %486 = vmatprep.mubr.bf16.mxu0 %v5971_v1 }
  0x77   :  { %650 = vmatmul.mubr.bf16.gmra.mrb[32].mxu1 %v6206_v55 }
  0x78   :  { %659 = vmatprep.mubr.bf16.mxu1 %v5971_v1 }
  0x7a   :  { %487 = vmatmul.mubr.bf16.gmra.mrb[44].mxu0 %v6227_v58 }
  0x7b   :  { %496 = vmatprep.mubr.bf16.mxu0 %v5971_v1 }
  0x7f   :  { %660 = vmatmul.mubr.bf16.gmra.mrb[36].mxu1 %v6213_v56 }
  0x80   :  { %669 = vmatprep.mubr.bf16.mxu1 %v5971_v1 }
  0x82   :  { %497 = vmatmul.mubr.bf16.gmra.mrb[48].mxu0 %v6240_v61 }
  0x83   :  { %506 = vmatprep.mubr.bf16.mxu0 %v5971_v1 }
  0x87   :  { %670 = vmatmul.mubr.bf16.gmra.mrb[40].mxu1 %v6220_v57 }
  0x88   :  { %679 = vmatprep.mubr.bf16.mxu1 %v5971_v1 }
  0x8a   :  { %507 = vmatmul.mubr.bf16.gmra.mrb[52].mxu0 %v6247_v62 }
  0x8b   :  { %516 = vmatprep.mubr.bf16.mxu0 %v5971_v1 }
  0x8f   :  { %680 = vmatmul.mubr.bf16.gmra.mrb[44].mxu1 %v6227_v58 }
  0x90   :  { %689 = vmatprep.mubr.bf16.mxu1 %v5971_v1 }
  0x92   :  { %517 = vmatmul.mubr.bf16.gmra.mrb[56].mxu0 %v6254_v63 }
  0x93   :  { %526 = vmatprep.mubr.bf16.mxu0 %v5971_v1 }
  0x97   :  { %690 = vmatmul.mubr.bf16.gmra.mrb[48].mxu1 %v6240_v61 }
  0x98   :  { %699 = vmatprep.mubr.bf16.mxu1 %v5971_v1 }
  0x9a   :  { %527 = vmatmul.mubr.bf16.gmra.mrb[60].mxu0 %v6261_v0 }
  0x9f   :  { %700 = vmatmul.mubr.bf16.gmra.mrb[52].mxu1 %v6247_v62 }
  0xa0   :  { %709 = vmatprep.mubr.bf16.mxu1 %v5971_v1 }
  0xa7   :  { %710 = vmatmul.mubr.bf16.gmra.mrb[56].mxu1 %v6254_v63 }
  0xa8   :  { %719 = vmatprep.mubr.bf16.mxu1 %v5971_v1 }
  0xaf   :  { %720 = vmatmul.mubr.bf16.gmra.mrb[60].mxu1 %v6261_v0 }
  0xf5   :  { %v378_v34 = vpop.f32.mrb[0].mxu0 }
  0xf6   :  { %v806_v35 = vadd.f32 %v6344_v30, %v378_v34  ;;  %v380_v36 = vpop.f32.mrb[1].mxu0 }
  0xf7   :  { %v807_v37 = vadd.f32 %v6347_v28, %v380_v36  ;;  %v382_v39 = vpop.f32.mrb[2].mxu0 }
  0xf8   :  { %v808_v40 = vadd.f32 %v6344_v30, %v382_v39  ;;  %v384_v41 = vpop.f32.mrb[3].mxu0  ;;  %v870_v46 = vmax.f32 %v806_v35, 0.0 }
  0xf9   :  { %v809_v45 = vadd.f32 %v6347_v28, %v384_v41  ;;  %v871_v49 = vmax.f32 %v807_v37, 0.0  ;;  %v5694_v37 = vld [vmem:[%s7690_s2 + $0x190] ss:$8 sps:$4 sm:$0xff]   ;;  %v5699_v41 = vld [vmem:[%s7690_s2 + $0x1a4] ss:$8 sps:$4 sm:$0xff]  }
  0xfa   :  { %v872_v47 = vmax.f32 %v808_v40, 0.0  ;;  %1685 = vmatpush1.bf16.msra.mxu1 %v5694_v37 }
  0xfb   :  { %v873_v50 = vmax.f32 %v809_v45, 0.0  ;;  %1686 = vmatprep.subr.bf16.mxu1 %v5699_v41 }
  0xfc   :  { %v934_v51 = vpack.c.bf16 %v872_v47, %v870_v46 }
  0xfd   :  { %v388_v54 = vpop.f32.mrb[4].mxu0  ;;  %v935_v59 = vpack.c.bf16 %v873_v50, %v871_v49  ;;  %v5697_v49 = vld [vmem:[%s7690_s2 + $0x1a0] ss:$8 sps:$4 sm:$0xff]  }
  0xfe   :  { %v810_v2 = vadd.f32 %v6344_v30, %v388_v54  ;;  %v390_v3 = vpop.f32.mrb[5].mxu0  ;;  %1687 = vmatpush1.bf16.msra.mxu1 %v5697_v49 }
  0xff   :  { %v811_v4 = vadd.f32 %v6347_v28, %v390_v3  ;;  %v392_v5 = vpop.f32.mrb[6].mxu0  ;;  %1203 = vmatprep.mubr.bf16.mxu0 %v935_v59  ;;  %1688 = vmatprep.subr.bf16.mxu1 %v5702_v48 }
 0x100   :  { %v812_v6 = vadd.f32 %v6344_v30, %v392_v5  ;;  %v394_v7 = vpop.f32.mrb[7].mxu0  ;;  %1204 = vmatmul.mubr.bf16.vlgmr.msra.gmra.mrb[64].mxu0 %v934_v51  ;;  %v874_v10 = vmax.f32 %v810_v2, 0.0  ;;  %v5700_v2 = vld [vmem:[%s7690_s2 + $0x1b0] ss:$8 sps:$4 sm:$0xff]   ;;  %v5705_v5 = vld [vmem:[%s7690_s2 + $0x1c4] ss:$8 sps:$4 sm:$0xff]  }
 0x101   :  { %v813_v9 = vadd.f32 %v6347_v28, %v394_v7  ;;  %v875_v12 = vmax.f32 %v811_v4, 0.0 }
 0x102   :  { %v876_v11 = vmax.f32 %v812_v6, 0.0  ;;  %1689 = vmatpush1.bf16.msra.mxu1 %v5700_v2 }
 0x103   :  { %v877_v13 = vmax.f32 %v813_v9, 0.0  ;;  %1690 = vmatprep.subr.bf16.mxu1 %v5705_v5 }
 0x104   :  { %v936_v14 = vpack.c.bf16 %v876_v11, %v874_v10  ;;  %v5703_v11 = vld [vmem:[%s7690_s2 + $0x1c0] ss:$8 sps:$4 sm:$0xff]  }
 0x105   :  { %v398_v16 = vpop.f32.mrb[8].mxu0  ;;  %v937_v17 = vpack.c.bf16 %v877_v13, %v875_v12 }
 0x106   :  { %v814_v20 = vadd.f32 %v6344_v30, %v398_v16  ;;  %v400_v21 = vpop.f32.mrb[9].mxu0  ;;  %1691 = vmatpush1.bf16.msra.mxu1 %v5703_v11 }
 0x107   :  { %v815_v18 = vadd.f32 %v6347_v28, %v400_v21  ;;  %v402_v22 = vpop.f32.mrb[10].mxu0  ;;  %1213 = vmatprep.mubr.bf16.mxu0 %v937_v17  ;;  %1692 = vmatprep.subr.bf16.mxu1 %v5708_v53 }
 0x108   :  { %v816_v24 = vadd.f32 %v6344_v30, %v402_v22  ;;  %v404_v23 = vpop.f32.mrb[11].mxu0  ;;  %1214 = vmatmul.mubr.bf16.gmra.mrb[68].mxu0 %v936_v14  ;;  %v878_v31 = vmax.f32 %v814_v20, 0.0 }
 0x109   :  { %v817_v29 = vadd.f32 %v6347_v28, %v404_v23  ;;  %v879_v34 = vmax.f32 %v815_v18, 0.0  ;;  %v5711_v18 = vld [vmem:[%s7690_s2 + $0x1e4] ss:$8 sps:$4 sm:$0xff]  }
 0x10a   :  { %v880_v32 = vmax.f32 %v816_v24, 0.0  ;;  %1693 = vmatpush1.bf16.msra.mxu1 %v5706_v19 }
 0x10b   :  { %v881_v35 = vmax.f32 %v817_v29, 0.0  ;;  %1694 = vmatprep.subr.bf16.mxu1 %v5711_v18 }
 0x10c   :  { %v938_v36 = vpack.c.bf16 %v880_v32, %v878_v31  ;;  %v5709_v31 = vld [vmem:[%s7690_s2 + $0x1e0] ss:$8 sps:$4 sm:$0xff]  }
 0x10d   :  { %v408_v39 = vpop.f32.mrb[12].mxu0  ;;  %v939_v40 = vpack.c.bf16 %v881_v35, %v879_v34 }
 0x10e   :  { %v818_v42 = vadd.f32 %v6344_v30, %v408_v39  ;;  %v410_v44 = vpop.f32.mrb[13].mxu0  ;;  %1695 = vmatpush1.bf16.msra.mxu1 %v5709_v31 }
 0x10f   :  { %v819_v45 = vadd.f32 %v6347_v28, %v410_v44  ;;  %v412_v33 = vpop.f32.mrb[14].mxu0  ;;  %1223 = vmatprep.mubr.bf16.mxu0 %v939_v40 }
 0x110   :  { %v820_v46 = vadd.f32 %v6344_v30, %v412_v33  ;;  %v414_v47 = vpop.f32.mrb[15].mxu0  ;;  %1224 = vmatmul.mubr.bf16.gmra.mrb[72].mxu0 %v938_v36  ;;  %v882_v51 = vmax.f32 %v818_v42, 0.0 }
 0x111   :  { %v821_v50 = vadd.f32 %v6347_v28, %v414_v47  ;;  %v883_v54 = vmax.f32 %v819_v45, 0.0 }
 0x112   :  { %v884_v52 = vmax.f32 %v820_v46, 0.0 }
 0x113   :  { %v885_v59 = vmax.f32 %v821_v50, 0.0 }
 0x114   :  { %v940_v60 = vpack.c.bf16 %v884_v52, %v882_v51 }
 0x115   :  { %v418_v3 = vpop.f32.mrb[16].mxu0  ;;  %v941_v4 = vpack.c.bf16 %v885_v59, %v883_v54 }
 0x116   :  { %v822_v6 = vadd.f32 %v6344_v30, %v418_v3  ;;  %v420_v7 = vpop.f32.mrb[17].mxu0 }
 0x117   :  { %v823_v8 = vadd.f32 %v6347_v28, %v420_v7  ;;  %v422_v9 = vpop.f32.mrb[18].mxu0  ;;  %1233 = vmatprep.mubr.bf16.mxu0 %v941_v4 }
 0x118   :  { %v824_v38 = vadd.f32 %v6344_v30, %v422_v9  ;;  %v424_v10 = vpop.f32.mrb[19].mxu0  ;;  %1234 = vmatmul.mubr.bf16.gmra.mrb[76].mxu0 %v940_v60  ;;  %v886_v13 = vmax.f32 %v822_v6, 0.0 }
 0x119   :  { %v825_v12 = vadd.f32 %v6347_v28, %v424_v10  ;;  %v887_v15 = vmax.f32 %v823_v8, 0.0 }
 0x11a   :  { %v888_v14 = vmax.f32 %v824_v38, 0.0 }
 0x11b   :  { %v889_v16 = vmax.f32 %v825_v12, 0.0 }
 0x11c   :  { %v942_v17 = vpack.c.bf16 %v888_v14, %v886_v13 }
 0x11d   :  { %v428_v20 = vpop.f32.mrb[20].mxu0  ;;  %v943_v21 = vpack.c.bf16 %v889_v16, %v887_v15 }
 0x11e   :  { %v826_v22 = vadd.f32 %v6344_v30, %v428_v20  ;;  %v430_v24 = vpop.f32.mrb[21].mxu0 }
 0x11f   :  { %v827_v23 = vadd.f32 %v6347_v28, %v430_v24  ;;  %v432_v27 = vpop.f32.mrb[22].mxu0  ;;  %1243 = vmatprep.mubr.bf16.mxu0 %v943_v21 }
 0x120   :  { %v828_v29 = vadd.f32 %v6344_v30, %v432_v27  ;;  %v434_v43 = vpop.f32.mrb[23].mxu0  ;;  %1244 = vmatmul.mubr.bf16.gmra.mrb[80].mxu0 %v942_v17  ;;  %v890_v34 = vmax.f32 %v826_v22, 0.0 }
 0x121   :  { %v829_v32 = vadd.f32 %v6347_v28, %v434_v43  ;;  %v891_v35 = vmax.f32 %v827_v23, 0.0 }
 0x122   :  { %v892_v55 = vmax.f32 %v828_v29, 0.0 }
 0x123   :  { %v893_v36 = vmax.f32 %v829_v32, 0.0 }
 0x124   :  { %v944_v37 = vpack.c.bf16 %v892_v55, %v890_v34 }
 0x125   :  { %v438_v39 = vpop.f32.mrb[24].mxu0  ;;  %v945_v40 = vpack.c.bf16 %v893_v36, %v891_v35 }
 0x126   :  { %v830_v41 = vadd.f32 %v6344_v30, %v438_v39  ;;  %v440_v42 = vpop.f32.mrb[25].mxu0 }
 0x127   :  { %v831_v44 = vadd.f32 %v6347_v28, %v440_v42  ;;  %v442_v45 = vpop.f32.mrb[26].mxu0  ;;  %1253 = vmatprep.mubr.bf16.mxu0 %v945_v40 }
 0x128   :  { %v832_v33 = vadd.f32 %v6344_v30, %v442_v45  ;;  %v444_v46 = vpop.f32.mrb[27].mxu0  ;;  %1254 = vmatmul.mubr.bf16.gmra.mrb[84].mxu0 %v944_v37  ;;  %v894_v49 = vmax.f32 %v830_v41, 0.0 }
 0x129   :  { %v833_v47 = vadd.f32 %v6347_v28, %v444_v46  ;;  %v895_v48 = vmax.f32 %v831_v44, 0.0 }
 0x12a   :  { %v896_v50 = vmax.f32 %v832_v33, 0.0 }
 0x12b   :  { %v897_v51 = vmax.f32 %v833_v47, 0.0 }
 0x12c   :  { %v946_v52 = vpack.c.bf16 %v896_v50, %v894_v49 }
 0x12d   :  { %v448_v54 = vpop.f32.mrb[28].mxu0  ;;  %v947_v59 = vpack.c.bf16 %v897_v51, %v895_v48 }
 0x12e   :  { %v834_v56 = vadd.f32 %v6344_v30, %v448_v54  ;;  %v450_v60 = vpop.f32.mrb[29].mxu0 }
 0x12f   :  { %v835_v2 = vadd.f32 %v6347_v28, %v450_v60  ;;  %v452_v3 = vpop.f32.mrb[30].mxu0  ;;  %1263 = vmatprep.mubr.bf16.mxu0 %v947_v59 }
 0x130   :  { %v836_v4 = vadd.f32 %v6344_v30, %v452_v3  ;;  %v454_v5 = vpop.f32.mrb[31].mxu0  ;;  %1264 = vmatmul.mubr.bf16.gmra.mrb[88].mxu0 %v946_v52  ;;  %v898_v7 = vmax.f32 %v834_v56, 0.0 }
 0x131   :  { %v837_v6 = vadd.f32 %v6347_v28, %v454_v5  ;;  %v899_v9 = vmax.f32 %v835_v2, 0.0 }
 0x132   :  { %v900_v8 = vmax.f32 %v836_v4, 0.0 }
 0x133   :  { %v901_v38 = vmax.f32 %v837_v6, 0.0 }
 0x134   :  { %v948_v10 = vpack.c.bf16 %v900_v8, %v898_v7 }
 0x135   :  { %v458_v11 = vpop.f32.mrb[32].mxu0  ;;  %v949_v12 = vpack.c.bf16 %v901_v38, %v899_v9 }
 0x136   :  { %v838_v57 = vadd.f32 %v6344_v30, %v458_v11  ;;  %v460_v53 = vpop.f32.mrb[33].mxu0 }
 0x137   :  { %v839_v13 = vadd.f32 %v6347_v28, %v460_v53  ;;  %v462_v14 = vpop.f32.mrb[34].mxu0  ;;  %1273 = vmatprep.mubr.bf16.mxu0 %v949_v12 }
 0x138   :  { %v840_v15 = vadd.f32 %v6344_v30, %v462_v14  ;;  %v464_v16 = vpop.f32.mrb[35].mxu0  ;;  %1274 = vmatmul.mubr.bf16.gmra.mrb[92].mxu0 %v948_v10  ;;  %v902_v19 = vmax.f32 %v838_v57, 0.0  ;;  %v5714_v14 = vld [vmem:[%s7690_s2 + $0x1f4] ss:$8 sps:$4 sm:$0xff]  }
 0x139   :  { %v841_v17 = vadd.f32 %v6347_v28, %v464_v16  ;;  %v903_v21 = vmax.f32 %v839_v13, 0.0  ;;  %v5712_v16 = vld [vmem:[%s7690_s2 + $0x1f0] ss:$8 sps:$4 sm:$0xff]   ;;  %1696 = vmatprep.subr.bf16.mxu1 %v5714_v14  ;;  %v5726_v14 = vld [vmem:[%s7690_s2 + $0x234] ss:$8 sps:$4 sm:$0xff]  }
 0x13a   :  { %v904_v20 = vmax.f32 %v840_v15, 0.0  ;;  %1697 = vmatpush1.bf16.msra.mxu1 %v5712_v16 }
 0x13b   :  { %v905_v18 = vmax.f32 %v841_v17, 0.0 }
 0x13c   :  { %v950_v22 = vpack.c.bf16 %v904_v20, %v902_v19 }
 0x13d   :  { %v468_v24 = vpop.f32.mrb[36].mxu0  ;;  %v951_v23 = vpack.c.bf16 %v905_v18, %v903_v21 }
 0x13e   :  { %v842_v58 = vadd.f32 %v6344_v30, %v468_v24  ;;  %v470_v27 = vpop.f32.mrb[37].mxu0 }
 0x13f   :  { %v843_v29 = vadd.f32 %v6347_v28, %v470_v27  ;;  %v472_v43 = vpop.f32.mrb[38].mxu0  ;;  %1283 = vmatprep.mubr.bf16.mxu0 %v951_v23 }
 0x140   :  { %v844_v31 = vadd.f32 %v6344_v30, %v472_v43  ;;  %v474_v32 = vpop.f32.mrb[39].mxu0  ;;  %1284 = vmatmul.mubr.bf16.gmra.mrb[96].mxu0 %v950_v22  ;;  %v906_v55 = vmax.f32 %v842_v58, 0.0 }
 0x141   :  { %v845_v34 = vadd.f32 %v6347_v28, %v474_v32  ;;  %v907_v36 = vmax.f32 %v843_v29, 0.0 }
 0x142   :  { %v908_v35 = vmax.f32 %v844_v31, 0.0 }
 0x143   :  { %v909_v37 = vmax.f32 %v845_v34, 0.0 }
 0x144   :  { %v952_v39 = vpack.c.bf16 %v908_v35, %v906_v55 }
 0x145   :  { %v478_v40 = vpop.f32.mrb[40].mxu0  ;;  %v953_v41 = vpack.c.bf16 %v909_v37, %v907_v36 }
 0x146   :  { %v846_v61 = vadd.f32 %v6344_v30, %v478_v40  ;;  %v480_v42 = vpop.f32.mrb[41].mxu0 }
 0x147   :  { %v847_v44 = vadd.f32 %v6347_v28, %v480_v42  ;;  %v482_v45 = vpop.f32.mrb[42].mxu0  ;;  %1293 = vmatprep.mubr.bf16.mxu0 %v953_v41 }
 0x148   :  { %v848_v33 = vadd.f32 %v6344_v30, %v482_v45  ;;  %v484_v46 = vpop.f32.mrb[43].mxu0  ;;  %1294 = vmatmul.mubr.bf16.gmra.mrb[100].mxu0 %v952_v39  ;;  %v910_v49 = vmax.f32 %v846_v61, 0.0 }
 0x149   :  { %v849_v47 = vadd.f32 %v6347_v28, %v484_v46  ;;  %v911_v48 = vmax.f32 %v847_v44, 0.0 }
 0x14a   :  { %v912_v50 = vmax.f32 %v848_v33, 0.0 }
 0x14b   :  { %v913_v51 = vmax.f32 %v849_v47, 0.0 }
 0x14c   :  { %v954_v52 = vpack.c.bf16 %v912_v50, %v910_v49 }
 0x14d   :  { %v488_v54 = vpop.f32.mrb[44].mxu0  ;;  %v955_v59 = vpack.c.bf16 %v913_v51, %v911_v48 }
 0x14e   :  { %v850_v62 = vadd.f32 %v6344_v30, %v488_v54  ;;  %v490_v56 = vpop.f32.mrb[45].mxu0 }
 0x14f   :  { %v851_v60 = vadd.f32 %v6347_v28, %v490_v56  ;;  %v492_v2 = vpop.f32.mrb[46].mxu0  ;;  %1303 = vmatprep.mubr.bf16.mxu0 %v955_v59 }
 0x150   :  { %v852_v3 = vadd.f32 %v6344_v30, %v492_v2  ;;  %v494_v4 = vpop.f32.mrb[47].mxu0  ;;  %1304 = vmatmul.mubr.bf16.gmra.mrb[104].mxu0 %v954_v52  ;;  %v914_v6 = vmax.f32 %v850_v62, 0.0 }
 0x151   :  { %v853_v5 = vadd.f32 %v6347_v28, %v494_v4  ;;  %v915_v8 = vmax.f32 %v851_v60, 0.0 }
 0x152   :  { %v916_v7 = vmax.f32 %v852_v3, 0.0 }
 0x153   :  { %v917_v9 = vmax.f32 %v853_v5, 0.0 }
 0x154   :  { %v956_v38 = vpack.c.bf16 %v916_v7, %v914_v6 }
 0x155   :  { %v498_v10 = vpop.f32.mrb[48].mxu0  ;;  %v957_v11 = vpack.c.bf16 %v917_v9, %v915_v8 }
 0x156   :  { %v854_v63 = vadd.f32 %v6344_v30, %v498_v10  ;;  %v500_v12 = vpop.f32.mrb[49].mxu0  ;;  %v5720_v10 = vld [vmem:[%s7690_s2 + $0x214] ss:$8 sps:$4 sm:$0xff]  }
 0x157   :  { %v855_v1 = vadd.f32 %v6347_v28, %v500_v12  ;;  %v502_v57 = vpop.f32.mrb[50].mxu0  ;;  %1313 = vmatprep.mubr.bf16.mxu0 %v957_v11  ;;  %v4938_v11 = vld [vmem:[%s7691_s3 + $0x1] ss:$8 sm:$0x3]  ;;  %v5723_v12 = vld [vmem:[%s7690_s2 + $0x224] ss:$8 sps:$4 sm:$0xff]  }
 0x158   :  { %v856_v53 = vadd.f32 %v6344_v30, %v502_v57  ;;  %v504_v13 = vpop.f32.mrb[51].mxu0  ;;  %1314 = vmatmul.mubr.bf16.gmra.mrb[108].mxu0 %v956_v38  ;;  %v918_v17 = vmax.f32 %v854_v63, 0.0  ;;  %v5715_v38 = vld [vmem:[%s7690_s2 + $0x200] ss:$8 sps:$4 sm:$0xff]   ;;  %v6541_v57 = vrot.slane %v4938_v11, %v6334_v26 }
 0x159   :  { %v857_v15 = vadd.f32 %v6347_v28, %v504_v13  ;;  %v919_v19 = vmax.f32 %v855_v1, 0.0  ;;  %v5721_v63 = vld [vmem:[%s7690_s2 + $0x220] ss:$8 sps:$4 sm:$0xff]   ;;  %v6538_v1 = vrot.slane %v4938_v11, %v6328_v25  ;;  %v5724_v13 = vld [vmem:[%s7690_s2 + $0x230] ss:$8 sps:$4 sm:$0xff]  }
 0x15a   :  { %v920_v0 = vmax.f32 %v856_v53, 0.0  ;;  %v5747_v11 = vld [vmem:[%s7690_s2 + $0x2a4] ss:$8 sps:$4 sm:$0xff]  }
 0x15b   :  { %v921_v20 = vmax.f32 %v857_v15, 0.0 }
 0x15c   :  { %v958_v21 = vpack.c.bf16 %v920_v0, %v918_v17 }
 0x15d   :  { %v508_v18 = vpop.f32.mrb[52].mxu0  ;;  %v959_v22 = vpack.c.bf16 %v921_v20, %v919_v19 }
 0x15e   :  { %v858_v24 = vadd.f32 %v6344_v30, %v508_v18  ;;  %v510_v23 = vpop.f32.mrb[53].mxu0  ;;  %v5729_v18 = vld [vmem:[%s7690_s2 + $0x244] ss:$8 sps:$4 sm:$0xff]  }
 0x15f   :  { %v859_v58 = vadd.f32 %v6347_v28, %v510_v23  ;;  %v512_v27 = vpop.f32.mrb[54].mxu0  ;;  %1323 = vmatprep.mubr.bf16.mxu0 %v959_v22 }
 0x160   :  { %v860_v29 = vadd.f32 %v6344_v30, %v512_v27  ;;  %v514_v43 = vpop.f32.mrb[55].mxu0  ;;  %1324 = vmatmul.mubr.bf16.gmra.mrb[112].mxu0 %v958_v21  ;;  %v922_v32 = vmax.f32 %v858_v24, 0.0  ;;  %v5727_v21 = vld [vmem:[%s7690_s2 + $0x240] ss:$8 sps:$4 sm:$0xff]   ;;  %v5732_v24 = vld [vmem:[%s7690_s2 + $0x254] ss:$8 sps:$4 sm:$0xff]  }
 0x161   :  { %v861_v31 = vadd.f32 %v6347_v28, %v514_v43  ;;  %v923_v55 = vmax.f32 %v859_v58, 0.0 }
 0x162   :  { %v924_v34 = vmax.f32 %v860_v29, 0.0 }
 0x163   :  { %v925_v35 = vmax.f32 %v861_v31, 0.0  ;;  %v5730_v31 = vld [vmem:[%s7690_s2 + $0x250] ss:$8 sps:$4 sm:$0xff]  }
 0x164   :  { %v960_v36 = vpack.c.bf16 %v924_v34, %v922_v32 }
 0x165   :  { %v518_v37 = vpop.f32.mrb[56].mxu0  ;;  %v961_v39 = vpack.c.bf16 %v925_v35, %v923_v55  ;;  %v5735_v55 = vld [vmem:[%s7690_s2 + $0x264] ss:$8 sps:$4 sm:$0xff]  }
 0x166   :  { %v862_v40 = vadd.f32 %v6344_v30, %v518_v37  ;;  %v520_v41 = vpop.f32.mrb[57].mxu0 }
 0x167   :  { %v863_v61 = vadd.f32 %v6347_v28, %v520_v41  ;;  %v522_v42 = vpop.f32.mrb[58].mxu0  ;;  %1333 = vmatprep.mubr.bf16.mxu0 %v961_v39 }
 0x168   :  { %v864_v44 = vadd.f32 %v6344_v30, %v522_v42  ;;  %v524_v45 = vpop.f32.mrb[59].mxu0  ;;  %1334 = vmatmul.mubr.bf16.gmra.mrb[116].mxu0 %v960_v36  ;;  %v926_v46 = vmax.f32 %v862_v40, 0.0 }
 0x169   :  { %v865_v33 = vadd.f32 %v6347_v28, %v524_v45  ;;  %v927_v49 = vmax.f32 %v863_v61, 0.0  ;;  %v5733_v61 = vld [vmem:[%s7690_s2 + $0x260] ss:$8 sps:$4 sm:$0xff]  }
 0x16a   :  { %v928_v47 = vmax.f32 %v864_v44, 0.0  ;;  %v5738_v44 = vld [vmem:[%s7690_s2 + $0x274] ss:$8 sps:$4 sm:$0xff]  }
 0x16b   :  { %v929_v50 = vmax.f32 %v865_v33, 0.0 }
 0x16c   :  { %v962_v48 = vpack.c.bf16 %v928_v47, %v926_v46 }
 0x16d   :  { %v528_v51 = vpop.f32.mrb[60].mxu0  ;;  %v963_v52 = vpack.c.bf16 %v929_v50, %v927_v49  ;;  %v5736_v50 = vld [vmem:[%s7690_s2 + $0x270] ss:$8 sps:$4 sm:$0xff]  }
 0x16e   :  { %v866_v54 = vadd.f32 %v6344_v30, %v528_v51  ;;  %v530_v59 = vpop.f32.mrb[61].mxu0 }
 0x16f   :  { %v867_v62 = vadd.f32 %v6347_v28, %v530_v59  ;;  %v532_v56 = vpop.f32.mrb[62].mxu0  ;;  %1343 = vmatprep.mubr.bf16.mxu0 %v963_v52  ;;  %v5741_v52 = vld [vmem:[%s7690_s2 + $0x284] ss:$8 sps:$4 sm:$0xff]  }
 0x170   :  { %v868_v60 = vadd.f32 %v6344_v30, %v532_v56  ;;  %v534_v2 = vpop.f32.mrb[63].mxu0  ;;  %1344 = vmatmul.mubr.bf16.gmra.mrb[120].mxu0 %v962_v48  ;;  %v930_v4 = vmax.f32 %v866_v54, 0.0  ;;  %v5717_v30 = vld [vmem:[%s7690_s2 + $0x204] ss:$8 sps:$4 sm:$0xff]  }
 0x171   :  { %v869_v3 = vadd.f32 %v6347_v28, %v534_v2  ;;  %v931_v6 = vmax.f32 %v867_v62, 0.0  ;;  %2161 = vmatprep.subr.bf16.mxu0 %v5717_v30  ;;  %v5718_v28 = vld [vmem:[%s7690_s2 + $0x210] ss:$8 sps:$4 sm:$0xff]  }
 0x172   :  { %v932_v5 = vmax.f32 %v868_v60, 0.0  ;;  %2162 = vmatpush1.bf16.msra.mxu0 %v5715_v38  ;;  %v5742_v30 = vld [vmem:[%s7690_s2 + $0x290] ss:$8 sps:$4 sm:$0xff]  }
 0x173   :  { %v933_v7 = vmax.f32 %v869_v3, 0.0  ;;  %2163 = vmatprep.subr.bf16.mxu0 %v5720_v10  ;;  %v5739_v3 = vld [vmem:[%s7690_s2 + $0x280] ss:$8 sps:$4 sm:$0xff]  }
 0x174   :  { %v964_v8 = vpack.c.bf16 %v932_v5, %v930_v4  ;;  %v5744_v5 = vld [vmem:[%s7690_s2 + $0x294] ss:$8 sps:$4 sm:$0xff]  }
 0x175   :  { %v965_v9 = vpack.c.bf16 %v933_v7, %v931_v6 }
 0x176   :  { %2164 = vmatpush1.bf16.msra.mxu0 %v5718_v28 }
 0x177   :  { %1353 = vmatprep.mubr.bf16.mxu0 %v965_v9  ;;  %2165 = vmatprep.subr.bf16.mxu0 %v5723_v12 }
 0x178   :  { %1354 = vmatmul.mubr.bf16.gmra.mrb[124].mxu0 %v964_v8 }
 0x17a   :  { %2166 = vmatpush1.bf16.msra.mxu0 %v5721_v63 }
 0x17b   :  { %2167 = vmatprep.subr.bf16.mxu0 %v5726_v14 }
 0x17e   :  { %2168 = vmatpush1.bf16.msra.mxu0 %v5724_v13 }
 0x17f   :  { %2169 = vmatprep.subr.bf16.mxu0 %v5729_v18 }
 0x182   :  { %2170 = vmatpush1.bf16.msra.mxu0 %v5727_v21 }
 0x183   :  { %2171 = vmatprep.subr.bf16.mxu0 %v5732_v24  ;;  %v5748_v24 = vld [vmem:[%s7690_s2 + $0x2b0] ss:$8 sps:$4 sm:$0xff]  }
 0x186   :  { %2172 = vmatpush1.bf16.msra.mxu0 %v5730_v31 }
 0x187   :  { %2173 = vmatprep.subr.bf16.mxu0 %v5735_v55 }
 0x18a   :  { %2174 = vmatpush1.bf16.msra.mxu0 %v5733_v61 }
 0x18b   :  { %2175 = vmatprep.subr.bf16.mxu0 %v5738_v44  ;;  %v5754_v44 = vld [vmem:[%s7690_s2 + $0x2d0] ss:$8 sps:$4 sm:$0xff]  }
 0x18e   :  { %2176 = vmatpush1.bf16.msra.mxu0 %v5736_v50 }
 0x18f   :  { %2177 = vmatprep.subr.bf16.mxu0 %v5741_v52 }
 0x192   :  { %2178 = vmatpush1.bf16.msra.mxu0 %v5739_v3 }
 0x193   :  { %2179 = vmatprep.subr.bf16.mxu0 %v5744_v5 }
 0x196   :  { %2180 = vmatpush1.bf16.msra.mxu0 %v5742_v30 }
 0x197   :  { %2181 = vmatprep.subr.bf16.mxu0 %v5747_v11 }
 0x1d3   :  { %v1205_v53 = vpop.f32.mrb[64].mxu0 }
 0x1d4   :  { %v1206_v15 = vadd.f32 %v1205_v53, %v6538_v1  ;;  %v1207_v16 = vpop.f32.mrb[65].mxu0 }
 0x1d5   :  { %v1208_v17 = vadd.f32 %v1207_v16, %v6541_v57  ;;  %v1209_v0 = vpop.f32.mrb[66].mxu0  ;;  %v5745_v16 = vld [vmem:[%s7690_s2 + $0x2a0] ss:$8 sps:$4 sm:$0xff]  }
 0x1d6   :  { %v1210_v19 = vadd.f32 %v1209_v0, %v6538_v1  ;;  %v1211_v20 = vpop.f32.mrb[67].mxu0  ;;  %v1364_v23 = vmax.f32 %v1206_v15, 0.0  ;;  %v5750_v0 = vld [vmem:[%s7690_s2 + $0x2b4] ss:$8 sps:$4 sm:$0xff]   ;;  %2182 = vmatpush1.bf16.msra.mxu0 %v5745_v16 }
 0x1d7   :  { %v1212_v22 = vadd.f32 %v1211_v20, %v6541_v57  ;;  %v1365_v27 = vmax.f32 %v1208_v17, 0.0  ;;  %2183 = vmatprep.subr.bf16.mxu0 %v5750_v0 }
 0x1d8   :  { %v1366_v58 = vmax.f32 %v1210_v19, 0.0 }
 0x1d9   :  { %v1367_v29 = vmax.f32 %v1212_v22, 0.0 }
 0x1da   :  { %v1428_v43 = vpack.c.bf16 %v1366_v58, %v1364_v23  ;;  %2184 = vmatpush1.bf16.msra.mxu0 %v5748_v24 }
 0x1db   :  { %v1429_v32 = vpack.c.bf16 %v1367_v29, %v1365_v27  ;;  %v1215_v34 = vpop.f32.mrb[68].mxu0  ;;  %v5753_v27 = vld [vmem:[%s7690_s2 + $0x2c4] ss:$8 sps:$4 sm:$0xff]  }
 0x1dc   :  { %v1216_v35 = vadd.f32 %v1215_v34, %v6538_v1  ;;  %v1217_v36 = vpop.f32.mrb[69].mxu0  ;;  %2185 = vmatprep.subr.bf16.mxu0 %v5753_v27 }
 0x1dd   :  { %v1218_v37 = vadd.f32 %v1217_v36, %v6541_v57  ;;  %v1219_v39 = vpop.f32.mrb[70].mxu0  ;;  %1698 = vmatprep.mubr.bf16.mxu1 %v1429_v32 }
 0x1de   :  { %v1220_v40 = vadd.f32 %v1219_v39, %v6538_v1  ;;  %v1221_v41 = vpop.f32.mrb[71].mxu0  ;;  %1699 = vmatmul.mubr.bf16.vlgmr.msra.gmra.mrb[64].mxu1 %v1428_v43  ;;  %v1368_v45 = vmax.f32 %v1216_v35, 0.0  ;;  %v5751_v35 = vld [vmem:[%s7690_s2 + $0x2c0] ss:$8 sps:$4 sm:$0xff]  }
 0x1df   :  { %v1222_v42 = vadd.f32 %v1221_v41, %v6541_v57  ;;  %v1369_v46 = vmax.f32 %v1218_v37, 0.0  ;;  %v5756_v37 = vld [vmem:[%s7690_s2 + $0x2d4] ss:$8 sps:$4 sm:$0xff]   ;;  %2186 = vmatpush1.bf16.msra.mxu0 %v5751_v35 }
 0x1e0   :  { %v1370_v33 = vmax.f32 %v1220_v40, 0.0  ;;  %2187 = vmatprep.subr.bf16.mxu0 %v5756_v37 }
 0x1e1   :  { %v1371_v47 = vmax.f32 %v1222_v42, 0.0 }
 0x1e2   :  { %v1430_v49 = vpack.c.bf16 %v1370_v33, %v1368_v45 }
 0x1e3   :  { %v1431_v48 = vpack.c.bf16 %v1371_v47, %v1369_v46  ;;  %v1225_v51 = vpop.f32.mrb[72].mxu0  ;;  %v5759_v46 = vld [vmem:[%s7690_s2 + $0x2e4] ss:$8 sps:$4 sm:$0xff]   ;;  %2188 = vmatpush1.bf16.msra.mxu0 %v5754_v44 }
 0x1e4   :  { %v1226_v54 = vadd.f32 %v1225_v51, %v6538_v1  ;;  %v1227_v59 = vpop.f32.mrb[73].mxu0  ;;  %2189 = vmatprep.subr.bf16.mxu0 %v5759_v46 }
 0x1e5   :  { %v1228_v62 = vadd.f32 %v1227_v59, %v6541_v57  ;;  %v1229_v56 = vpop.f32.mrb[74].mxu0  ;;  %1708 = vmatprep.mubr.bf16.mxu1 %v1431_v48 }
 0x1e6   :  { %v1230_v60 = vadd.f32 %v1229_v56, %v6538_v1  ;;  %v1231_v2 = vpop.f32.mrb[75].mxu0  ;;  %1709 = vmatmul.mubr.bf16.gmra.mrb[68].mxu1 %v1430_v49  ;;  %v1372_v6 = vmax.f32 %v1226_v54, 0.0  ;;  %v5757_v54 = vld [vmem:[%s7690_s2 + $0x2e0] ss:$8 sps:$4 sm:$0xff]  }
 0x1e7   :  { %v1232_v4 = vadd.f32 %v1231_v2, %v6541_v57  ;;  %v1373_v8 = vmax.f32 %v1228_v62, 0.0  ;;  %2190 = vmatpush1.bf16.msra.mxu0 %v5757_v54 }
 0x1e8   :  { %v1374_v7 = vmax.f32 %v1230_v60, 0.0 }
 0x1e9   :  { %v1375_v9 = vmax.f32 %v1232_v4, 0.0 }
 0x1ea   :  { %v1432_v38 = vpack.c.bf16 %v1374_v7, %v1372_v6 }
 0x1eb   :  { %v1433_v28 = vpack.c.bf16 %v1375_v9, %v1373_v8  ;;  %v1235_v10 = vpop.f32.mrb[76].mxu0 }
 0x1ec   :  { %v1236_v63 = vadd.f32 %v1235_v10, %v6538_v1  ;;  %v1237_v12 = vpop.f32.mrb[77].mxu0 }
 0x1ed   :  { %v1238_v53 = vadd.f32 %v1237_v12, %v6541_v57  ;;  %v1239_v13 = vpop.f32.mrb[78].mxu0  ;;  %1718 = vmatprep.mubr.bf16.mxu1 %v1433_v28 }
 0x1ee   :  { %v1240_v14 = vadd.f32 %v1239_v13, %v6538_v1  ;;  %v1241_v15 = vpop.f32.mrb[79].mxu0  ;;  %1719 = vmatmul.mubr.bf16.gmra.mrb[72].mxu1 %v1432_v38  ;;  %v1376_v19 = vmax.f32 %v1236_v63, 0.0 }
 0x1ef   :  { %v1242_v17 = vadd.f32 %v1241_v15, %v6541_v57  ;;  %v1377_v21 = vmax.f32 %v1238_v53, 0.0 }
 0x1f0   :  { %v1378_v20 = vmax.f32 %v1240_v14, 0.0 }
 0x1f1   :  { %v1379_v18 = vmax.f32 %v1242_v17, 0.0 }
 0x1f2   :  { %v1434_v22 = vpack.c.bf16 %v1378_v20, %v1376_v19 }
 0x1f3   :  { %v1435_v23 = vpack.c.bf16 %v1379_v18, %v1377_v21  ;;  %v1245_v58 = vpop.f32.mrb[80].mxu0 }
 0x1f4   :  { %v1246_v29 = vadd.f32 %v1245_v58, %v6538_v1  ;;  %v1247_v43 = vpop.f32.mrb[81].mxu0 }
 0x1f5   :  { %v1248_v31 = vadd.f32 %v1247_v43, %v6541_v57  ;;  %v1249_v32 = vpop.f32.mrb[82].mxu0  ;;  %1728 = vmatprep.mubr.bf16.mxu1 %v1435_v23 }
 0x1f6   :  { %v1250_v34 = vadd.f32 %v1249_v32, %v6538_v1  ;;  %v1251_v55 = vpop.f32.mrb[83].mxu0  ;;  %1729 = vmatmul.mubr.bf16.gmra.mrb[76].mxu1 %v1434_v22  ;;  %v1380_v39 = vmax.f32 %v1246_v29, 0.0 }
 0x1f7   :  { %v1252_v36 = vadd.f32 %v1251_v55, %v6541_v57  ;;  %v1381_v41 = vmax.f32 %v1248_v31, 0.0 }
 0x1f8   :  { %v1382_v40 = vmax.f32 %v1250_v34, 0.0 }
 0x1f9   :  { %v1383_v61 = vmax.f32 %v1252_v36, 0.0 }
 0x1fa   :  { %v1436_v42 = vpack.c.bf16 %v1382_v40, %v1380_v39 }
 0x1fb   :  { %v1437_v45 = vpack.c.bf16 %v1383_v61, %v1381_v41  ;;  %v1255_v33 = vpop.f32.mrb[84].mxu0 }
 0x1fc   :  { %v1256_v47 = vadd.f32 %v1255_v33, %v6538_v1  ;;  %v1257_v49 = vpop.f32.mrb[85].mxu0 }
 0x1fd   :  { %v1258_v50 = vadd.f32 %v1257_v49, %v6541_v57  ;;  %v1259_v48 = vpop.f32.mrb[86].mxu0  ;;  %1738 = vmatprep.mubr.bf16.mxu1 %v1437_v45 }
 0x1fe   :  { %v1260_v51 = vadd.f32 %v1259_v48, %v6538_v1  ;;  %v1261_v52 = vpop.f32.mrb[87].mxu0  ;;  %1739 = vmatmul.mubr.bf16.gmra.mrb[80].mxu1 %v1436_v42  ;;  %v1384_v62 = vmax.f32 %v1256_v47, 0.0 }
 0x1ff   :  { %v1262_v59 = vadd.f32 %v1261_v52, %v6541_v57  ;;  %v1385_v60 = vmax.f32 %v1258_v50, 0.0 }
 0x200   :  { %v1386_v56 = vmax.f32 %v1260_v51, 0.0 }
 0x201   :  { %v1387_v2 = vmax.f32 %v1262_v59, 0.0 }
 0x202   :  { %v1438_v3 = vpack.c.bf16 %v1386_v56, %v1384_v62 }
 0x203   :  { %v1439_v4 = vpack.c.bf16 %v1387_v2, %v1385_v60  ;;  %v1265_v5 = vpop.f32.mrb[88].mxu0 }
 0x204   :  { %v1266_v6 = vadd.f32 %v1265_v5, %v6538_v1  ;;  %v1267_v7 = vpop.f32.mrb[89].mxu0 }
 0x205   :  { %v1268_v8 = vadd.f32 %v1267_v7, %v6541_v57  ;;  %v1269_v9 = vpop.f32.mrb[90].mxu0  ;;  %1748 = vmatprep.mubr.bf16.mxu1 %v1439_v4 }
 0x206   :  { %v1270_v38 = vadd.f32 %v1269_v9, %v6538_v1  ;;  %v1271_v30 = vpop.f32.mrb[91].mxu0  ;;  %1749 = vmatmul.mubr.bf16.gmra.mrb[84].mxu1 %v1438_v3  ;;  %v1388_v10 = vmax.f32 %v1266_v6, 0.0 }
 0x207   :  { %v1272_v28 = vadd.f32 %v1271_v30, %v6541_v57  ;;  %v1389_v63 = vmax.f32 %v1268_v8, 0.0 }
 0x208   :  { %v1390_v11 = vmax.f32 %v1270_v38, 0.0 }
 0x209   :  { %v1391_v12 = vmax.f32 %v1272_v28, 0.0 }
 0x20a   :  { %v1440_v53 = vpack.c.bf16 %v1390_v11, %v1388_v10 }
 0x20b   :  { %v1441_v13 = vpack.c.bf16 %v1391_v12, %v1389_v63  ;;  %v1275_v14 = vpop.f32.mrb[92].mxu0 }
 0x20c   :  { %v1276_v15 = vadd.f32 %v1275_v14, %v6538_v1  ;;  %v1277_v16 = vpop.f32.mrb[93].mxu0 }
 0x20d   :  { %v1278_v17 = vadd.f32 %v1277_v16, %v6541_v57  ;;  %v1279_v0 = vpop.f32.mrb[94].mxu0  ;;  %1758 = vmatprep.mubr.bf16.mxu1 %v1441_v13 }
 0x20e   :  { %v1280_v19 = vadd.f32 %v1279_v0, %v6538_v1  ;;  %v1281_v20 = vpop.f32.mrb[95].mxu0  ;;  %1759 = vmatmul.mubr.bf16.gmra.mrb[88].mxu1 %v1440_v53  ;;  %v1392_v18 = vmax.f32 %v1276_v15, 0.0 }
 0x20f   :  { %v1282_v21 = vadd.f32 %v1281_v20, %v6541_v57  ;;  %v1393_v24 = vmax.f32 %v1278_v17, 0.0 }
 0x210   :  { %v1394_v22 = vmax.f32 %v1280_v19, 0.0 }
 0x211   :  { %v1395_v23 = vmax.f32 %v1282_v21, 0.0 }
 0x212   :  { %v1442_v58 = vpack.c.bf16 %v1394_v22, %v1392_v18 }
 0x213   :  { %v1443_v27 = vpack.c.bf16 %v1395_v23, %v1393_v24  ;;  %v1285_v29 = vpop.f32.mrb[96].mxu0 }
 0x214   :  { %v1286_v43 = vadd.f32 %v1285_v29, %v6538_v1  ;;  %v1287_v31 = vpop.f32.mrb[97].mxu0 }
 0x215   :  { %v1288_v32 = vadd.f32 %v1287_v31, %v6541_v57  ;;  %v1289_v34 = vpop.f32.mrb[98].mxu0  ;;  %1768 = vmatprep.mubr.bf16.mxu1 %v1443_v27 }
 0x216   :  { %v1290_v55 = vadd.f32 %v1289_v34, %v6538_v1  ;;  %v1291_v35 = vpop.f32.mrb[99].mxu0  ;;  %1769 = vmatmul.mubr.bf16.gmra.mrb[92].mxu1 %v1442_v58  ;;  %v1396_v37 = vmax.f32 %v1286_v43, 0.0 }
 0x217   :  { %v1292_v36 = vadd.f32 %v1291_v35, %v6541_v57  ;;  %v1397_v40 = vmax.f32 %v1288_v32, 0.0  ;;  %v5762_v32 = vld [vmem:[%s7690_s2 + $0x2f4] ss:$8 sps:$4 sm:$0xff]  }
 0x218   :  { %v1398_v39 = vmax.f32 %v1290_v55, 0.0  ;;  %v5760_v55 = vld [vmem:[%s7690_s2 + $0x2f0] ss:$8 sps:$4 sm:$0xff]   ;;  %2191 = vmatprep.subr.bf16.mxu0 %v5762_v32  ;;  %v5774_v32 = vld [vmem:[%s7690_s2 + $0x334] ss:$8 sps:$4 sm:$0xff]  }
 0x219   :  { %v1399_v41 = vmax.f32 %v1292_v36, 0.0  ;;  %2192 = vmatpush1.bf16.msra.mxu0 %v5760_v55 }
 0x21a   :  { %v1444_v61 = vpack.c.bf16 %v1398_v39, %v1396_v37 }
 0x21b   :  { %v1445_v42 = vpack.c.bf16 %v1399_v41, %v1397_v40  ;;  %v1295_v44 = vpop.f32.mrb[100].mxu0 }
 0x21c   :  { %v1296_v45 = vadd.f32 %v1295_v44, %v6538_v1  ;;  %v1297_v33 = vpop.f32.mrb[101].mxu0 }
 0x21d   :  { %v1298_v46 = vadd.f32 %v1297_v33, %v6541_v57  ;;  %v1299_v47 = vpop.f32.mrb[102].mxu0  ;;  %1778 = vmatprep.mubr.bf16.mxu1 %v1445_v42 }
 0x21e   :  { %v1300_v49 = vadd.f32 %v1299_v47, %v6538_v1  ;;  %v1301_v50 = vpop.f32.mrb[103].mxu0  ;;  %1779 = vmatmul.mubr.bf16.gmra.mrb[96].mxu1 %v1444_v61  ;;  %v1400_v51 = vmax.f32 %v1296_v45, 0.0 }
 0x21f   :  { %v1302_v48 = vadd.f32 %v1301_v50, %v6541_v57  ;;  %v1401_v54 = vmax.f32 %v1298_v46, 0.0 }
 0x220   :  { %v1402_v52 = vmax.f32 %v1300_v49, 0.0 }
 0x221   :  { %v1403_v59 = vmax.f32 %v1302_v48, 0.0 }
 0x222   :  { %v1446_v62 = vpack.c.bf16 %v1402_v52, %v1400_v51 }
 0x223   :  { %v1447_v56 = vpack.c.bf16 %v1403_v59, %v1401_v54  ;;  %v1305_v60 = vpop.f32.mrb[104].mxu0 }
 0x224   :  { %v1306_v2 = vadd.f32 %v1305_v60, %v6538_v1  ;;  %v1307_v3 = vpop.f32.mrb[105].mxu0 }
 0x225   :  { %v1308_v4 = vadd.f32 %v1307_v3, %v6541_v57  ;;  %v1309_v5 = vpop.f32.mrb[106].mxu0  ;;  %1788 = vmatprep.mubr.bf16.mxu1 %v1447_v56 }
 0x226   :  { %v1310_v6 = vadd.f32 %v1309_v5, %v6538_v1  ;;  %v1311_v7 = vpop.f32.mrb[107].mxu0  ;;  %1789 = vmatmul.mubr.bf16.gmra.mrb[100].mxu1 %v1446_v62  ;;  %v1404_v9 = vmax.f32 %v1306_v2, 0.0 }
 0x227   :  { %v1312_v8 = vadd.f32 %v1311_v7, %v6541_v57  ;;  %v1405_v30 = vmax.f32 %v1308_v4, 0.0 }
 0x228   :  { %v1406_v38 = vmax.f32 %v1310_v6, 0.0 }
 0x229   :  { %v1407_v28 = vmax.f32 %v1312_v8, 0.0 }
 0x22a   :  { %v1448_v10 = vpack.c.bf16 %v1406_v38, %v1404_v9 }
 0x22b   :  { %v1449_v11 = vpack.c.bf16 %v1407_v28, %v1405_v30  ;;  %v1315_v63 = vpop.f32.mrb[108].mxu0 }
 0x22c   :  { %v1316_v12 = vadd.f32 %v1315_v63, %v6538_v1  ;;  %v1317_v53 = vpop.f32.mrb[109].mxu0 }
 0x22d   :  { %v1318_v13 = vadd.f32 %v1317_v53, %v6541_v57  ;;  %v1319_v14 = vpop.f32.mrb[110].mxu0  ;;  %1798 = vmatprep.mubr.bf16.mxu1 %v1449_v11 }
 0x22e   :  { %v1320_v15 = vadd.f32 %v1319_v14, %v6538_v1  ;;  %v1321_v16 = vpop.f32.mrb[111].mxu0  ;;  %1799 = vmatmul.mubr.bf16.gmra.mrb[104].mxu1 %v1448_v10  ;;  %v1408_v0 = vmax.f32 %v1316_v12, 0.0 }
 0x22f   :  { %v1322_v17 = vadd.f32 %v1321_v16, %v6541_v57  ;;  %v1409_v20 = vmax.f32 %v1318_v13, 0.0 }
 0x230   :  { %v1410_v19 = vmax.f32 %v1320_v15, 0.0 }
 0x231   :  { %v1411_v21 = vmax.f32 %v1322_v17, 0.0 }
 0x232   :  { %v1450_v18 = vpack.c.bf16 %v1410_v19, %v1408_v0 }
 0x233   :  { %v1451_v22 = vpack.c.bf16 %v1411_v21, %v1409_v20  ;;  %v1325_v24 = vpop.f32.mrb[112].mxu0 }
 0x234   :  { %v1326_v23 = vadd.f32 %v1325_v24, %v6538_v1  ;;  %v1327_v58 = vpop.f32.mrb[113].mxu0  ;;  %v5003_v24 = vld [vmem:[%s7691_s3 + $0x2] ss:$8 sm:$0x3] }
 0x235   :  { %v1328_v27 = vadd.f32 %v1327_v58, %v6541_v57  ;;  %v1329_v29 = vpop.f32.mrb[114].mxu0  ;;  %1808 = vmatprep.mubr.bf16.mxu1 %v1451_v22  ;;  %v5768_v22 = vld [vmem:[%s7690_s2 + $0x314] ss:$8 sps:$4 sm:$0xff]   ;;  %v5771_v58 = vld [vmem:[%s7690_s2 + $0x324] ss:$8 sps:$4 sm:$0xff]  }
 0x236   :  { %v1330_v43 = vadd.f32 %v1329_v29, %v6538_v1  ;;  %v1331_v31 = vpop.f32.mrb[115].mxu0  ;;  %1809 = vmatmul.mubr.bf16.gmra.mrb[108].mxu1 %v1450_v18  ;;  %v1412_v35 = vmax.f32 %v1326_v23, 0.0  ;;  %v5763_v18 = vld [vmem:[%s7690_s2 + $0x300] ss:$8 sps:$4 sm:$0xff]   ;;  %v6710_v29 = vrot.slane %v5003_v24, %v6334_v26 }
 0x237   :  { %v1332_v34 = vadd.f32 %v1331_v31, %v6541_v57  ;;  %v1413_v37 = vmax.f32 %v1328_v27, 0.0  ;;  %v5769_v23 = vld [vmem:[%s7690_s2 + $0x320] ss:$8 sps:$4 sm:$0xff]   ;;  %v6707_v27 = vrot.slane %v5003_v24, %v6328_v25  ;;  %v5772_v31 = vld [vmem:[%s7690_s2 + $0x330] ss:$8 sps:$4 sm:$0xff]  }
 0x238   :  { %v1414_v36 = vmax.f32 %v1330_v43, 0.0  ;;  %v5795_v24 = vld [vmem:[%s7690_s2 + $0x3a4] ss:$8 sps:$4 sm:$0xff]  }
 0x239   :  { %v1415_v39 = vmax.f32 %v1332_v34, 0.0 }
 0x23a   :  { %v1452_v40 = vpack.c.bf16 %v1414_v36, %v1412_v35 }
 0x23b   :  { %v1453_v41 = vpack.c.bf16 %v1415_v39, %v1413_v37  ;;  %v1335_v61 = vpop.f32.mrb[116].mxu0 }
 0x23c   :  { %v1336_v42 = vadd.f32 %v1335_v61, %v6538_v1  ;;  %v1337_v44 = vpop.f32.mrb[117].mxu0 }
 0x23d   :  { %v1338_v45 = vadd.f32 %v1337_v44, %v6541_v57  ;;  %v1339_v33 = vpop.f32.mrb[118].mxu0  ;;  %1818 = vmatprep.mubr.bf16.mxu1 %v1453_v41  ;;  %v5777_v41 = vld [vmem:[%s7690_s2 + $0x344] ss:$8 sps:$4 sm:$0xff]  }
 0x23e   :  { %v1340_v46 = vadd.f32 %v1339_v33, %v6538_v1  ;;  %v1341_v47 = vpop.f32.mrb[119].mxu0  ;;  %1819 = vmatmul.mubr.bf16.gmra.mrb[112].mxu1 %v1452_v40  ;;  %v1416_v50 = vmax.f32 %v1336_v42, 0.0  ;;  %v5775_v40 = vld [vmem:[%s7690_s2 + $0x340] ss:$8 sps:$4 sm:$0xff]   ;;  %v5780_v42 = vld [vmem:[%s7690_s2 + $0x354] ss:$8 sps:$4 sm:$0xff]  }
 0x23f   :  { %v1342_v49 = vadd.f32 %v1341_v47, %v6541_v57  ;;  %v1417_v51 = vmax.f32 %v1338_v45, 0.0 }
 0x240   :  { %v1418_v48 = vmax.f32 %v1340_v46, 0.0 }
 0x241   :  { %v1419_v52 = vmax.f32 %v1342_v49, 0.0  ;;  %v5778_v49 = vld [vmem:[%s7690_s2 + $0x350] ss:$8 sps:$4 sm:$0xff]  }
 0x242   :  { %v1454_v54 = vpack.c.bf16 %v1418_v48, %v1416_v50 }
 0x243   :  { %v1455_v59 = vpack.c.bf16 %v1419_v52, %v1417_v51  ;;  %v1345_v62 = vpop.f32.mrb[120].mxu0  ;;  %v5783_v51 = vld [vmem:[%s7690_s2 + $0x364] ss:$8 sps:$4 sm:$0xff]  }
 0x244   :  { %v1346_v56 = vadd.f32 %v1345_v62, %v6538_v1  ;;  %v1347_v60 = vpop.f32.mrb[121].mxu0 }
 0x245   :  { %v1348_v2 = vadd.f32 %v1347_v60, %v6541_v57  ;;  %v1349_v3 = vpop.f32.mrb[122].mxu0  ;;  %1828 = vmatprep.mubr.bf16.mxu1 %v1455_v59 }
 0x246   :  { %v1350_v4 = vadd.f32 %v1349_v3, %v6538_v1  ;;  %v1351_v5 = vpop.f32.mrb[123].mxu0  ;;  %1829 = vmatmul.mubr.bf16.gmra.mrb[116].mxu1 %v1454_v54  ;;  %v1420_v7 = vmax.f32 %v1346_v56, 0.0 }
 0x247   :  { %v1352_v6 = vadd.f32 %v1351_v5, %v6541_v57  ;;  %v1421_v9 = vmax.f32 %v1348_v2, 0.0  ;;  %v5781_v2 = vld [vmem:[%s7690_s2 + $0x360] ss:$8 sps:$4 sm:$0xff]  }
 0x248   :  { %v1422_v8 = vmax.f32 %v1350_v4, 0.0  ;;  %v5786_v4 = vld [vmem:[%s7690_s2 + $0x374] ss:$8 sps:$4 sm:$0xff]  }
 0x249   :  { %v1423_v38 = vmax.f32 %v1352_v6, 0.0 }
 0x24a   :  { %v1456_v30 = vpack.c.bf16 %v1422_v8, %v1420_v7 }
 0x24b   :  { %v1457_v28 = vpack.c.bf16 %v1423_v38, %v1421_v9  ;;  %v1355_v10 = vpop.f32.mrb[124].mxu0  ;;  %v5784_v38 = vld [vmem:[%s7690_s2 + $0x370] ss:$8 sps:$4 sm:$0xff]  }
 0x24c   :  { %v1356_v11 = vadd.f32 %v1355_v10, %v6538_v1  ;;  %v1357_v63 = vpop.f32.mrb[125].mxu0  ;;  %v5789_v10 = vld [vmem:[%s7690_s2 + $0x384] ss:$8 sps:$4 sm:$0xff]  }
 0x24d   :  { %v1358_v12 = vadd.f32 %v1357_v63, %v6541_v57  ;;  %v1359_v53 = vpop.f32.mrb[126].mxu0  ;;  %1838 = vmatprep.mubr.bf16.mxu1 %v1457_v28 }
 0x24e   :  { %v1360_v13 = vadd.f32 %v1359_v53, %v6538_v1  ;;  %v1361_v14 = vpop.f32.mrb[127].mxu0  ;;  %1839 = vmatmul.mubr.bf16.gmra.mrb[120].mxu1 %v1456_v30  ;;  %v1424_v16 = vmax.f32 %v1356_v11, 0.0  ;;  %v5765_v1 = vld [vmem:[%s7690_s2 + $0x304] ss:$8 sps:$4 sm:$0xff]  }
 0x24f   :  { %v1362_v15 = vadd.f32 %v1361_v14, %v6541_v57  ;;  %v1425_v0 = vmax.f32 %v1358_v12, 0.0  ;;  %2656 = vmatprep.subr.bf16.mxu1 %v5765_v1  ;;  %v5766_v57 = vld [vmem:[%s7690_s2 + $0x310] ss:$8 sps:$4 sm:$0xff]  }
 0x250   :  { %v1426_v17 = vmax.f32 %v1360_v13, 0.0  ;;  %2657 = vmatpush1.bf16.msra.mxu1 %v5763_v18  ;;  %v5790_v1 = vld [vmem:[%s7690_s2 + $0x390] ss:$8 sps:$4 sm:$0xff]  }
 0x251   :  { %v1427_v19 = vmax.f32 %v1362_v15, 0.0  ;;  %2658 = vmatprep.subr.bf16.mxu1 %v5768_v22  ;;  %v5787_v15 = vld [vmem:[%s7690_s2 + $0x380] ss:$8 sps:$4 sm:$0xff]  }
 0x252   :  { %v1458_v20 = vpack.c.bf16 %v1426_v17, %v1424_v16  ;;  %v5792_v17 = vld [vmem:[%s7690_s2 + $0x394] ss:$8 sps:$4 sm:$0xff]  }
 0x253   :  { %v1459_v21 = vpack.c.bf16 %v1427_v19, %v1425_v0 }
 0x254   :  { %2659 = vmatpush1.bf16.msra.mxu1 %v5766_v57 }
 0x255   :  { %1848 = vmatprep.mubr.bf16.mxu1 %v1459_v21  ;;  %2660 = vmatprep.subr.bf16.mxu1 %v5771_v58 }
 0x256   :  { %1849 = vmatmul.mubr.bf16.gmra.mrb[124].mxu1 %v1458_v20 }
 0x258   :  { %2661 = vmatpush1.bf16.msra.mxu1 %v5769_v23 }
 0x259   :  { %2662 = vmatprep.subr.bf16.mxu1 %v5774_v32 }
 0x25c   :  { %2663 = vmatpush1.bf16.msra.mxu1 %v5772_v31 }
 0x25d   :  { %2664 = vmatprep.subr.bf16.mxu1 %v5777_v41 }
 0x260   :  { %2665 = vmatpush1.bf16.msra.mxu1 %v5775_v40 }
 0x261   :  { %2666 = vmatprep.subr.bf16.mxu1 %v5780_v42  ;;  %v5796_v42 = vld [vmem:[%s7690_s2 + $0x3b0] ss:$8 sps:$4 sm:$0xff]  }
 0x264   :  { %2667 = vmatpush1.bf16.msra.mxu1 %v5778_v49 }
 0x265   :  { %2668 = vmatprep.subr.bf16.mxu1 %v5783_v51 }
 0x268   :  { %2669 = vmatpush1.bf16.msra.mxu1 %v5781_v2 }
 0x269   :  { %2670 = vmatprep.subr.bf16.mxu1 %v5786_v4  ;;  %v5802_v4 = vld [vmem:[%s7690_s2 + $0x3d0] ss:$8 sps:$4 sm:$0xff]  }
 0x26c   :  { %2671 = vmatpush1.bf16.msra.mxu1 %v5784_v38 }
 0x26d   :  { %2672 = vmatprep.subr.bf16.mxu1 %v5789_v10 }
 0x270   :  { %2673 = vmatpush1.bf16.msra.mxu1 %v5787_v15 }
 0x271   :  { %2674 = vmatprep.subr.bf16.mxu1 %v5792_v17 }
 0x274   :  { %2675 = vmatpush1.bf16.msra.mxu1 %v5790_v1 }
 0x275   :  { %2676 = vmatprep.subr.bf16.mxu1 %v5795_v24 }
 0x2b1   :  { %v1700_v43 = vpop.f32.mrb[64].mxu1 }
 0x2b2   :  { %v1701_v34 = vadd.f32 %v1700_v43, %v6707_v27  ;;  %v1702_v55 = vpop.f32.mrb[65].mxu1 }
 0x2b3   :  { %v1703_v35 = vadd.f32 %v1702_v55, %v6710_v29  ;;  %v1704_v36 = vpop.f32.mrb[66].mxu1  ;;  %v5793_v55 = vld [vmem:[%s7690_s2 + $0x3a0] ss:$8 sps:$4 sm:$0xff]  }
 0x2b4   :  { %v1705_v37 = vadd.f32 %v1704_v36, %v6707_v27  ;;  %v1706_v39 = vpop.f32.mrb[67].mxu1  ;;  %v1859_v44 = vmax.f32 %v1701_v34, 0.0  ;;  %v5798_v36 = vld [vmem:[%s7690_s2 + $0x3b4] ss:$8 sps:$4 sm:$0xff]   ;;  %2677 = vmatpush1.bf16.msra.mxu1 %v5793_v55 }
 0x2b5   :  { %v1707_v61 = vadd.f32 %v1706_v39, %v6710_v29  ;;  %v1860_v33 = vmax.f32 %v1703_v35, 0.0  ;;  %2678 = vmatprep.subr.bf16.mxu1 %v5798_v36 }
 0x2b6   :  { %v1861_v45 = vmax.f32 %v1705_v37, 0.0 }
 0x2b7   :  { %v1862_v46 = vmax.f32 %v1707_v61, 0.0 }
 0x2b8   :  { %v1923_v47 = vpack.c.bf16 %v1861_v45, %v1859_v44  ;;  %2679 = vmatpush1.bf16.msra.mxu1 %v5796_v42 }
 0x2b9   :  { %v1924_v50 = vpack.c.bf16 %v1862_v46, %v1860_v33  ;;  %v1710_v48 = vpop.f32.mrb[68].mxu1  ;;  %v5801_v33 = vld [vmem:[%s7690_s2 + $0x3c4] ss:$8 sps:$4 sm:$0xff]  }
 0x2ba   :  { %v1711_v52 = vadd.f32 %v1710_v48, %v6707_v27  ;;  %v1712_v54 = vpop.f32.mrb[69].mxu1  ;;  %2680 = vmatprep.subr.bf16.mxu1 %v5801_v33 }
 0x2bb   :  { %v1713_v59 = vadd.f32 %v1712_v54, %v6710_v29  ;;  %v1714_v62 = vpop.f32.mrb[70].mxu1  ;;  %2193 = vmatprep.mubr.bf16.mxu0 %v1924_v50 }
 0x2bc   :  { %v1715_v56 = vadd.f32 %v1714_v62, %v6707_v27  ;;  %v1716_v60 = vpop.f32.mrb[71].mxu1  ;;  %2194 = vmatmul.mubr.bf16.vlgmr.msra.gmra.mrb[128].mxu0 %v1923_v47  ;;  %v1863_v5 = vmax.f32 %v1711_v52, 0.0  ;;  %v5799_v52 = vld [vmem:[%s7690_s2 + $0x3c0] ss:$8 sps:$4 sm:$0xff]  }
 0x2bd   :  { %v1717_v3 = vadd.f32 %v1716_v60, %v6710_v29  ;;  %v1864_v7 = vmax.f32 %v1713_v59, 0.0  ;;  %v5804_v59 = vld [vmem:[%s7690_s2 + $0x3d4] ss:$8 sps:$4 sm:$0xff]   ;;  %2681 = vmatpush1.bf16.msra.mxu1 %v5799_v52 }
 0x2be   :  { %v1865_v6 = vmax.f32 %v1715_v56, 0.0  ;;  %2682 = vmatprep.subr.bf16.mxu1 %v5804_v59 }
 0x2bf   :  { %v1866_v8 = vmax.f32 %v1717_v3, 0.0 }
 0x2c0   :  { %v1925_v9 = vpack.c.bf16 %v1865_v6, %v1863_v5 }
 0x2c1   :  { %v1926_v30 = vpack.c.bf16 %v1866_v8, %v1864_v7  ;;  %v1720_v28 = vpop.f32.mrb[72].mxu1  ;;  %v5807_v7 = vld [vmem:[%s7690_s2 + $0x3e4] ss:$8 sps:$4 sm:$0xff]   ;;  %2683 = vmatpush1.bf16.msra.mxu1 %v5802_v4 }
 0x2c2   :  { %v1721_v11 = vadd.f32 %v1720_v28, %v6707_v27  ;;  %v1722_v63 = vpop.f32.mrb[73].mxu1  ;;  %2684 = vmatprep.subr.bf16.mxu1 %v5807_v7 }
 0x2c3   :  { %v1723_v12 = vadd.f32 %v1722_v63, %v6710_v29  ;;  %v1724_v53 = vpop.f32.mrb[74].mxu1  ;;  %2203 = vmatprep.mubr.bf16.mxu0 %v1926_v30 }
 0x2c4   :  { %v1725_v13 = vadd.f32 %v1724_v53, %v6707_v27  ;;  %v1726_v14 = vpop.f32.mrb[75].mxu1  ;;  %2204 = vmatmul.mubr.bf16.gmra.mrb[132].mxu0 %v1925_v9  ;;  %v1867_v0 = vmax.f32 %v1721_v11, 0.0  ;;  %v5805_v11 = vld [vmem:[%s7690_s2 + $0x3e0] ss:$8 sps:$4 sm:$0xff]  }
 0x2c5   :  { %v1727_v16 = vadd.f32 %v1726_v14, %v6710_v29  ;;  %v1868_v20 = vmax.f32 %v1723_v12, 0.0  ;;  %2685 = vmatpush1.bf16.msra.mxu1 %v5805_v11 }
 0x2c6   :  { %v1869_v19 = vmax.f32 %v1725_v13, 0.0 }
 0x2c7   :  { %v1870_v21 = vmax.f32 %v1727_v16, 0.0 }
 0x2c8   :  { %v1927_v18 = vpack.c.bf16 %v1869_v19, %v1867_v0 }
 0x2c9   :  { %v1928_v57 = vpack.c.bf16 %v1870_v21, %v1868_v20  ;;  %v1730_v22 = vpop.f32.mrb[76].mxu1 }
 0x2ca   :  { %v1731_v23 = vadd.f32 %v1730_v22, %v6707_v27  ;;  %v1732_v58 = vpop.f32.mrb[77].mxu1 }
 0x2cb   :  { %v1733_v43 = vadd.f32 %v1732_v58, %v6710_v29  ;;  %v1734_v31 = vpop.f32.mrb[78].mxu1  ;;  %2213 = vmatprep.mubr.bf16.mxu0 %v1928_v57 }
 0x2cc   :  { %v1735_v32 = vadd.f32 %v1734_v31, %v6707_v27  ;;  %v1736_v34 = vpop.f32.mrb[79].mxu1  ;;  %2214 = vmatmul.mubr.bf16.gmra.mrb[136].mxu0 %v1927_v18  ;;  %v1871_v37 = vmax.f32 %v1731_v23, 0.0 }
 0x2cd   :  { %v1737_v35 = vadd.f32 %v1736_v34, %v6710_v29  ;;  %v1872_v40 = vmax.f32 %v1733_v43, 0.0 }
 0x2ce   :  { %v1873_v39 = vmax.f32 %v1735_v32, 0.0 }
 0x2cf   :  { %v1874_v41 = vmax.f32 %v1737_v35, 0.0 }
 0x2d0   :  { %v1929_v61 = vpack.c.bf16 %v1873_v39, %v1871_v37 }
 0x2d1   :  { %v1930_v44 = vpack.c.bf16 %v1874_v41, %v1872_v40  ;;  %v1740_v45 = vpop.f32.mrb[80].mxu1 }
 0x2d2   :  { %v1741_v46 = vadd.f32 %v1740_v45, %v6707_v27  ;;  %v1742_v47 = vpop.f32.mrb[81].mxu1 }
 0x2d3   :  { %v1743_v49 = vadd.f32 %v1742_v47, %v6710_v29  ;;  %v1744_v50 = vpop.f32.mrb[82].mxu1  ;;  %2223 = vmatprep.mubr.bf16.mxu0 %v1930_v44 }
 0x2d4   :  { %v1745_v48 = vadd.f32 %v1744_v50, %v6707_v27  ;;  %v1746_v51 = vpop.f32.mrb[83].mxu1  ;;  %2224 = vmatmul.mubr.bf16.gmra.mrb[140].mxu0 %v1929_v61  ;;  %v1875_v62 = vmax.f32 %v1741_v46, 0.0 }
 0x2d5   :  { %v1747_v54 = vadd.f32 %v1746_v51, %v6710_v29  ;;  %v1876_v60 = vmax.f32 %v1743_v49, 0.0 }
 0x2d6   :  { %v1877_v56 = vmax.f32 %v1745_v48, 0.0 }
 0x2d7   :  { %v1878_v2 = vmax.f32 %v1747_v54, 0.0 }
 0x2d8   :  { %v1931_v3 = vpack.c.bf16 %v1877_v56, %v1875_v62 }
 0x2d9   :  { %v1932_v5 = vpack.c.bf16 %v1878_v2, %v1876_v60  ;;  %v1750_v6 = vpop.f32.mrb[84].mxu1 }
 0x2da   :  { %v1751_v8 = vadd.f32 %v1750_v6, %v6707_v27  ;;  %v1752_v9 = vpop.f32.mrb[85].mxu1 }
 0x2db   :  { %v1753_v38 = vadd.f32 %v1752_v9, %v6710_v29  ;;  %v1754_v30 = vpop.f32.mrb[86].mxu1  ;;  %2233 = vmatprep.mubr.bf16.mxu0 %v1932_v5 }
 0x2dc   :  { %v1755_v28 = vadd.f32 %v1754_v30, %v6707_v27  ;;  %v1756_v10 = vpop.f32.mrb[87].mxu1  ;;  %2234 = vmatmul.mubr.bf16.gmra.mrb[144].mxu0 %v1931_v3  ;;  %v1879_v12 = vmax.f32 %v1751_v8, 0.0 }
 0x2dd   :  { %v1757_v63 = vadd.f32 %v1756_v10, %v6710_v29  ;;  %v1880_v13 = vmax.f32 %v1753_v38, 0.0 }
 0x2de   :  { %v1881_v53 = vmax.f32 %v1755_v28, 0.0 }
 0x2df   :  { %v1882_v14 = vmax.f32 %v1757_v63, 0.0 }
 0x2e0   :  { %v1933_v15 = vpack.c.bf16 %v1881_v53, %v1879_v12 }
 0x2e1   :  { %v1934_v16 = vpack.c.bf16 %v1882_v14, %v1880_v13  ;;  %v1760_v17 = vpop.f32.mrb[88].mxu1 }
 0x2e2   :  { %v1761_v0 = vadd.f32 %v1760_v17, %v6707_v27  ;;  %v1762_v19 = vpop.f32.mrb[89].mxu1 }
 0x2e3   :  { %v1763_v20 = vadd.f32 %v1762_v19, %v6710_v29  ;;  %v1764_v21 = vpop.f32.mrb[90].mxu1  ;;  %2243 = vmatprep.mubr.bf16.mxu0 %v1934_v16 }
 0x2e4   :  { %v1765_v18 = vadd.f32 %v1764_v21, %v6707_v27  ;;  %v1766_v1 = vpop.f32.mrb[91].mxu1  ;;  %2244 = vmatmul.mubr.bf16.gmra.mrb[148].mxu0 %v1933_v15  ;;  %v1883_v22 = vmax.f32 %v1761_v0, 0.0 }
 0x2e5   :  { %v1767_v57 = vadd.f32 %v1766_v1, %v6710_v29  ;;  %v1884_v23 = vmax.f32 %v1763_v20, 0.0 }
 0x2e6   :  { %v1885_v24 = vmax.f32 %v1765_v18, 0.0 }
 0x2e7   :  { %v1886_v58 = vmax.f32 %v1767_v57, 0.0 }
 0x2e8   :  { %v1935_v43 = vpack.c.bf16 %v1885_v24, %v1883_v22 }
 0x2e9   :  { %v1936_v31 = vpack.c.bf16 %v1886_v58, %v1884_v23  ;;  %v1770_v32 = vpop.f32.mrb[92].mxu1 }
 0x2ea   :  { %v1771_v34 = vadd.f32 %v1770_v32, %v6707_v27  ;;  %v1772_v55 = vpop.f32.mrb[93].mxu1 }
 0x2eb   :  { %v1773_v35 = vadd.f32 %v1772_v55, %v6710_v29  ;;  %v1774_v36 = vpop.f32.mrb[94].mxu1  ;;  %2253 = vmatprep.mubr.bf16.mxu0 %v1936_v31 }
 0x2ec   :  { %v1775_v37 = vadd.f32 %v1774_v36, %v6707_v27  ;;  %v1776_v39 = vpop.f32.mrb[95].mxu1  ;;  %2254 = vmatmul.mubr.bf16.gmra.mrb[152].mxu0 %v1935_v43  ;;  %v1887_v41 = vmax.f32 %v1771_v34, 0.0 }
 0x2ed   :  { %v1777_v40 = vadd.f32 %v1776_v39, %v6710_v29  ;;  %v1888_v42 = vmax.f32 %v1773_v35, 0.0 }
 0x2ee   :  { %v1889_v61 = vmax.f32 %v1775_v37, 0.0 }
 0x2ef   :  { %v1890_v44 = vmax.f32 %v1777_v40, 0.0 }
 0x2f0   :  { %v1937_v45 = vpack.c.bf16 %v1889_v61, %v1887_v41 }
 0x2f1   :  { %v1938_v33 = vpack.c.bf16 %v1890_v44, %v1888_v42  ;;  %v1780_v46 = vpop.f32.mrb[96].mxu1 }
 0x2f2   :  { %v1781_v47 = vadd.f32 %v1780_v46, %v6707_v27  ;;  %v1782_v49 = vpop.f32.mrb[97].mxu1 }
 0x2f3   :  { %v1783_v50 = vadd.f32 %v1782_v49, %v6710_v29  ;;  %v1784_v48 = vpop.f32.mrb[98].mxu1  ;;  %2263 = vmatprep.mubr.bf16.mxu0 %v1938_v33 }
 0x2f4   :  { %v1785_v51 = vadd.f32 %v1784_v48, %v6707_v27  ;;  %v1786_v52 = vpop.f32.mrb[99].mxu1  ;;  %2264 = vmatmul.mubr.bf16.gmra.mrb[156].mxu0 %v1937_v45  ;;  %v1891_v59 = vmax.f32 %v1781_v47, 0.0 }
 0x2f5   :  { %v1787_v54 = vadd.f32 %v1786_v52, %v6710_v29  ;;  %v1892_v56 = vmax.f32 %v1783_v50, 0.0  ;;  %v5810_v50 = vld [vmem:[%s7690_s2 + $0x3f4] ss:$8 sps:$4 sm:$0xff]  }
 0x2f6   :  { %v1893_v62 = vmax.f32 %v1785_v51, 0.0  ;;  %v5808_v51 = vld [vmem:[%s7690_s2 + $0x3f0] ss:$8 sps:$4 sm:$0xff]   ;;  %2686 = vmatprep.subr.bf16.mxu1 %v5810_v50 }
 0x2f7   :  { %v1894_v60 = vmax.f32 %v1787_v54, 0.0  ;;  %2687 = vmatpush1.bf16.msra.mxu1 %v5808_v51 }
 0x2f8   :  { %v1939_v2 = vpack.c.bf16 %v1893_v62, %v1891_v59 }
 0x2f9   :  { %v1940_v3 = vpack.c.bf16 %v1894_v60, %v1892_v56  ;;  %v1790_v4 = vpop.f32.mrb[100].mxu1 }
 0x2fa   :  { %v1791_v5 = vadd.f32 %v1790_v4, %v6707_v27  ;;  %v1792_v6 = vpop.f32.mrb[101].mxu1 }
 0x2fb   :  { %v1793_v7 = vadd.f32 %v1792_v6, %v6710_v29  ;;  %v1794_v8 = vpop.f32.mrb[102].mxu1  ;;  %2273 = vmatprep.mubr.bf16.mxu0 %v1940_v3 }
 0x2fc   :  { %v1795_v9 = vadd.f32 %v1794_v8, %v6707_v27  ;;  %v1796_v38 = vpop.f32.mrb[103].mxu1  ;;  %2274 = vmatmul.mubr.bf16.gmra.mrb[160].mxu0 %v1939_v2  ;;  %v1895_v28 = vmax.f32 %v1791_v5, 0.0 }
 0x2fd   :  { %v1797_v30 = vadd.f32 %v1796_v38, %v6710_v29  ;;  %v1896_v11 = vmax.f32 %v1793_v7, 0.0 }
 0x2fe   :  { %v1897_v10 = vmax.f32 %v1795_v9, 0.0 }
 0x2ff   :  { %v1898_v63 = vmax.f32 %v1797_v30, 0.0 }
 0x300   :  { %v1941_v12 = vpack.c.bf16 %v1897_v10, %v1895_v28 }
 0x301   :  { %v1942_v53 = vpack.c.bf16 %v1898_v63, %v1896_v11  ;;  %v1800_v13 = vpop.f32.mrb[104].mxu1 }
 0x302   :  { %v1801_v14 = vadd.f32 %v1800_v13, %v6707_v27  ;;  %v1802_v15 = vpop.f32.mrb[105].mxu1 }
 0x303   :  { %v1803_v16 = vadd.f32 %v1802_v15, %v6710_v29  ;;  %v1804_v17 = vpop.f32.mrb[106].mxu1  ;;  %2283 = vmatprep.mubr.bf16.mxu0 %v1942_v53 }
 0x304   :  { %v1805_v0 = vadd.f32 %v1804_v17, %v6707_v27  ;;  %v1806_v19 = vpop.f32.mrb[107].mxu1  ;;  %2284 = vmatmul.mubr.bf16.gmra.mrb[164].mxu0 %v1941_v12  ;;  %v1899_v21 = vmax.f32 %v1801_v14, 0.0 }
 0x305   :  { %v1807_v20 = vadd.f32 %v1806_v19, %v6710_v29  ;;  %v1900_v1 = vmax.f32 %v1803_v16, 0.0 }
 0x306   :  { %v1901_v18 = vmax.f32 %v1805_v0, 0.0 }
 0x307   :  { %v1902_v57 = vmax.f32 %v1807_v20, 0.0 }
 0x308   :  { %v1943_v22 = vpack.c.bf16 %v1901_v18, %v1899_v21 }
 0x309   :  { %v1944_v24 = vpack.c.bf16 %v1902_v57, %v1900_v1  ;;  %v1810_v23 = vpop.f32.mrb[108].mxu1 }
 0x30a   :  { %v1811_v58 = vadd.f32 %v1810_v23, %v6707_v27  ;;  %v1812_v43 = vpop.f32.mrb[109].mxu1 }
 0x30b   :  { %v1813_v31 = vadd.f32 %v1812_v43, %v6710_v29  ;;  %v1814_v32 = vpop.f32.mrb[110].mxu1  ;;  %2293 = vmatprep.mubr.bf16.mxu0 %v1944_v24 }
 0x30c   :  { %v1815_v34 = vadd.f32 %v1814_v32, %v6707_v27  ;;  %v1816_v55 = vpop.f32.mrb[111].mxu1  ;;  %2294 = vmatmul.mubr.bf16.gmra.mrb[168].mxu0 %v1943_v22  ;;  %v1903_v36 = vmax.f32 %v1811_v58, 0.0 }
 0x30d   :  { %v1817_v35 = vadd.f32 %v1816_v55, %v6710_v29  ;;  %v1904_v39 = vmax.f32 %v1813_v31, 0.0 }
 0x30e   :  { %v1905_v37 = vmax.f32 %v1815_v34, 0.0 }
 0x30f   :  { %v1906_v40 = vmax.f32 %v1817_v35, 0.0 }
 0x310   :  { %v1945_v41 = vpack.c.bf16 %v1905_v37, %v1903_v36 }
 0x311   :  { %v1946_v61 = vpack.c.bf16 %v1906_v40, %v1904_v39  ;;  %v1820_v42 = vpop.f32.mrb[112].mxu1 }
 0x312   :  { %v1821_v44 = vadd.f32 %v1820_v42, %v6707_v27  ;;  %v1822_v45 = vpop.f32.mrb[113].mxu1 }
 0x313   :  { %v1823_v33 = vadd.f32 %v1822_v45, %v6710_v29  ;;  %v1824_v46 = vpop.f32.mrb[114].mxu1  ;;  %2303 = vmatprep.mubr.bf16.mxu0 %v1946_v61 }
 0x314   :  { %v1825_v47 = vadd.f32 %v1824_v46, %v6707_v27  ;;  %v1826_v49 = vpop.f32.mrb[115].mxu1  ;;  %2304 = vmatmul.mubr.bf16.gmra.mrb[172].mxu0 %v1945_v41  ;;  %v1907_v52 = vmax.f32 %v1821_v44, 0.0  ;;  %v5813_v41 = vld [vmem:[%s7690_s2 + $0x404] ss:$8 sps:$4 sm:$0xff]  }
 0x315   :  { %v1827_v48 = vadd.f32 %v1826_v49, %v6710_v29  ;;  %v1908_v59 = vmax.f32 %v1823_v33, 0.0  ;;  %3202 = vmatprep.subr.bf16.mxu1 %v5813_v41 }
 0x316   :  { %v1909_v54 = vmax.f32 %v1825_v47, 0.0 }
 0x317   :  { %v1910_v62 = vmax.f32 %v1827_v48, 0.0 }
 0x318   :  { %v1947_v56 = vpack.c.bf16 %v1909_v54, %v1907_v52 }
 0x319   :  { %v1948_v60 = vpack.c.bf16 %v1910_v62, %v1908_v59  ;;  %v1830_v2 = vpop.f32.mrb[116].mxu1 }
 0x31a   :  { %v1831_v3 = vadd.f32 %v1830_v2, %v6707_v27  ;;  %v1832_v4 = vpop.f32.mrb[117].mxu1 }
 0x31b   :  { %v1833_v5 = vadd.f32 %v1832_v4, %v6710_v29  ;;  %v1834_v6 = vpop.f32.mrb[118].mxu1  ;;  %2313 = vmatprep.mubr.bf16.mxu0 %v1948_v60  ;;  %v5811_v60 = vld [vmem:[%s7690_s2 + $0x400] ss:$8 sps:$4 sm:$0xff]   ;;  %v5816_v4 = vld [vmem:[%s7690_s2 + $0x414] ss:$8 sps:$4 sm:$0xff]  }
 0x31c   :  { %v1835_v7 = vadd.f32 %v1834_v6, %v6707_v27  ;;  %v1836_v8 = vpop.f32.mrb[119].mxu1  ;;  %2314 = vmatmul.mubr.bf16.gmra.mrb[176].mxu0 %v1947_v56  ;;  %v1911_v38 = vmax.f32 %v1831_v3, 0.0 }
 0x31d   :  { %v1837_v9 = vadd.f32 %v1836_v8, %v6710_v29  ;;  %v1912_v28 = vmax.f32 %v1833_v5, 0.0 }
 0x31e   :  { %v1913_v30 = vmax.f32 %v1835_v7, 0.0 }
 0x31f   :  { %v1914_v10 = vmax.f32 %v1837_v9, 0.0 }
 0x320   :  { %v1949_v11 = vpack.c.bf16 %v1913_v30, %v1911_v38  ;;  %v5814_v38 = vld [vmem:[%s7690_s2 + $0x410] ss:$8 sps:$4 sm:$0xff]  }
 0x321   :  { %v1950_v63 = vpack.c.bf16 %v1914_v10, %v1912_v28  ;;  %v1840_v12 = vpop.f32.mrb[120].mxu1  ;;  %v5819_v10 = vld [vmem:[%s7690_s2 + $0x424] ss:$8 sps:$4 sm:$0xff]  }
 0x322   :  { %v1841_v53 = vadd.f32 %v1840_v12, %v6707_v27  ;;  %v1842_v13 = vpop.f32.mrb[121].mxu1 }
 0x323   :  { %v1843_v14 = vadd.f32 %v1842_v13, %v6710_v29  ;;  %v1844_v15 = vpop.f32.mrb[122].mxu1  ;;  %2323 = vmatprep.mubr.bf16.mxu0 %v1950_v63 }
 0x324   :  { %v1845_v16 = vadd.f32 %v1844_v15, %v6707_v27  ;;  %v1846_v17 = vpop.f32.mrb[123].mxu1  ;;  %2324 = vmatmul.mubr.bf16.gmra.mrb[180].mxu0 %v1949_v11  ;;  %v1915_v19 = vmax.f32 %v1841_v53, 0.0 }
 0x325   :  { %v1847_v0 = vadd.f32 %v1846_v17, %v6710_v29  ;;  %v1916_v21 = vmax.f32 %v1843_v14, 0.0  ;;  %v5817_v14 = vld [vmem:[%s7690_s2 + $0x420] ss:$8 sps:$4 sm:$0xff]   ;;  %v5822_v17 = vld [vmem:[%s7690_s2 + $0x434] ss:$8 sps:$4 sm:$0xff]  }
 0x326   :  { %v1917_v20 = vmax.f32 %v1845_v16, 0.0 }
 0x327   :  { %v1918_v18 = vmax.f32 %v1847_v0, 0.0 }
 0x328   :  { %v1951_v1 = vpack.c.bf16 %v1917_v20, %v1915_v19 }
 0x329   :  { %v1952_v57 = vpack.c.bf16 %v1918_v18, %v1916_v21  ;;  %v1850_v22 = vpop.f32.mrb[124].mxu1 }
 0x32a   :  { %v1851_v24 = vadd.f32 %v1850_v22, %v6707_v27  ;;  %v1852_v23 = vpop.f32.mrb[125].mxu1 }
 0x32b   :  { %v1853_v58 = vadd.f32 %v1852_v23, %v6710_v29  ;;  %v1854_v43 = vpop.f32.mrb[126].mxu1  ;;  %2333 = vmatprep.mubr.bf16.mxu0 %v1952_v57 }
 0x32c   :  { %v1855_v31 = vadd.f32 %v1854_v43, %v6707_v27  ;;  %v1856_v32 = vpop.f32.mrb[127].mxu1  ;;  %2334 = vmatmul.mubr.bf16.gmra.mrb[184].mxu0 %v1951_v1  ;;  %v1919_v55 = vmax.f32 %v1851_v24, 0.0  ;;  %v5068_v27 = vld [vmem:[%s7691_s3 + $0x3] ss:$8 sm:$0x3] }
 0x32d   :  { %v1857_v34 = vadd.f32 %v1856_v32, %v6710_v29  ;;  %v1920_v36 = vmax.f32 %v1853_v58, 0.0  ;;  %v6861_v61 = vrot.slane %v5068_v27, %v6328_v25  ;;  %v6864_v29 = vrot.slane %v5068_v27, %v6334_v26  ;;  %v5820_v1 = vld [vmem:[%s7690_s2 + $0x430] ss:$8 sps:$4 sm:$0xff]   ;;  %v5825_v24 = vld [vmem:[%s7690_s2 + $0x444] ss:$8 sps:$4 sm:$0xff]  }
 0x32e   :  { %v1921_v35 = vmax.f32 %v1855_v31, 0.0 }
 0x32f   :  { %v1922_v37 = vmax.f32 %v1857_v34, 0.0  ;;  %v5823_v34 = vld [vmem:[%s7690_s2 + $0x440] ss:$8 sps:$4 sm:$0xff]  }
 0x330   :  { %v1953_v39 = vpack.c.bf16 %v1921_v35, %v1919_v55 }
 0x331   :  { %v1954_v40 = vpack.c.bf16 %v1922_v37, %v1920_v36  ;;  %v5828_v36 = vld [vmem:[%s7690_s2 + $0x454] ss:$8 sps:$4 sm:$0xff]  }
 0x333   :  { %2343 = vmatprep.mubr.bf16.mxu0 %v1954_v40 }
 0x334   :  { %2344 = vmatmul.mubr.bf16.gmra.mrb[188].mxu0 %v1953_v39 }
 0x38f   :  { %v2195_v42 = vpop.f32.mrb[128].mxu0 }
 0x390   :  { %v2196_v44 = vadd.f32 %v2195_v42, %v6861_v61  ;;  %v2197_v45 = vpop.f32.mrb[129].mxu0  ;;  %v5826_v42 = vld [vmem:[%s7690_s2 + $0x450] ss:$8 sps:$4 sm:$0xff]  }
 0x391   :  { %v2198_v33 = vadd.f32 %v2197_v45, %v6864_v29  ;;  %v2199_v46 = vpop.f32.mrb[130].mxu0 }
 0x392   :  { %v2200_v47 = vadd.f32 %v2199_v46, %v6861_v61  ;;  %v2201_v49 = vpop.f32.mrb[131].mxu0  ;;  %v2354_v48 = vmax.f32 %v2196_v44, 0.0 }
 0x393   :  { %v2202_v50 = vadd.f32 %v2201_v49, %v6864_v29  ;;  %v2355_v52 = vmax.f32 %v2198_v33, 0.0  ;;  %v5831_v33 = vld [vmem:[%s7690_s2 + $0x464] ss:$8 sps:$4 sm:$0xff]  }
 0x394   :  { %v2356_v51 = vmax.f32 %v2200_v47, 0.0 }
 0x395   :  { %v2357_v54 = vmax.f32 %v2202_v50, 0.0 }
 0x396   :  { %v2418_v59 = vpack.c.bf16 %v2356_v51, %v2354_v48  ;;  %v5829_v51 = vld [vmem:[%s7690_s2 + $0x460] ss:$8 sps:$4 sm:$0xff]  }
 0x397   :  { %v2419_v62 = vpack.c.bf16 %v2357_v54, %v2355_v52  ;;  %v2205_v56 = vpop.f32.mrb[132].mxu0 }
 0x398   :  { %v2206_v2 = vadd.f32 %v2205_v56, %v6861_v61  ;;  %v2207_v3 = vpop.f32.mrb[133].mxu0 }
 0x399   :  { %v2208_v5 = vadd.f32 %v2207_v3, %v6864_v29  ;;  %v2209_v6 = vpop.f32.mrb[134].mxu0  ;;  %2688 = vmatprep.mubr.bf16.mxu1 %v2419_v62 }
 0x39a   :  { %v2210_v7 = vadd.f32 %v2209_v6, %v6861_v61  ;;  %v2211_v8 = vpop.f32.mrb[135].mxu0  ;;  %2689 = vmatmul.mubr.bf16.vlgmr.msra.gmra.mrb[128].mxu1 %v2418_v59  ;;  %v2358_v30 = vmax.f32 %v2206_v2, 0.0  ;;  %v5834_v59 = vld [vmem:[%s7690_s2 + $0x474] ss:$8 sps:$4 sm:$0xff]  }
 0x39b   :  { %v2212_v9 = vadd.f32 %v2211_v8, %v6864_v29  ;;  %3203 = vmatpush1.bf16.msra.mxu1 %v5811_v60  ;;  %v2359_v11 = vmax.f32 %v2208_v5, 0.0 }
 0x39c   :  { %v2360_v28 = vmax.f32 %v2210_v7, 0.0  ;;  %3204 = vmatprep.subr.bf16.mxu1 %v5816_v4  ;;  %v5832_v4 = vld [vmem:[%s7690_s2 + $0x470] ss:$8 sps:$4 sm:$0xff]   ;;  %v5837_v7 = vld [vmem:[%s7690_s2 + $0x484] ss:$8 sps:$4 sm:$0xff]  }
 0x39d   :  { %v2361_v63 = vmax.f32 %v2212_v9, 0.0 }
 0x39e   :  { %v2420_v12 = vpack.c.bf16 %v2360_v28, %v2358_v30 }
 0x39f   :  { %v2421_v53 = vpack.c.bf16 %v2361_v63, %v2359_v11  ;;  %v2215_v13 = vpop.f32.mrb[136].mxu0  ;;  %3205 = vmatpush1.bf16.msra.mxu1 %v5814_v38 }
 0x3a0   :  { %v2216_v15 = vadd.f32 %v2215_v13, %v6861_v61  ;;  %v2217_v16 = vpop.f32.mrb[137].mxu0  ;;  %3206 = vmatprep.subr.bf16.mxu1 %v5819_v10  ;;  %v5835_v10 = vld [vmem:[%s7690_s2 + $0x480] ss:$8 sps:$4 sm:$0xff]  }
 0x3a1   :  { %v2218_v0 = vadd.f32 %v2217_v16, %v6864_v29  ;;  %v2219_v19 = vpop.f32.mrb[138].mxu0  ;;  %2698 = vmatprep.mubr.bf16.mxu1 %v2421_v53 }
 0x3a2   :  { %v2220_v20 = vadd.f32 %v2219_v19, %v6861_v61  ;;  %v2221_v21 = vpop.f32.mrb[139].mxu0  ;;  %2699 = vmatmul.mubr.bf16.gmra.mrb[132].mxu1 %v2420_v12  ;;  %v2362_v57 = vmax.f32 %v2216_v15, 0.0  ;;  %v5840_v12 = vld [vmem:[%s7690_s2 + $0x494] ss:$8 sps:$4 sm:$0xff]  }
 0x3a3   :  { %v2222_v18 = vadd.f32 %v2221_v21, %v6864_v29  ;;  %3207 = vmatpush1.bf16.msra.mxu1 %v5817_v14  ;;  %v2363_v23 = vmax.f32 %v2218_v0, 0.0 }
 0x3a4   :  { %v2364_v22 = vmax.f32 %v2220_v20, 0.0  ;;  %3208 = vmatprep.subr.bf16.mxu1 %v5822_v17  ;;  %v5838_v17 = vld [vmem:[%s7690_s2 + $0x490] ss:$8 sps:$4 sm:$0xff]   ;;  %v5843_v20 = vld [vmem:[%s7690_s2 + $0x4a4] ss:$8 sps:$4 sm:$0xff]  }
 0x3a5   :  { %v2365_v58 = vmax.f32 %v2222_v18, 0.0 }
 0x3a6   :  { %v2422_v43 = vpack.c.bf16 %v2364_v22, %v2362_v57 }
 0x3a7   :  { %v2423_v31 = vpack.c.bf16 %v2365_v58, %v2363_v23  ;;  %v2225_v32 = vpop.f32.mrb[140].mxu0  ;;  %3209 = vmatpush1.bf16.msra.mxu1 %v5820_v1 }
 0x3a8   :  { %v2226_v55 = vadd.f32 %v2225_v32, %v6861_v61  ;;  %v2227_v35 = vpop.f32.mrb[141].mxu0  ;;  %3210 = vmatprep.subr.bf16.mxu1 %v5825_v24  ;;  %v5841_v24 = vld [vmem:[%s7690_s2 + $0x4a0] ss:$8 sps:$4 sm:$0xff]  }
 0x3a9   :  { %v2228_v37 = vadd.f32 %v2227_v35, %v6864_v29  ;;  %v2229_v39 = vpop.f32.mrb[142].mxu0  ;;  %2708 = vmatprep.mubr.bf16.mxu1 %v2423_v31 }
 0x3aa   :  { %v2230_v40 = vadd.f32 %v2229_v39, %v6861_v61  ;;  %v2231_v41 = vpop.f32.mrb[143].mxu0  ;;  %2709 = vmatmul.mubr.bf16.gmra.mrb[136].mxu1 %v2422_v43  ;;  %v2366_v44 = vmax.f32 %v2226_v55, 0.0  ;;  %v5846_v43 = vld [vmem:[%s7690_s2 + $0x4b4] ss:$8 sps:$4 sm:$0xff]  }
 0x3ab   :  { %v2232_v27 = vadd.f32 %v2231_v41, %v6864_v29  ;;  %3211 = vmatpush1.bf16.msra.mxu1 %v5823_v34  ;;  %v2367_v46 = vmax.f32 %v2228_v37, 0.0 }
 0x3ac   :  { %v2368_v45 = vmax.f32 %v2230_v40, 0.0  ;;  %3212 = vmatprep.subr.bf16.mxu1 %v5828_v36  ;;  %v5844_v36 = vld [vmem:[%s7690_s2 + $0x4b0] ss:$8 sps:$4 sm:$0xff]   ;;  %v5849_v40 = vld [vmem:[%s7690_s2 + $0x4c4] ss:$8 sps:$4 sm:$0xff]  }
 0x3ad   :  { %v2369_v47 = vmax.f32 %v2232_v27, 0.0 }
 0x3ae   :  { %v2424_v49 = vpack.c.bf16 %v2368_v45, %v2366_v44 }
 0x3af   :  { %v2425_v50 = vpack.c.bf16 %v2369_v47, %v2367_v46  ;;  %v2235_v48 = vpop.f32.mrb[144].mxu0  ;;  %3213 = vmatpush1.bf16.msra.mxu1 %v5826_v42 }
 0x3b0   :  { %v2236_v52 = vadd.f32 %v2235_v48, %v6861_v61  ;;  %v2237_v54 = vpop.f32.mrb[145].mxu0  ;;  %3214 = vmatprep.subr.bf16.mxu1 %v5831_v33  ;;  %v5847_v33 = vld [vmem:[%s7690_s2 + $0x4c0] ss:$8 sps:$4 sm:$0xff]  }
 0x3b1   :  { %v2238_v62 = vadd.f32 %v2237_v54, %v6864_v29  ;;  %v2239_v56 = vpop.f32.mrb[146].mxu0  ;;  %2718 = vmatprep.mubr.bf16.mxu1 %v2425_v50 }
 0x3b2   :  { %v2240_v60 = vadd.f32 %v2239_v56, %v6861_v61  ;;  %v2241_v2 = vpop.f32.mrb[147].mxu0  ;;  %2719 = vmatmul.mubr.bf16.gmra.mrb[140].mxu1 %v2424_v49  ;;  %v2370_v5 = vmax.f32 %v2236_v52, 0.0  ;;  %v5852_v49 = vld [vmem:[%s7690_s2 + $0x4d4] ss:$8 sps:$4 sm:$0xff]  }
 0x3b3   :  { %v2242_v3 = vadd.f32 %v2241_v2, %v6864_v29  ;;  %3215 = vmatpush1.bf16.msra.mxu1 %v5829_v51  ;;  %v2371_v8 = vmax.f32 %v2238_v62, 0.0 }
 0x3b4   :  { %v2372_v6 = vmax.f32 %v2240_v60, 0.0  ;;  %3216 = vmatprep.subr.bf16.mxu1 %v5834_v59  ;;  %v5850_v59 = vld [vmem:[%s7690_s2 + $0x4d0] ss:$8 sps:$4 sm:$0xff]   ;;  %v5855_v60 = vld [vmem:[%s7690_s2 + $0x4e4] ss:$8 sps:$4 sm:$0xff]  }
 0x3b5   :  { %v2373_v9 = vmax.f32 %v2242_v3, 0.0 }
 0x3b6   :  { %v2426_v38 = vpack.c.bf16 %v2372_v6, %v2370_v5 }
 0x3b7   :  { %v2427_v30 = vpack.c.bf16 %v2373_v9, %v2371_v8  ;;  %v2245_v28 = vpop.f32.mrb[148].mxu0  ;;  %3217 = vmatpush1.bf16.msra.mxu1 %v5832_v4 }
 0x3b8   :  { %v2246_v11 = vadd.f32 %v2245_v28, %v6861_v61  ;;  %v2247_v63 = vpop.f32.mrb[149].mxu0  ;;  %3218 = vmatprep.subr.bf16.mxu1 %v5837_v7  ;;  %v5853_v7 = vld [vmem:[%s7690_s2 + $0x4e0] ss:$8 sps:$4 sm:$0xff]  }
 0x3b9   :  { %v2248_v53 = vadd.f32 %v2247_v63, %v6864_v29  ;;  %v2249_v13 = vpop.f32.mrb[150].mxu0  ;;  %2728 = vmatprep.mubr.bf16.mxu1 %v2427_v30 }
 0x3ba   :  { %v2250_v14 = vadd.f32 %v2249_v13, %v6861_v61  ;;  %v2251_v15 = vpop.f32.mrb[151].mxu0  ;;  %2729 = vmatmul.mubr.bf16.gmra.mrb[144].mxu1 %v2426_v38  ;;  %v2374_v0 = vmax.f32 %v2246_v11, 0.0 }
 0x3bb   :  { %v2252_v16 = vadd.f32 %v2251_v15, %v6864_v29  ;;  %3219 = vmatpush1.bf16.msra.mxu1 %v5835_v10  ;;  %v2375_v21 = vmax.f32 %v2248_v53, 0.0 }
 0x3bc   :  { %v2376_v19 = vmax.f32 %v2250_v14, 0.0  ;;  %3220 = vmatprep.subr.bf16.mxu1 %v5840_v12 }
 0x3bd   :  { %v2377_v18 = vmax.f32 %v2252_v16, 0.0 }
 0x3be   :  { %v2428_v1 = vpack.c.bf16 %v2376_v19, %v2374_v0 }
 0x3bf   :  { %v2429_v57 = vpack.c.bf16 %v2377_v18, %v2375_v21  ;;  %v2255_v22 = vpop.f32.mrb[152].mxu0  ;;  %3221 = vmatpush1.bf16.msra.mxu1 %v5838_v17 }
 0x3c0   :  { %v2256_v23 = vadd.f32 %v2255_v22, %v6861_v61  ;;  %v2257_v58 = vpop.f32.mrb[153].mxu0  ;;  %3222 = vmatprep.subr.bf16.mxu1 %v5843_v20 }
 0x3c1   :  { %v2258_v31 = vadd.f32 %v2257_v58, %v6864_v29  ;;  %v2259_v32 = vpop.f32.mrb[154].mxu0  ;;  %2738 = vmatprep.mubr.bf16.mxu1 %v2429_v57 }
 0x3c2   :  { %v2260_v34 = vadd.f32 %v2259_v32, %v6861_v61  ;;  %v2261_v55 = vpop.f32.mrb[155].mxu0  ;;  %2739 = vmatmul.mubr.bf16.gmra.mrb[148].mxu1 %v2428_v1  ;;  %v2378_v37 = vmax.f32 %v2256_v23, 0.0 }
 0x3c3   :  { %v2262_v35 = vadd.f32 %v2261_v55, %v6864_v29  ;;  %3223 = vmatpush1.bf16.msra.mxu1 %v5841_v24  ;;  %v2379_v41 = vmax.f32 %v2258_v31, 0.0 }
 0x3c4   :  { %v2380_v39 = vmax.f32 %v2260_v34, 0.0  ;;  %3224 = vmatprep.subr.bf16.mxu1 %v5846_v43 }
 0x3c5   :  { %v2381_v27 = vmax.f32 %v2262_v35, 0.0 }
 0x3c6   :  { %v2430_v42 = vpack.c.bf16 %v2380_v39, %v2378_v37 }
 0x3c7   :  { %v2431_v44 = vpack.c.bf16 %v2381_v27, %v2379_v41  ;;  %v2265_v45 = vpop.f32.mrb[156].mxu0  ;;  %3225 = vmatpush1.bf16.msra.mxu1 %v5844_v36 }
 0x3c8   :  { %v2266_v46 = vadd.f32 %v2265_v45, %v6861_v61  ;;  %v2267_v47 = vpop.f32.mrb[157].mxu0  ;;  %3226 = vmatprep.subr.bf16.mxu1 %v5849_v40 }
 0x3c9   :  { %v2268_v50 = vadd.f32 %v2267_v47, %v6864_v29  ;;  %v2269_v48 = vpop.f32.mrb[158].mxu0  ;;  %2748 = vmatprep.mubr.bf16.mxu1 %v2431_v44 }
 0x3ca   :  { %v2270_v51 = vadd.f32 %v2269_v48, %v6861_v61  ;;  %v2271_v52 = vpop.f32.mrb[159].mxu0  ;;  %2749 = vmatmul.mubr.bf16.gmra.mrb[152].mxu1 %v2430_v42  ;;  %v2382_v62 = vmax.f32 %v2266_v46, 0.0 }
 0x3cb   :  { %v2272_v54 = vadd.f32 %v2271_v52, %v6864_v29  ;;  %3227 = vmatpush1.bf16.msra.mxu1 %v5847_v33  ;;  %v2383_v2 = vmax.f32 %v2268_v50, 0.0 }
 0x3cc   :  { %v2384_v56 = vmax.f32 %v2270_v51, 0.0  ;;  %3228 = vmatprep.subr.bf16.mxu1 %v5852_v49 }
 0x3cd   :  { %v2385_v3 = vmax.f32 %v2272_v54, 0.0 }
 0x3ce   :  { %v2432_v4 = vpack.c.bf16 %v2384_v56, %v2382_v62 }
 0x3cf   :  { %v2433_v5 = vpack.c.bf16 %v2385_v3, %v2383_v2  ;;  %v2275_v6 = vpop.f32.mrb[160].mxu0  ;;  %3229 = vmatpush1.bf16.msra.mxu1 %v5850_v59 }
 0x3d0   :  { %v2276_v8 = vadd.f32 %v2275_v6, %v6861_v61  ;;  %v2277_v9 = vpop.f32.mrb[161].mxu0  ;;  %3230 = vmatprep.subr.bf16.mxu1 %v5855_v60 }
 0x3d1   :  { %v2278_v38 = vadd.f32 %v2277_v9, %v6864_v29  ;;  %v2279_v30 = vpop.f32.mrb[162].mxu0  ;;  %2758 = vmatprep.mubr.bf16.mxu1 %v2433_v5 }
 0x3d2   :  { %v2280_v28 = vadd.f32 %v2279_v30, %v6861_v61  ;;  %v2281_v10 = vpop.f32.mrb[163].mxu0  ;;  %2759 = vmatmul.mubr.bf16.gmra.mrb[156].mxu1 %v2432_v4  ;;  %v2386_v63 = vmax.f32 %v2276_v8, 0.0 }
 0x3d3   :  { %v2282_v11 = vadd.f32 %v2281_v10, %v6864_v29  ;;  %3231 = vmatpush1.bf16.msra.mxu1 %v5853_v7  ;;  %v2387_v53 = vmax.f32 %v2278_v38, 0.0  ;;  %v5858_v38 = vld [vmem:[%s7690_s2 + $0x4f4] ss:$8 sps:$4 sm:$0xff]  }
 0x3d4   :  { %v2388_v12 = vmax.f32 %v2280_v28, 0.0  ;;  %v5856_v28 = vld [vmem:[%s7690_s2 + $0x4f0] ss:$8 sps:$4 sm:$0xff]   ;;  %3232 = vmatprep.subr.bf16.mxu1 %v5858_v38  ;;  %v5870_v38 = vld [vmem:[%s7690_s2 + $0x534] ss:$8 sps:$4 sm:$0xff]  }
 0x3d5   :  { %v2389_v13 = vmax.f32 %v2282_v11, 0.0 }
 0x3d6   :  { %v2434_v14 = vpack.c.bf16 %v2388_v12, %v2386_v63 }
 0x3d7   :  { %v2435_v15 = vpack.c.bf16 %v2389_v13, %v2387_v53  ;;  %v2285_v16 = vpop.f32.mrb[164].mxu0  ;;  %3233 = vmatpush1.bf16.msra.mxu1 %v5856_v28 }
 0x3d8   :  { %v2286_v17 = vadd.f32 %v2285_v16, %v6861_v61  ;;  %v2287_v0 = vpop.f32.mrb[165].mxu0 }
 0x3d9   :  { %v2288_v19 = vadd.f32 %v2287_v0, %v6864_v29  ;;  %v2289_v20 = vpop.f32.mrb[166].mxu0  ;;  %2768 = vmatprep.mubr.bf16.mxu1 %v2435_v15 }
 0x3da   :  { %v2290_v21 = vadd.f32 %v2289_v20, %v6861_v61  ;;  %v2291_v18 = vpop.f32.mrb[167].mxu0  ;;  %2769 = vmatmul.mubr.bf16.gmra.mrb[160].mxu1 %v2434_v14  ;;  %v2390_v57 = vmax.f32 %v2286_v17, 0.0 }
 0x3db   :  { %v2292_v1 = vadd.f32 %v2291_v18, %v6864_v29  ;;  %v2391_v24 = vmax.f32 %v2288_v19, 0.0 }
 0x3dc   :  { %v2392_v22 = vmax.f32 %v2290_v21, 0.0 }
 0x3dd   :  { %v2393_v23 = vmax.f32 %v2292_v1, 0.0 }
 0x3de   :  { %v2436_v58 = vpack.c.bf16 %v2392_v22, %v2390_v57 }
 0x3df   :  { %v2437_v43 = vpack.c.bf16 %v2393_v23, %v2391_v24  ;;  %v2295_v31 = vpop.f32.mrb[168].mxu0 }
 0x3e0   :  { %v2296_v32 = vadd.f32 %v2295_v31, %v6861_v61  ;;  %v2297_v34 = vpop.f32.mrb[169].mxu0 }
 0x3e1   :  { %v2298_v55 = vadd.f32 %v2297_v34, %v6864_v29  ;;  %v2299_v35 = vpop.f32.mrb[170].mxu0  ;;  %2778 = vmatprep.mubr.bf16.mxu1 %v2437_v43 }
 0x3e2   :  { %v2300_v36 = vadd.f32 %v2299_v35, %v6861_v61  ;;  %v2301_v37 = vpop.f32.mrb[171].mxu0  ;;  %2779 = vmatmul.mubr.bf16.gmra.mrb[164].mxu1 %v2436_v58  ;;  %v2394_v40 = vmax.f32 %v2296_v32, 0.0 }
 0x3e3   :  { %v2302_v39 = vadd.f32 %v2301_v37, %v6864_v29  ;;  %v2395_v27 = vmax.f32 %v2298_v55, 0.0 }
 0x3e4   :  { %v2396_v41 = vmax.f32 %v2300_v36, 0.0 }
 0x3e5   :  { %v2397_v42 = vmax.f32 %v2302_v39, 0.0 }
 0x3e6   :  { %v2438_v44 = vpack.c.bf16 %v2396_v41, %v2394_v40 }
 0x3e7   :  { %v2439_v45 = vpack.c.bf16 %v2397_v42, %v2395_v27  ;;  %v2305_v33 = vpop.f32.mrb[172].mxu0 }
 0x3e8   :  { %v2306_v46 = vadd.f32 %v2305_v33, %v6861_v61  ;;  %v2307_v47 = vpop.f32.mrb[173].mxu0 }
 0x3e9   :  { %v2308_v49 = vadd.f32 %v2307_v47, %v6864_v29  ;;  %v2309_v50 = vpop.f32.mrb[174].mxu0  ;;  %2788 = vmatprep.mubr.bf16.mxu1 %v2439_v45 }
 0x3ea   :  { %v2310_v48 = vadd.f32 %v2309_v50, %v6861_v61  ;;  %v2311_v51 = vpop.f32.mrb[175].mxu0  ;;  %2789 = vmatmul.mubr.bf16.gmra.mrb[168].mxu1 %v2438_v44  ;;  %v2398_v54 = vmax.f32 %v2306_v46, 0.0 }
 0x3eb   :  { %v2312_v52 = vadd.f32 %v2311_v51, %v6864_v29  ;;  %v2399_v62 = vmax.f32 %v2308_v49, 0.0 }
 0x3ec   :  { %v2400_v59 = vmax.f32 %v2310_v48, 0.0 }
 0x3ed   :  { %v2401_v56 = vmax.f32 %v2312_v52, 0.0 }
 0x3ee   :  { %v2440_v60 = vpack.c.bf16 %v2400_v59, %v2398_v54 }
 0x3ef   :  { %v2441_v2 = vpack.c.bf16 %v2401_v56, %v2399_v62  ;;  %v2315_v3 = vpop.f32.mrb[176].mxu0 }
 0x3f0   :  { %v2316_v4 = vadd.f32 %v2315_v3, %v6861_v61  ;;  %v2317_v5 = vpop.f32.mrb[177].mxu0  ;;  %v5133_v3 = vld [vmem:[%s7691_s3 + $0x4] ss:$8 sm:$0x3] }
 0x3f1   :  { %v2318_v6 = vadd.f32 %v2317_v5, %v6864_v29  ;;  %v2319_v7 = vpop.f32.mrb[178].mxu0  ;;  %2798 = vmatprep.mubr.bf16.mxu1 %v2441_v2  ;;  %v5864_v2 = vld [vmem:[%s7690_s2 + $0x514] ss:$8 sps:$4 sm:$0xff]   ;;  %v5867_v5 = vld [vmem:[%s7690_s2 + $0x524] ss:$8 sps:$4 sm:$0xff]  }
 0x3f2   :  { %v2320_v8 = vadd.f32 %v2319_v7, %v6861_v61  ;;  %v2321_v9 = vpop.f32.mrb[179].mxu0  ;;  %2799 = vmatmul.mubr.bf16.gmra.mrb[172].mxu1 %v2440_v60  ;;  %v2402_v10 = vmax.f32 %v2316_v4, 0.0  ;;  %v5859_v60 = vld [vmem:[%s7690_s2 + $0x500] ss:$8 sps:$4 sm:$0xff]   ;;  %v7048_v7 = vrot.slane %v5133_v3, %v6334_v26 }
 0x3f3   :  { %v2322_v30 = vadd.f32 %v2321_v9, %v6864_v29  ;;  %v2403_v63 = vmax.f32 %v2318_v6, 0.0  ;;  %v5865_v4 = vld [vmem:[%s7690_s2 + $0x520] ss:$8 sps:$4 sm:$0xff]   ;;  %v7045_v6 = vrot.slane %v5133_v3, %v6328_v25  ;;  %v5868_v9 = vld [vmem:[%s7690_s2 + $0x530] ss:$8 sps:$4 sm:$0xff]  }
 0x3f4   :  { %v2404_v11 = vmax.f32 %v2320_v8, 0.0  ;;  %v5891_v3 = vld [vmem:[%s7690_s2 + $0x5a4] ss:$8 sps:$4 sm:$0xff]  }
 0x3f5   :  { %v2405_v12 = vmax.f32 %v2322_v30, 0.0 }
 0x3f6   :  { %v2442_v53 = vpack.c.bf16 %v2404_v11, %v2402_v10 }
 0x3f7   :  { %v2443_v13 = vpack.c.bf16 %v2405_v12, %v2403_v63  ;;  %v2325_v14 = vpop.f32.mrb[180].mxu0 }
 0x3f8   :  { %v2326_v15 = vadd.f32 %v2325_v14, %v6861_v61  ;;  %v2327_v16 = vpop.f32.mrb[181].mxu0 }
 0x3f9   :  { %v2328_v17 = vadd.f32 %v2327_v16, %v6864_v29  ;;  %v2329_v0 = vpop.f32.mrb[182].mxu0  ;;  %2808 = vmatprep.mubr.bf16.mxu1 %v2443_v13  ;;  %v5873_v13 = vld [vmem:[%s7690_s2 + $0x544] ss:$8 sps:$4 sm:$0xff]  }
 0x3fa   :  { %v2330_v19 = vadd.f32 %v2329_v0, %v6861_v61  ;;  %v2331_v20 = vpop.f32.mrb[183].mxu0  ;;  %2809 = vmatmul.mubr.bf16.gmra.mrb[176].mxu1 %v2442_v53  ;;  %v2406_v18 = vmax.f32 %v2326_v15, 0.0  ;;  %v5871_v53 = vld [vmem:[%s7690_s2 + $0x540] ss:$8 sps:$4 sm:$0xff]   ;;  %v5876_v15 = vld [vmem:[%s7690_s2 + $0x554] ss:$8 sps:$4 sm:$0xff]  }
 0x3fb   :  { %v2332_v21 = vadd.f32 %v2331_v20, %v6864_v29  ;;  %v2407_v57 = vmax.f32 %v2328_v17, 0.0 }
 0x3fc   :  { %v2408_v1 = vmax.f32 %v2330_v19, 0.0 }
 0x3fd   :  { %v2409_v22 = vmax.f32 %v2332_v21, 0.0  ;;  %v5874_v21 = vld [vmem:[%s7690_s2 + $0x550] ss:$8 sps:$4 sm:$0xff]  }
 0x3fe   :  { %v2444_v24 = vpack.c.bf16 %v2408_v1, %v2406_v18 }
 0x3ff   :  { %v2445_v23 = vpack.c.bf16 %v2409_v22, %v2407_v57  ;;  %v2335_v58 = vpop.f32.mrb[184].mxu0  ;;  %v5879_v57 = vld [vmem:[%s7690_s2 + $0x564] ss:$8 sps:$4 sm:$0xff]  }
 0x400   :  { %v2336_v43 = vadd.f32 %v2335_v58, %v6861_v61  ;;  %v2337_v31 = vpop.f32.mrb[185].mxu0 }
 0x401   :  { %v2338_v32 = vadd.f32 %v2337_v31, %v6864_v29  ;;  %v2339_v34 = vpop.f32.mrb[186].mxu0  ;;  %2818 = vmatprep.mubr.bf16.mxu1 %v2445_v23 }
 0x402   :  { %v2340_v55 = vadd.f32 %v2339_v34, %v6861_v61  ;;  %v2341_v35 = vpop.f32.mrb[187].mxu0  ;;  %2819 = vmatmul.mubr.bf16.gmra.mrb[180].mxu1 %v2444_v24  ;;  %v2410_v37 = vmax.f32 %v2336_v43, 0.0 }
 0x403   :  { %v2342_v36 = vadd.f32 %v2341_v35, %v6864_v29  ;;  %v2411_v40 = vmax.f32 %v2338_v32, 0.0  ;;  %v5877_v32 = vld [vmem:[%s7690_s2 + $0x560] ss:$8 sps:$4 sm:$0xff]  }
 0x404   :  { %v2412_v39 = vmax.f32 %v2340_v55, 0.0  ;;  %v5882_v55 = vld [vmem:[%s7690_s2 + $0x574] ss:$8 sps:$4 sm:$0xff]  }
 0x405   :  { %v2413_v41 = vmax.f32 %v2342_v36, 0.0 }
 0x406   :  { %v2446_v27 = vpack.c.bf16 %v2412_v39, %v2410_v37 }
 0x407   :  { %v2447_v42 = vpack.c.bf16 %v2413_v41, %v2411_v40  ;;  %v2345_v44 = vpop.f32.mrb[188].mxu0  ;;  %v5880_v41 = vld [vmem:[%s7690_s2 + $0x570] ss:$8 sps:$4 sm:$0xff]  }
 0x408   :  { %v2346_v45 = vadd.f32 %v2345_v44, %v6861_v61  ;;  %v2347_v33 = vpop.f32.mrb[189].mxu0  ;;  %v5885_v44 = vld [vmem:[%s7690_s2 + $0x584] ss:$8 sps:$4 sm:$0xff]  }
 0x409   :  { %v2348_v46 = vadd.f32 %v2347_v33, %v6864_v29  ;;  %v2349_v47 = vpop.f32.mrb[190].mxu0  ;;  %2828 = vmatprep.mubr.bf16.mxu1 %v2447_v42 }
 0x40a   :  { %v2350_v49 = vadd.f32 %v2349_v47, %v6861_v61  ;;  %v2351_v50 = vpop.f32.mrb[191].mxu0  ;;  %2829 = vmatmul.mubr.bf16.gmra.mrb[184].mxu1 %v2446_v27  ;;  %v2414_v51 = vmax.f32 %v2346_v45, 0.0  ;;  %v5861_v61 = vld [vmem:[%s7690_s2 + $0x504] ss:$8 sps:$4 sm:$0xff]  }
 0x40b   :  { %v2352_v48 = vadd.f32 %v2351_v50, %v6864_v29  ;;  %v2415_v54 = vmax.f32 %v2348_v46, 0.0  ;;  %3774 = vmatprep.subr.bf16.mxu0 %v5861_v61  ;;  %v5862_v29 = vld [vmem:[%s7690_s2 + $0x510] ss:$8 sps:$4 sm:$0xff]  }
 0x40c   :  { %v2416_v52 = vmax.f32 %v2350_v49, 0.0  ;;  %3775 = vmatpush1.bf16.msra.mxu0 %v5859_v60  ;;  %v5886_v61 = vld [vmem:[%s7690_s2 + $0x590] ss:$8 sps:$4 sm:$0xff]  }
 0x40d   :  { %v2417_v59 = vmax.f32 %v2352_v48, 0.0  ;;  %3776 = vmatprep.subr.bf16.mxu0 %v5864_v2  ;;  %v5883_v48 = vld [vmem:[%s7690_s2 + $0x580] ss:$8 sps:$4 sm:$0xff]  }
 0x40e   :  { %v2448_v62 = vpack.c.bf16 %v2416_v52, %v2414_v51  ;;  %v5888_v52 = vld [vmem:[%s7690_s2 + $0x594] ss:$8 sps:$4 sm:$0xff]  }
 0x40f   :  { %v2449_v56 = vpack.c.bf16 %v2417_v59, %v2415_v54 }
 0x410   :  { %3777 = vmatpush1.bf16.msra.mxu0 %v5862_v29 }
 0x411   :  { %2838 = vmatprep.mubr.bf16.mxu1 %v2449_v56  ;;  %3778 = vmatprep.subr.bf16.mxu0 %v5867_v5 }
 0x412   :  { %2839 = vmatmul.mubr.bf16.gmra.mrb[188].mxu1 %v2448_v62 }
 0x414   :  { %3779 = vmatpush1.bf16.msra.mxu0 %v5865_v4 }
 0x415   :  { %3780 = vmatprep.subr.bf16.mxu0 %v5870_v38 }
 0x418   :  { %3781 = vmatpush1.bf16.msra.mxu0 %v5868_v9 }
 0x419   :  { %3782 = vmatprep.subr.bf16.mxu0 %v5873_v13 }
 0x41c   :  { %3783 = vmatpush1.bf16.msra.mxu0 %v5871_v53 }
 0x41d   :  { %3784 = vmatprep.subr.bf16.mxu0 %v5876_v15  ;;  %v5892_v15 = vld [vmem:[%s7690_s2 + $0x5b0] ss:$8 sps:$4 sm:$0xff]  }
 0x420   :  { %3785 = vmatpush1.bf16.msra.mxu0 %v5874_v21 }
 0x421   :  { %3786 = vmatprep.subr.bf16.mxu0 %v5879_v57 }
 0x424   :  { %3787 = vmatpush1.bf16.msra.mxu0 %v5877_v32 }
 0x425   :  { %3788 = vmatprep.subr.bf16.mxu0 %v5882_v55  ;;  %v5898_v55 = vld [vmem:[%s7690_s2 + $0x5d0] ss:$8 sps:$4 sm:$0xff]  }
 0x428   :  { %3789 = vmatpush1.bf16.msra.mxu0 %v5880_v41 }
 0x429   :  { %3790 = vmatprep.subr.bf16.mxu0 %v5885_v44 }
 0x42c   :  { %3791 = vmatpush1.bf16.msra.mxu0 %v5883_v48 }
 0x42d   :  { %3792 = vmatprep.subr.bf16.mxu0 %v5888_v52 }
 0x430   :  { %3793 = vmatpush1.bf16.msra.mxu0 %v5886_v61 }
 0x431   :  { %3794 = vmatprep.subr.bf16.mxu0 %v5891_v3 }
 0x46d   :  { %v2690_v8 = vpop.f32.mrb[128].mxu1 }
 0x46e   :  { %v2691_v30 = vadd.f32 %v2690_v8, %v7045_v6  ;;  %v2692_v28 = vpop.f32.mrb[129].mxu1 }
 0x46f   :  { %v2693_v10 = vadd.f32 %v2692_v28, %v7048_v7  ;;  %v2694_v11 = vpop.f32.mrb[130].mxu1  ;;  %v5889_v28 = vld [vmem:[%s7690_s2 + $0x5a0] ss:$8 sps:$4 sm:$0xff]  }
 0x470   :  { %v2695_v63 = vadd.f32 %v2694_v11, %v7045_v6  ;;  %v2696_v12 = vpop.f32.mrb[131].mxu1  ;;  %v2849_v16 = vmax.f32 %v2691_v30, 0.0  ;;  %v5894_v11 = vld [vmem:[%s7690_s2 + $0x5b4] ss:$8 sps:$4 sm:$0xff]   ;;  %3795 = vmatpush1.bf16.msra.mxu0 %v5889_v28 }
 0x471   :  { %v2697_v14 = vadd.f32 %v2696_v12, %v7048_v7  ;;  %v2850_v0 = vmax.f32 %v2693_v10, 0.0  ;;  %3796 = vmatprep.subr.bf16.mxu0 %v5894_v11 }
 0x472   :  { %v2851_v17 = vmax.f32 %v2695_v63, 0.0 }
 0x473   :  { %v2852_v19 = vmax.f32 %v2697_v14, 0.0 }
 0x474   :  { %v2913_v20 = vpack.c.bf16 %v2851_v17, %v2849_v16  ;;  %3797 = vmatpush1.bf16.msra.mxu0 %v5892_v15 }
 0x475   :  { %v2914_v18 = vpack.c.bf16 %v2852_v19, %v2850_v0  ;;  %v2700_v1 = vpop.f32.mrb[132].mxu1  ;;  %v5897_v0 = vld [vmem:[%s7690_s2 + $0x5c4] ss:$8 sps:$4 sm:$0xff]  }
 0x476   :  { %v2701_v22 = vadd.f32 %v2700_v1, %v7045_v6  ;;  %v2702_v24 = vpop.f32.mrb[133].mxu1  ;;  %3798 = vmatprep.subr.bf16.mxu0 %v5897_v0 }
 0x477   :  { %v2703_v23 = vadd.f32 %v2702_v24, %v7048_v7  ;;  %v2704_v58 = vpop.f32.mrb[134].mxu1  ;;  %3234 = vmatprep.mubr.bf16.mxu1 %v2914_v18 }
 0x478   :  { %v2705_v43 = vadd.f32 %v2704_v58, %v7045_v6  ;;  %v2706_v31 = vpop.f32.mrb[135].mxu1  ;;  %3235 = vmatmul.mubr.bf16.vlgmr.msra.gmra.mrb[0].mxu1 %v2913_v20  ;;  %v2853_v35 = vmax.f32 %v2701_v22, 0.0  ;;  %v5895_v22 = vld [vmem:[%s7690_s2 + $0x5c0] ss:$8 sps:$4 sm:$0xff]  }
 0x479   :  { %v2707_v34 = vadd.f32 %v2706_v31, %v7048_v7  ;;  %v2854_v37 = vmax.f32 %v2703_v23, 0.0  ;;  %v5900_v23 = vld [vmem:[%s7690_s2 + $0x5d4] ss:$8 sps:$4 sm:$0xff]   ;;  %3799 = vmatpush1.bf16.msra.mxu0 %v5895_v22 }
 0x47a   :  { %v2855_v36 = vmax.f32 %v2705_v43, 0.0  ;;  %3800 = vmatprep.subr.bf16.mxu0 %v5900_v23 }
 0x47b   :  { %v2856_v39 = vmax.f32 %v2707_v34, 0.0 }
 0x47c   :  { %v2915_v40 = vpack.c.bf16 %v2855_v36, %v2853_v35 }
 0x47d   :  { %v2916_v27 = vpack.c.bf16 %v2856_v39, %v2854_v37  ;;  %v2710_v42 = vpop.f32.mrb[136].mxu1  ;;  %v5903_v37 = vld [vmem:[%s7690_s2 + $0x5e4] ss:$8 sps:$4 sm:$0xff]   ;;  %3801 = vmatpush1.bf16.msra.mxu0 %v5898_v55 }
 0x47e   :  { %v2711_v45 = vadd.f32 %v2710_v42, %v7045_v6  ;;  %v2712_v33 = vpop.f32.mrb[137].mxu1  ;;  %3802 = vmatprep.subr.bf16.mxu0 %v5903_v37 }
 0x47f   :  { %v2713_v46 = vadd.f32 %v2712_v33, %v7048_v7  ;;  %v2714_v47 = vpop.f32.mrb[138].mxu1  ;;  %3244 = vmatprep.mubr.bf16.mxu1 %v2916_v27 }
 0x480   :  { %v2715_v49 = vadd.f32 %v2714_v47, %v7045_v6  ;;  %v2716_v50 = vpop.f32.mrb[139].mxu1  ;;  %3245 = vmatmul.mubr.bf16.gmra.mrb[4].mxu1 %v2915_v40  ;;  %v2857_v54 = vmax.f32 %v2711_v45, 0.0  ;;  %v5901_v45 = vld [vmem:[%s7690_s2 + $0x5e0] ss:$8 sps:$4 sm:$0xff]  }
 0x481   :  { %v2717_v51 = vadd.f32 %v2716_v50, %v7048_v7  ;;  %v2858_v62 = vmax.f32 %v2713_v46, 0.0  ;;  %3803 = vmatpush1.bf16.msra.mxu0 %v5901_v45 }
 0x482   :  { %v2859_v59 = vmax.f32 %v2715_v49, 0.0 }
 0x483   :  { %v2860_v56 = vmax.f32 %v2717_v51, 0.0 }
 0x484   :  { %v2917_v60 = vpack.c.bf16 %v2859_v59, %v2857_v54 }
 0x485   :  { %v2918_v29 = vpack.c.bf16 %v2860_v56, %v2858_v62  ;;  %v2720_v2 = vpop.f32.mrb[140].mxu1 }
 0x486   :  { %v2721_v4 = vadd.f32 %v2720_v2, %v7045_v6  ;;  %v2722_v5 = vpop.f32.mrb[141].mxu1 }
 0x487   :  { %v2723_v8 = vadd.f32 %v2722_v5, %v7048_v7  ;;  %v2724_v9 = vpop.f32.mrb[142].mxu1  ;;  %3254 = vmatprep.mubr.bf16.mxu1 %v2918_v29 }
 0x488   :  { %v2725_v38 = vadd.f32 %v2724_v9, %v7045_v6  ;;  %v2726_v30 = vpop.f32.mrb[143].mxu1  ;;  %3255 = vmatmul.mubr.bf16.gmra.mrb[8].mxu1 %v2917_v60  ;;  %v2861_v63 = vmax.f32 %v2721_v4, 0.0 }
 0x489   :  { %v2727_v10 = vadd.f32 %v2726_v30, %v7048_v7  ;;  %v2862_v53 = vmax.f32 %v2723_v8, 0.0 }
 0x48a   :  { %v2863_v12 = vmax.f32 %v2725_v38, 0.0 }
 0x48b   :  { %v2864_v13 = vmax.f32 %v2727_v10, 0.0 }
 0x48c   :  { %v2919_v14 = vpack.c.bf16 %v2863_v12, %v2861_v63 }
 0x48d   :  { %v2920_v16 = vpack.c.bf16 %v2864_v13, %v2862_v53  ;;  %v2730_v17 = vpop.f32.mrb[144].mxu1 }
 0x48e   :  { %v2731_v19 = vadd.f32 %v2730_v17, %v7045_v6  ;;  %v2732_v20 = vpop.f32.mrb[145].mxu1 }
 0x48f   :  { %v2733_v21 = vadd.f32 %v2732_v20, %v7048_v7  ;;  %v2734_v18 = vpop.f32.mrb[146].mxu1  ;;  %3264 = vmatprep.mubr.bf16.mxu1 %v2920_v16 }
 0x490   :  { %v2735_v1 = vadd.f32 %v2734_v18, %v7045_v6  ;;  %v2736_v57 = vpop.f32.mrb[147].mxu1  ;;  %3265 = vmatmul.mubr.bf16.gmra.mrb[12].mxu1 %v2919_v14  ;;  %v2865_v58 = vmax.f32 %v2731_v19, 0.0 }
 0x491   :  { %v2737_v24 = vadd.f32 %v2736_v57, %v7048_v7  ;;  %v2866_v31 = vmax.f32 %v2733_v21, 0.0 }
 0x492   :  { %v2867_v43 = vmax.f32 %v2735_v1, 0.0 }
 0x493   :  { %v2868_v32 = vmax.f32 %v2737_v24, 0.0 }
 0x494   :  { %v2921_v34 = vpack.c.bf16 %v2867_v43, %v2865_v58 }
 0x495   :  { %v2922_v35 = vpack.c.bf16 %v2868_v32, %v2866_v31  ;;  %v2740_v36 = vpop.f32.mrb[148].mxu1 }
 0x496   :  { %v2741_v39 = vadd.f32 %v2740_v36, %v7045_v6  ;;  %v2742_v40 = vpop.f32.mrb[149].mxu1 }
 0x497   :  { %v2743_v41 = vadd.f32 %v2742_v40, %v7048_v7  ;;  %v2744_v27 = vpop.f32.mrb[150].mxu1  ;;  %3274 = vmatprep.mubr.bf16.mxu1 %v2922_v35 }
 0x498   :  { %v2745_v42 = vadd.f32 %v2744_v27, %v7045_v6  ;;  %v2746_v44 = vpop.f32.mrb[151].mxu1  ;;  %3275 = vmatmul.mubr.bf16.gmra.mrb[16].mxu1 %v2921_v34  ;;  %v2869_v46 = vmax.f32 %v2741_v39, 0.0 }
 0x499   :  { %v2747_v33 = vadd.f32 %v2746_v44, %v7048_v7  ;;  %v2870_v49 = vmax.f32 %v2743_v41, 0.0 }
 0x49a   :  { %v2871_v47 = vmax.f32 %v2745_v42, 0.0 }
 0x49b   :  { %v2872_v50 = vmax.f32 %v2747_v33, 0.0 }
 0x49c   :  { %v2923_v48 = vpack.c.bf16 %v2871_v47, %v2869_v46 }
 0x49d   :  { %v2924_v51 = vpack.c.bf16 %v2872_v50, %v2870_v49  ;;  %v2750_v52 = vpop.f32.mrb[152].mxu1 }
 0x49e   :  { %v2751_v54 = vadd.f32 %v2750_v52, %v7045_v6  ;;  %v2752_v59 = vpop.f32.mrb[153].mxu1 }
 0x49f   :  { %v2753_v62 = vadd.f32 %v2752_v59, %v7048_v7  ;;  %v2754_v56 = vpop.f32.mrb[154].mxu1  ;;  %3284 = vmatprep.mubr.bf16.mxu1 %v2924_v51 }
 0x4a0   :  { %v2755_v60 = vadd.f32 %v2754_v56, %v7045_v6  ;;  %v2756_v61 = vpop.f32.mrb[155].mxu1  ;;  %3285 = vmatmul.mubr.bf16.gmra.mrb[20].mxu1 %v2923_v48  ;;  %v2873_v2 = vmax.f32 %v2751_v54, 0.0 }
 0x4a1   :  { %v2757_v29 = vadd.f32 %v2756_v61, %v7048_v7  ;;  %v2874_v4 = vmax.f32 %v2753_v62, 0.0 }
 0x4a2   :  { %v2875_v3 = vmax.f32 %v2755_v60, 0.0 }
 0x4a3   :  { %v2876_v5 = vmax.f32 %v2757_v29, 0.0 }
 0x4a4   :  { %v2925_v8 = vpack.c.bf16 %v2875_v3, %v2873_v2 }
 0x4a5   :  { %v2926_v9 = vpack.c.bf16 %v2876_v5, %v2874_v4  ;;  %v2760_v38 = vpop.f32.mrb[156].mxu1 }
 0x4a6   :  { %v2761_v30 = vadd.f32 %v2760_v38, %v7045_v6  ;;  %v2762_v28 = vpop.f32.mrb[157].mxu1 }
 0x4a7   :  { %v2763_v10 = vadd.f32 %v2762_v28, %v7048_v7  ;;  %v2764_v11 = vpop.f32.mrb[158].mxu1  ;;  %3294 = vmatprep.mubr.bf16.mxu1 %v2926_v9 }
 0x4a8   :  { %v2765_v63 = vadd.f32 %v2764_v11, %v7045_v6  ;;  %v2766_v12 = vpop.f32.mrb[159].mxu1  ;;  %3295 = vmatmul.mubr.bf16.gmra.mrb[24].mxu1 %v2925_v8  ;;  %v2877_v13 = vmax.f32 %v2761_v30, 0.0 }
 0x4a9   :  { %v2767_v53 = vadd.f32 %v2766_v12, %v7048_v7  ;;  %v2878_v15 = vmax.f32 %v2763_v10, 0.0 }
 0x4aa   :  { %v2879_v14 = vmax.f32 %v2765_v63, 0.0 }
 0x4ab   :  { %v2880_v16 = vmax.f32 %v2767_v53, 0.0 }
 0x4ac   :  { %v2927_v17 = vpack.c.bf16 %v2879_v14, %v2877_v13 }
 0x4ad   :  { %v2928_v0 = vpack.c.bf16 %v2880_v16, %v2878_v15  ;;  %v2770_v19 = vpop.f32.mrb[160].mxu1 }
 0x4ae   :  { %v2771_v20 = vadd.f32 %v2770_v19, %v7045_v6  ;;  %v2772_v21 = vpop.f32.mrb[161].mxu1 }
 0x4af   :  { %v2773_v18 = vadd.f32 %v2772_v21, %v7048_v7  ;;  %v2774_v1 = vpop.f32.mrb[162].mxu1  ;;  %3304 = vmatprep.mubr.bf16.mxu1 %v2928_v0 }
 0x4b0   :  { %v2775_v57 = vadd.f32 %v2774_v1, %v7045_v6  ;;  %v2776_v22 = vpop.f32.mrb[163].mxu1  ;;  %3305 = vmatmul.mubr.bf16.gmra.mrb[28].mxu1 %v2927_v17  ;;  %v2881_v23 = vmax.f32 %v2771_v20, 0.0 }
 0x4b1   :  { %v2777_v24 = vadd.f32 %v2776_v22, %v7048_v7  ;;  %v2882_v43 = vmax.f32 %v2773_v18, 0.0  ;;  %v5906_v18 = vld [vmem:[%s7690_s2 + $0x5f4] ss:$8 sps:$4 sm:$0xff]  }
 0x4b2   :  { %v2883_v58 = vmax.f32 %v2775_v57, 0.0  ;;  %v5904_v57 = vld [vmem:[%s7690_s2 + $0x5f0] ss:$8 sps:$4 sm:$0xff]   ;;  %3804 = vmatprep.subr.bf16.mxu0 %v5906_v18 }
 0x4b3   :  { %v2884_v31 = vmax.f32 %v2777_v24, 0.0  ;;  %3805 = vmatpush1.bf16.msra.mxu0 %v5904_v57 }
 0x4b4   :  { %v2929_v32 = vpack.c.bf16 %v2883_v58, %v2881_v23 }
 0x4b5   :  { %v2930_v34 = vpack.c.bf16 %v2884_v31, %v2882_v43  ;;  %v2780_v55 = vpop.f32.mrb[164].mxu1 }
 0x4b6   :  { %v2781_v35 = vadd.f32 %v2780_v55, %v7045_v6  ;;  %v2782_v36 = vpop.f32.mrb[165].mxu1 }
 0x4b7   :  { %v2783_v37 = vadd.f32 %v2782_v36, %v7048_v7  ;;  %v2784_v39 = vpop.f32.mrb[166].mxu1  ;;  %3314 = vmatprep.mubr.bf16.mxu1 %v2930_v34 }
 0x4b8   :  { %v2785_v40 = vadd.f32 %v2784_v39, %v7045_v6  ;;  %v2786_v41 = vpop.f32.mrb[167].mxu1  ;;  %3315 = vmatmul.mubr.bf16.gmra.mrb[32].mxu1 %v2929_v32  ;;  %v2885_v42 = vmax.f32 %v2781_v35, 0.0 }
 0x4b9   :  { %v2787_v27 = vadd.f32 %v2786_v41, %v7048_v7  ;;  %v2886_v45 = vmax.f32 %v2783_v37, 0.0 }
 0x4ba   :  { %v2887_v44 = vmax.f32 %v2785_v40, 0.0 }
 0x4bb   :  { %v2888_v33 = vmax.f32 %v2787_v27, 0.0 }
 0x4bc   :  { %v2931_v46 = vpack.c.bf16 %v2887_v44, %v2885_v42 }
 0x4bd   :  { %v2932_v47 = vpack.c.bf16 %v2888_v33, %v2886_v45  ;;  %v2790_v49 = vpop.f32.mrb[168].mxu1 }
 0x4be   :  { %v2791_v50 = vadd.f32 %v2790_v49, %v7045_v6  ;;  %v2792_v48 = vpop.f32.mrb[169].mxu1 }
 0x4bf   :  { %v2793_v51 = vadd.f32 %v2792_v48, %v7048_v7  ;;  %v2794_v52 = vpop.f32.mrb[170].mxu1  ;;  %3324 = vmatprep.mubr.bf16.mxu1 %v2932_v47 }
 0x4c0   :  { %v2795_v54 = vadd.f32 %v2794_v52, %v7045_v6  ;;  %v2796_v59 = vpop.f32.mrb[171].mxu1  ;;  %3325 = vmatmul.mubr.bf16.gmra.mrb[36].mxu1 %v2931_v46  ;;  %v2889_v56 = vmax.f32 %v2791_v50, 0.0 }
 0x4c1   :  { %v2797_v62 = vadd.f32 %v2796_v59, %v7048_v7  ;;  %v2890_v61 = vmax.f32 %v2793_v51, 0.0 }
 0x4c2   :  { %v2891_v60 = vmax.f32 %v2795_v54, 0.0 }
 0x4c3   :  { %v2892_v29 = vmax.f32 %v2797_v62, 0.0 }
 0x4c4   :  { %v2933_v2 = vpack.c.bf16 %v2891_v60, %v2889_v56 }
 0x4c5   :  { %v2934_v3 = vpack.c.bf16 %v2892_v29, %v2890_v61  ;;  %v2800_v4 = vpop.f32.mrb[172].mxu1 }
 0x4c6   :  { %v2801_v5 = vadd.f32 %v2800_v4, %v7045_v6  ;;  %v2802_v8 = vpop.f32.mrb[173].mxu1 }
 0x4c7   :  { %v2803_v9 = vadd.f32 %v2802_v8, %v7048_v7  ;;  %v2804_v38 = vpop.f32.mrb[174].mxu1  ;;  %3334 = vmatprep.mubr.bf16.mxu1 %v2934_v3 }
 0x4c8   :  { %v2805_v30 = vadd.f32 %v2804_v38, %v7045_v6  ;;  %v2806_v28 = vpop.f32.mrb[175].mxu1  ;;  %3335 = vmatmul.mubr.bf16.gmra.mrb[40].mxu1 %v2933_v2  ;;  %v2893_v11 = vmax.f32 %v2801_v5, 0.0 }
 0x4c9   :  { %v2807_v10 = vadd.f32 %v2806_v28, %v7048_v7  ;;  %v2894_v12 = vmax.f32 %v2803_v9, 0.0 }
 0x4ca   :  { %v2895_v63 = vmax.f32 %v2805_v30, 0.0 }
 0x4cb   :  { %v2896_v53 = vmax.f32 %v2807_v10, 0.0 }
 0x4cc   :  { %v2935_v13 = vpack.c.bf16 %v2895_v63, %v2893_v11 }
 0x4cd   :  { %v2936_v14 = vpack.c.bf16 %v2896_v53, %v2894_v12  ;;  %v2810_v15 = vpop.f32.mrb[176].mxu1 }
 0x4ce   :  { %v2811_v16 = vadd.f32 %v2810_v15, %v7045_v6  ;;  %v2812_v17 = vpop.f32.mrb[177].mxu1 }
 0x4cf   :  { %v2813_v0 = vadd.f32 %v2812_v17, %v7048_v7  ;;  %v2814_v19 = vpop.f32.mrb[178].mxu1  ;;  %3344 = vmatprep.mubr.bf16.mxu1 %v2936_v14 }
 0x4d0   :  { %v2815_v20 = vadd.f32 %v2814_v19, %v7045_v6  ;;  %v2816_v21 = vpop.f32.mrb[179].mxu1  ;;  %3345 = vmatmul.mubr.bf16.gmra.mrb[44].mxu1 %v2935_v13  ;;  %v2897_v22 = vmax.f32 %v2811_v16, 0.0  ;;  %v5909_v13 = vld [vmem:[%s7690_s2 + $0x604] ss:$8 sps:$4 sm:$0xff]  }
 0x4d1   :  { %v2817_v1 = vadd.f32 %v2816_v21, %v7048_v7  ;;  %v2898_v23 = vmax.f32 %v2813_v0, 0.0  ;;  %4269 = vmatprep.subr.bf16.mxu0 %v5909_v13 }
 0x4d2   :  { %v2899_v24 = vmax.f32 %v2815_v20, 0.0 }
 0x4d3   :  { %v2900_v58 = vmax.f32 %v2817_v1, 0.0 }
 0x4d4   :  { %v2937_v43 = vpack.c.bf16 %v2899_v24, %v2897_v22 }
 0x4d5   :  { %v2938_v31 = vpack.c.bf16 %v2900_v58, %v2898_v23  ;;  %v2820_v32 = vpop.f32.mrb[180].mxu1 }
 0x4d6   :  { %v2821_v34 = vadd.f32 %v2820_v32, %v7045_v6  ;;  %v2822_v55 = vpop.f32.mrb[181].mxu1 }
 0x4d7   :  { %v2823_v35 = vadd.f32 %v2822_v55, %v7048_v7  ;;  %v2824_v36 = vpop.f32.mrb[182].mxu1  ;;  %3354 = vmatprep.mubr.bf16.mxu1 %v2938_v31  ;;  %v5907_v31 = vld [vmem:[%s7690_s2 + $0x600] ss:$8 sps:$4 sm:$0xff]   ;;  %v5912_v55 = vld [vmem:[%s7690_s2 + $0x614] ss:$8 sps:$4 sm:$0xff]  }
 0x4d8   :  { %v2825_v37 = vadd.f32 %v2824_v36, %v7045_v6  ;;  %v2826_v39 = vpop.f32.mrb[183].mxu1  ;;  %3355 = vmatmul.mubr.bf16.gmra.mrb[48].mxu1 %v2937_v43  ;;  %v2901_v41 = vmax.f32 %v2821_v34, 0.0 }
 0x4d9   :  { %v2827_v40 = vadd.f32 %v2826_v39, %v7048_v7  ;;  %v2902_v42 = vmax.f32 %v2823_v35, 0.0 }
 0x4da   :  { %v2903_v27 = vmax.f32 %v2825_v37, 0.0 }
 0x4db   :  { %v2904_v44 = vmax.f32 %v2827_v40, 0.0 }
 0x4dc   :  { %v2939_v45 = vpack.c.bf16 %v2903_v27, %v2901_v41  ;;  %v5910_v41 = vld [vmem:[%s7690_s2 + $0x610] ss:$8 sps:$4 sm:$0xff]  }
 0x4dd   :  { %v2940_v33 = vpack.c.bf16 %v2904_v44, %v2902_v42  ;;  %v2830_v46 = vpop.f32.mrb[184].mxu1  ;;  %v5915_v44 = vld [vmem:[%s7690_s2 + $0x624] ss:$8 sps:$4 sm:$0xff]  }
 0x4de   :  { %v2831_v47 = vadd.f32 %v2830_v46, %v7045_v6  ;;  %v2832_v49 = vpop.f32.mrb[185].mxu1 }
 0x4df   :  { %v2833_v50 = vadd.f32 %v2832_v49, %v7048_v7  ;;  %v2834_v48 = vpop.f32.mrb[186].mxu1  ;;  %3364 = vmatprep.mubr.bf16.mxu1 %v2940_v33 }
 0x4e0   :  { %v2835_v51 = vadd.f32 %v2834_v48, %v7045_v6  ;;  %v2836_v52 = vpop.f32.mrb[187].mxu1  ;;  %3365 = vmatmul.mubr.bf16.gmra.mrb[52].mxu1 %v2939_v45  ;;  %v2905_v59 = vmax.f32 %v2831_v47, 0.0 }
 0x4e1   :  { %v2837_v54 = vadd.f32 %v2836_v52, %v7048_v7  ;;  %v2906_v56 = vmax.f32 %v2833_v50, 0.0  ;;  %v5913_v50 = vld [vmem:[%s7690_s2 + $0x620] ss:$8 sps:$4 sm:$0xff]   ;;  %v5918_v52 = vld [vmem:[%s7690_s2 + $0x634] ss:$8 sps:$4 sm:$0xff]  }
 0x4e2   :  { %v2907_v62 = vmax.f32 %v2835_v51, 0.0 }
 0x4e3   :  { %v2908_v60 = vmax.f32 %v2837_v54, 0.0 }
 0x4e4   :  { %v2941_v61 = vpack.c.bf16 %v2907_v62, %v2905_v59 }
 0x4e5   :  { %v2942_v29 = vpack.c.bf16 %v2908_v60, %v2906_v56  ;;  %v2840_v2 = vpop.f32.mrb[188].mxu1 }
 0x4e6   :  { %v2841_v3 = vadd.f32 %v2840_v2, %v7045_v6  ;;  %v2842_v4 = vpop.f32.mrb[189].mxu1 }
 0x4e7   :  { %v2843_v5 = vadd.f32 %v2842_v4, %v7048_v7  ;;  %v2844_v8 = vpop.f32.mrb[190].mxu1  ;;  %3374 = vmatprep.mubr.bf16.mxu1 %v2942_v29 }
 0x4e8   :  { %v2845_v9 = vadd.f32 %v2844_v8, %v7045_v6  ;;  %v2846_v38 = vpop.f32.mrb[191].mxu1  ;;  %3375 = vmatmul.mubr.bf16.gmra.mrb[56].mxu1 %v2941_v61  ;;  %v2909_v28 = vmax.f32 %v2841_v3, 0.0  ;;  %v5230_v6 = vld [vmem:[%s7691_s3 + $0x5] ss:$8 sm:$0x3] }
 0x4e9   :  { %v2847_v30 = vadd.f32 %v2846_v38, %v7048_v7  ;;  %v2910_v11 = vmax.f32 %v2843_v5, 0.0  ;;  %v7199_v14 = vrot.slane %v5230_v6, %v6328_v25  ;;  %v7202_v7 = vrot.slane %v5230_v6, %v6334_v26  ;;  %v5916_v61 = vld [vmem:[%s7690_s2 + $0x630] ss:$8 sps:$4 sm:$0xff]   ;;  %v5921_v3 = vld [vmem:[%s7690_s2 + $0x644] ss:$8 sps:$4 sm:$0xff]  }
 0x4ea   :  { %v2911_v10 = vmax.f32 %v2845_v9, 0.0 }
 0x4eb   :  { %v2912_v63 = vmax.f32 %v2847_v30, 0.0  ;;  %v5919_v30 = vld [vmem:[%s7690_s2 + $0x640] ss:$8 sps:$4 sm:$0xff]  }
 0x4ec   :  { %v2943_v12 = vpack.c.bf16 %v2911_v10, %v2909_v28 }
 0x4ed   :  { %v2944_v53 = vpack.c.bf16 %v2912_v63, %v2910_v11  ;;  %v5924_v11 = vld [vmem:[%s7690_s2 + $0x654] ss:$8 sps:$4 sm:$0xff]  }
 0x4ef   :  { %3384 = vmatprep.mubr.bf16.mxu1 %v2944_v53 }
 0x4f0   :  { %3385 = vmatmul.mubr.bf16.gmra.mrb[60].mxu1 %v2943_v12 }
 0x54b   :  { %v3236_v15 = vpop.f32.mrb[0].mxu1 }
 0x54c   :  { %v3408_v16 = vadd.f32 %v7199_v14, %v3236_v15  ;;  %v3238_v17 = vpop.f32.mrb[1].mxu1  ;;  %v5922_v15 = vld [vmem:[%s7690_s2 + $0x650] ss:$8 sps:$4 sm:$0xff]  }
 0x54d   :  { %v3409_v0 = vadd.f32 %v7202_v7, %v3238_v17  ;;  %v3240_v19 = vpop.f32.mrb[2].mxu1 }
 0x54e   :  { %v3410_v20 = vadd.f32 %v7199_v14, %v3240_v19  ;;  %v3242_v21 = vpop.f32.mrb[3].mxu1  ;;  %v3472_v1 = vmax.f32 %v3408_v16, 0.0 }
 0x54f   :  { %v3411_v18 = vadd.f32 %v7202_v7, %v3242_v21  ;;  %v3473_v22 = vmax.f32 %v3409_v0, 0.0  ;;  %v5927_v0 = vld [vmem:[%s7690_s2 + $0x664] ss:$8 sps:$4 sm:$0xff]  }
 0x550   :  { %v3474_v57 = vmax.f32 %v3410_v20, 0.0 }
 0x551   :  { %v3475_v24 = vmax.f32 %v3411_v18, 0.0 }
 0x552   :  { %v3536_v23 = vpack.c.bf16 %v3474_v57, %v3472_v1  ;;  %v5925_v57 = vld [vmem:[%s7690_s2 + $0x660] ss:$8 sps:$4 sm:$0xff]  }
 0x553   :  { %v3537_v58 = vpack.c.bf16 %v3475_v24, %v3473_v22  ;;  %v3246_v43 = vpop.f32.mrb[4].mxu1 }
 0x554   :  { %v3412_v32 = vadd.f32 %v7199_v14, %v3246_v43  ;;  %v3248_v34 = vpop.f32.mrb[5].mxu1 }
 0x555   :  { %v3413_v35 = vadd.f32 %v7202_v7, %v3248_v34  ;;  %v3250_v36 = vpop.f32.mrb[6].mxu1  ;;  %3806 = vmatprep.mubr.bf16.mxu0 %v3537_v58 }
 0x556   :  { %v3414_v37 = vadd.f32 %v7199_v14, %v3250_v36  ;;  %v3252_v39 = vpop.f32.mrb[7].mxu1  ;;  %3807 = vmatmul.mubr.bf16.vlgmr.msra.gmra.mrb[192].mxu0 %v3536_v23  ;;  %v3476_v27 = vmax.f32 %v3412_v32, 0.0  ;;  %v5930_v23 = vld [vmem:[%s7690_s2 + $0x674] ss:$8 sps:$4 sm:$0xff]  }
 0x557   :  { %v3415_v40 = vadd.f32 %v7202_v7, %v3252_v39  ;;  %4270 = vmatpush1.bf16.msra.mxu0 %v5907_v31  ;;  %v3477_v45 = vmax.f32 %v3413_v35, 0.0 }
 0x558   :  { %v3478_v42 = vmax.f32 %v3414_v37, 0.0  ;;  %4271 = vmatprep.subr.bf16.mxu0 %v5912_v55  ;;  %v5928_v55 = vld [vmem:[%s7690_s2 + $0x670] ss:$8 sps:$4 sm:$0xff]   ;;  %v5933_v37 = vld [vmem:[%s7690_s2 + $0x684] ss:$8 sps:$4 sm:$0xff]  }
 0x559   :  { %v3479_v33 = vmax.f32 %v3415_v40, 0.0 }
 0x55a   :  { %v3538_v46 = vpack.c.bf16 %v3478_v42, %v3476_v27 }
 0x55b   :  { %v3539_v47 = vpack.c.bf16 %v3479_v33, %v3477_v45  ;;  %v3256_v49 = vpop.f32.mrb[8].mxu1  ;;  %4272 = vmatpush1.bf16.msra.mxu0 %v5910_v41 }
 0x55c   :  { %v3416_v48 = vadd.f32 %v7199_v14, %v3256_v49  ;;  %v3258_v51 = vpop.f32.mrb[9].mxu1  ;;  %4273 = vmatprep.subr.bf16.mxu0 %v5915_v44  ;;  %v5931_v44 = vld [vmem:[%s7690_s2 + $0x680] ss:$8 sps:$4 sm:$0xff]  }
 0x55d   :  { %v3417_v54 = vadd.f32 %v7202_v7, %v3258_v51  ;;  %v3260_v59 = vpop.f32.mrb[10].mxu1  ;;  %3816 = vmatprep.mubr.bf16.mxu0 %v3539_v47 }
 0x55e   :  { %v3418_v62 = vadd.f32 %v7199_v14, %v3260_v59  ;;  %v3262_v56 = vpop.f32.mrb[11].mxu1  ;;  %3817 = vmatmul.mubr.bf16.gmra.mrb[196].mxu0 %v3538_v46  ;;  %v3480_v29 = vmax.f32 %v3416_v48, 0.0  ;;  %v5936_v46 = vld [vmem:[%s7690_s2 + $0x694] ss:$8 sps:$4 sm:$0xff]  }
 0x55f   :  { %v3419_v60 = vadd.f32 %v7202_v7, %v3262_v56  ;;  %4274 = vmatpush1.bf16.msra.mxu0 %v5913_v50  ;;  %v3481_v4 = vmax.f32 %v3417_v54, 0.0 }
 0x560   :  { %v3482_v2 = vmax.f32 %v3418_v62, 0.0  ;;  %4275 = vmatprep.subr.bf16.mxu0 %v5918_v52  ;;  %v5934_v52 = vld [vmem:[%s7690_s2 + $0x690] ss:$8 sps:$4 sm:$0xff]   ;;  %v5939_v62 = vld [vmem:[%s7690_s2 + $0x6a4] ss:$8 sps:$4 sm:$0xff]  }
 0x561   :  { %v3483_v5 = vmax.f32 %v3419_v60, 0.0 }
 0x562   :  { %v3540_v8 = vpack.c.bf16 %v3482_v2, %v3480_v29 }
 0x563   :  { %v3541_v9 = vpack.c.bf16 %v3483_v5, %v3481_v4  ;;  %v3266_v38 = vpop.f32.mrb[12].mxu1  ;;  %4276 = vmatpush1.bf16.msra.mxu0 %v5916_v61 }
 0x564   :  { %v3420_v28 = vadd.f32 %v7199_v14, %v3266_v38  ;;  %v3268_v10 = vpop.f32.mrb[13].mxu1  ;;  %4277 = vmatprep.subr.bf16.mxu0 %v5921_v3  ;;  %v5937_v3 = vld [vmem:[%s7690_s2 + $0x6a0] ss:$8 sps:$4 sm:$0xff]  }
 0x565   :  { %v3421_v63 = vadd.f32 %v7202_v7, %v3268_v10  ;;  %v3270_v12 = vpop.f32.mrb[14].mxu1  ;;  %3826 = vmatprep.mubr.bf16.mxu0 %v3541_v9 }
 0x566   :  { %v3422_v53 = vadd.f32 %v7199_v14, %v3270_v12  ;;  %v3272_v13 = vpop.f32.mrb[15].mxu1  ;;  %3827 = vmatmul.mubr.bf16.gmra.mrb[200].mxu0 %v3540_v8  ;;  %v3484_v16 = vmax.f32 %v3420_v28, 0.0  ;;  %v5942_v8 = vld [vmem:[%s7690_s2 + $0x6b4] ss:$8 sps:$4 sm:$0xff]  }
 0x567   :  { %v3423_v6 = vadd.f32 %v7202_v7, %v3272_v13  ;;  %4278 = vmatpush1.bf16.msra.mxu0 %v5919_v30  ;;  %v3485_v19 = vmax.f32 %v3421_v63, 0.0 }
 0x568   :  { %v3486_v17 = vmax.f32 %v3422_v53, 0.0  ;;  %4279 = vmatprep.subr.bf16.mxu0 %v5924_v11  ;;  %v5940_v11 = vld [vmem:[%s7690_s2 + $0x6b0] ss:$8 sps:$4 sm:$0xff]   ;;  %v5945_v53 = vld [vmem:[%s7690_s2 + $0x6c4] ss:$8 sps:$4 sm:$0xff]  }
 0x569   :  { %v3487_v20 = vmax.f32 %v3423_v6, 0.0 }
 0x56a   :  { %v3542_v21 = vpack.c.bf16 %v3486_v17, %v3484_v16 }
 0x56b   :  { %v3543_v18 = vpack.c.bf16 %v3487_v20, %v3485_v19  ;;  %v3276_v1 = vpop.f32.mrb[16].mxu1  ;;  %4280 = vmatpush1.bf16.msra.mxu0 %v5922_v15 }
 0x56c   :  { %v3424_v22 = vadd.f32 %v7199_v14, %v3276_v1  ;;  %v3278_v24 = vpop.f32.mrb[17].mxu1  ;;  %4281 = vmatprep.subr.bf16.mxu0 %v5927_v0  ;;  %v5943_v0 = vld [vmem:[%s7690_s2 + $0x6c0] ss:$8 sps:$4 sm:$0xff]  }
 0x56d   :  { %v3425_v58 = vadd.f32 %v7202_v7, %v3278_v24  ;;  %v3280_v43 = vpop.f32.mrb[18].mxu1  ;;  %3836 = vmatprep.mubr.bf16.mxu0 %v3543_v18 }
 0x56e   :  { %v3426_v31 = vadd.f32 %v7199_v14, %v3280_v43  ;;  %v3282_v32 = vpop.f32.mrb[19].mxu1  ;;  %3837 = vmatmul.mubr.bf16.gmra.mrb[204].mxu0 %v3542_v21  ;;  %v3488_v35 = vmax.f32 %v3424_v22, 0.0  ;;  %v5948_v21 = vld [vmem:[%s7690_s2 + $0x6d4] ss:$8 sps:$4 sm:$0xff]  }
 0x56f   :  { %v3427_v34 = vadd.f32 %v7202_v7, %v3282_v32  ;;  %4282 = vmatpush1.bf16.msra.mxu0 %v5925_v57  ;;  %v3489_v39 = vmax.f32 %v3425_v58, 0.0 }
 0x570   :  { %v3490_v36 = vmax.f32 %v3426_v31, 0.0  ;;  %4283 = vmatprep.subr.bf16.mxu0 %v5930_v23  ;;  %v5946_v23 = vld [vmem:[%s7690_s2 + $0x6d0] ss:$8 sps:$4 sm:$0xff]   ;;  %v5951_v31 = vld [vmem:[%s7690_s2 + $0x6e4] ss:$8 sps:$4 sm:$0xff]  }
 0x571   :  { %v3491_v40 = vmax.f32 %v3427_v34, 0.0 }
 0x572   :  { %v3544_v41 = vpack.c.bf16 %v3490_v36, %v3488_v35 }
 0x573   :  { %v3545_v27 = vpack.c.bf16 %v3491_v40, %v3489_v39  ;;  %v3286_v42 = vpop.f32.mrb[20].mxu1  ;;  %4284 = vmatpush1.bf16.msra.mxu0 %v5928_v55 }
 0x574   :  { %v3428_v45 = vadd.f32 %v7199_v14, %v3286_v42  ;;  %v3288_v33 = vpop.f32.mrb[21].mxu1  ;;  %4285 = vmatprep.subr.bf16.mxu0 %v5933_v37  ;;  %v5949_v37 = vld [vmem:[%s7690_s2 + $0x6e0] ss:$8 sps:$4 sm:$0xff]  }
 0x575   :  { %v3429_v47 = vadd.f32 %v7202_v7, %v3288_v33  ;;  %v3290_v49 = vpop.f32.mrb[22].mxu1  ;;  %3846 = vmatprep.mubr.bf16.mxu0 %v3545_v27 }
 0x576   :  { %v3430_v50 = vadd.f32 %v7199_v14, %v3290_v49  ;;  %v3292_v48 = vpop.f32.mrb[23].mxu1  ;;  %3847 = vmatmul.mubr.bf16.gmra.mrb[208].mxu0 %v3544_v41  ;;  %v3492_v54 = vmax.f32 %v3428_v45, 0.0 }
 0x577   :  { %v3431_v51 = vadd.f32 %v7202_v7, %v3292_v48  ;;  %4286 = vmatpush1.bf16.msra.mxu0 %v5931_v44  ;;  %v3493_v56 = vmax.f32 %v3429_v47, 0.0 }
 0x578   :  { %v3494_v59 = vmax.f32 %v3430_v50, 0.0  ;;  %4287 = vmatprep.subr.bf16.mxu0 %v5936_v46 }
 0x579   :  { %v3495_v60 = vmax.f32 %v3431_v51, 0.0 }
 0x57a   :  { %v3546_v61 = vpack.c.bf16 %v3494_v59, %v3492_v54 }
 0x57b   :  { %v3547_v29 = vpack.c.bf16 %v3495_v60, %v3493_v56  ;;  %v3296_v2 = vpop.f32.mrb[24].mxu1  ;;  %4288 = vmatpush1.bf16.msra.mxu0 %v5934_v52 }
 0x57c   :  { %v3432_v4 = vadd.f32 %v7199_v14, %v3296_v2  ;;  %v3298_v5 = vpop.f32.mrb[25].mxu1  ;;  %4289 = vmatprep.subr.bf16.mxu0 %v5939_v62 }
 0x57d   :  { %v3433_v9 = vadd.f32 %v7202_v7, %v3298_v5  ;;  %v3300_v38 = vpop.f32.mrb[26].mxu1  ;;  %3856 = vmatprep.mubr.bf16.mxu0 %v3547_v29 }
 0x57e   :  { %v3434_v30 = vadd.f32 %v7199_v14, %v3300_v38  ;;  %v3302_v28 = vpop.f32.mrb[27].mxu1  ;;  %3857 = vmatmul.mubr.bf16.gmra.mrb[212].mxu0 %v3546_v61  ;;  %v3496_v63 = vmax.f32 %v3432_v4, 0.0 }
 0x57f   :  { %v3435_v10 = vadd.f32 %v7202_v7, %v3302_v28  ;;  %4290 = vmatpush1.bf16.msra.mxu0 %v5937_v3  ;;  %v3497_v13 = vmax.f32 %v3433_v9, 0.0 }
 0x580   :  { %v3498_v12 = vmax.f32 %v3434_v30, 0.0  ;;  %4291 = vmatprep.subr.bf16.mxu0 %v5942_v8 }
 0x581   :  { %v3499_v6 = vmax.f32 %v3435_v10, 0.0 }
 0x582   :  { %v3548_v15 = vpack.c.bf16 %v3498_v12, %v3496_v63 }
 0x583   :  { %v3549_v16 = vpack.c.bf16 %v3499_v6, %v3497_v13  ;;  %v3306_v17 = vpop.f32.mrb[28].mxu1  ;;  %4292 = vmatpush1.bf16.msra.mxu0 %v5940_v11 }
 0x584   :  { %v3436_v19 = vadd.f32 %v7199_v14, %v3306_v17  ;;  %v3308_v20 = vpop.f32.mrb[29].mxu1  ;;  %4293 = vmatprep.subr.bf16.mxu0 %v5945_v53 }
 0x585   :  { %v3437_v18 = vadd.f32 %v7202_v7, %v3308_v20  ;;  %v3310_v1 = vpop.f32.mrb[30].mxu1  ;;  %3866 = vmatprep.mubr.bf16.mxu0 %v3549_v16 }
 0x586   :  { %v3438_v57 = vadd.f32 %v7199_v14, %v3310_v1  ;;  %v3312_v22 = vpop.f32.mrb[31].mxu1  ;;  %3867 = vmatmul.mubr.bf16.gmra.mrb[216].mxu0 %v3548_v15  ;;  %v3500_v58 = vmax.f32 %v3436_v19, 0.0 }
 0x587   :  { %v3439_v24 = vadd.f32 %v7202_v7, %v3312_v22  ;;  %4294 = vmatpush1.bf16.msra.mxu0 %v5943_v0  ;;  %v3501_v32 = vmax.f32 %v3437_v18, 0.0 }
 0x588   :  { %v3502_v43 = vmax.f32 %v3438_v57, 0.0  ;;  %4295 = vmatprep.subr.bf16.mxu0 %v5948_v21 }
 0x589   :  { %v3503_v34 = vmax.f32 %v3439_v24, 0.0 }
 0x58a   :  { %v3550_v55 = vpack.c.bf16 %v3502_v43, %v3500_v58 }
 0x58b   :  { %v3551_v35 = vpack.c.bf16 %v3503_v34, %v3501_v32  ;;  %v3316_v36 = vpop.f32.mrb[32].mxu1  ;;  %4296 = vmatpush1.bf16.msra.mxu0 %v5946_v23 }
 0x58c   :  { %v3440_v39 = vadd.f32 %v7199_v14, %v3316_v36  ;;  %v3318_v40 = vpop.f32.mrb[33].mxu1  ;;  %4297 = vmatprep.subr.bf16.mxu0 %v5951_v31 }
 0x58d   :  { %v3441_v41 = vadd.f32 %v7202_v7, %v3318_v40  ;;  %v3320_v27 = vpop.f32.mrb[34].mxu1  ;;  %3876 = vmatprep.mubr.bf16.mxu0 %v3551_v35 }
 0x58e   :  { %v3442_v42 = vadd.f32 %v7199_v14, %v3320_v27  ;;  %v3322_v44 = vpop.f32.mrb[35].mxu1  ;;  %3877 = vmatmul.mubr.bf16.gmra.mrb[220].mxu0 %v3550_v55  ;;  %v3504_v33 = vmax.f32 %v3440_v39, 0.0 }
 0x58f   :  { %v3443_v45 = vadd.f32 %v7202_v7, %v3322_v44  ;;  %4298 = vmatpush1.bf16.msra.mxu0 %v5949_v37  ;;  %v3505_v47 = vmax.f32 %v3441_v41, 0.0  ;;  %v5954_v41 = vld [vmem:[%s7690_s2 + $0x6f4] ss:$8 sps:$4 sm:$0xff]  }
 0x590   :  { %v3506_v46 = vmax.f32 %v3442_v42, 0.0  ;;  %v5952_v42 = vld [vmem:[%s7690_s2 + $0x6f0] ss:$8 sps:$4 sm:$0xff]   ;;  %4299 = vmatprep.subr.bf16.mxu0 %v5954_v41 }
 0x591   :  { %v3507_v49 = vmax.f32 %v3443_v45, 0.0 }
 0x592   :  { %v3552_v50 = vpack.c.bf16 %v3506_v46, %v3504_v33 }
 0x593   :  { %v3553_v48 = vpack.c.bf16 %v3507_v49, %v3505_v47  ;;  %v3326_v51 = vpop.f32.mrb[36].mxu1  ;;  %4300 = vmatpush1.bf16.msra.mxu0 %v5952_v42 }
 0x594   :  { %v3444_v52 = vadd.f32 %v7199_v14, %v3326_v51  ;;  %v3328_v54 = vpop.f32.mrb[37].mxu1 }
 0x595   :  { %v3445_v59 = vadd.f32 %v7202_v7, %v3328_v54  ;;  %v3330_v62 = vpop.f32.mrb[38].mxu1  ;;  %3886 = vmatprep.mubr.bf16.mxu0 %v3553_v48 }
 0x596   :  { %v3446_v56 = vadd.f32 %v7199_v14, %v3330_v62  ;;  %v3332_v60 = vpop.f32.mrb[39].mxu1  ;;  %3887 = vmatmul.mubr.bf16.gmra.mrb[224].mxu0 %v3552_v50  ;;  %v3508_v29 = vmax.f32 %v3444_v52, 0.0 }
 0x597   :  { %v3447_v61 = vadd.f32 %v7202_v7, %v3332_v60  ;;  %v3509_v3 = vmax.f32 %v3445_v59, 0.0 }
 0x598   :  { %v3510_v2 = vmax.f32 %v3446_v56, 0.0 }
 0x599   :  { %v3511_v4 = vmax.f32 %v3447_v61, 0.0 }
 0x59a   :  { %v3554_v5 = vpack.c.bf16 %v3510_v2, %v3508_v29 }
 0x59b   :  { %v3555_v8 = vpack.c.bf16 %v3511_v4, %v3509_v3  ;;  %v3336_v9 = vpop.f32.mrb[40].mxu1 }
 0x59c   :  { %v3448_v38 = vadd.f32 %v7199_v14, %v3336_v9  ;;  %v3338_v30 = vpop.f32.mrb[41].mxu1 }
 0x59d   :  { %v3449_v28 = vadd.f32 %v7202_v7, %v3338_v30  ;;  %v3340_v10 = vpop.f32.mrb[42].mxu1  ;;  %3896 = vmatprep.mubr.bf16.mxu0 %v3555_v8 }
 0x59e   :  { %v3450_v11 = vadd.f32 %v7199_v14, %v3340_v10  ;;  %v3342_v63 = vpop.f32.mrb[43].mxu1  ;;  %3897 = vmatmul.mubr.bf16.gmra.mrb[228].mxu0 %v3554_v5  ;;  %v3512_v53 = vmax.f32 %v3448_v38, 0.0 }
 0x59f   :  { %v3451_v12 = vadd.f32 %v7202_v7, %v3342_v63  ;;  %v3513_v6 = vmax.f32 %v3449_v28, 0.0 }
 0x5a0   :  { %v3514_v13 = vmax.f32 %v3450_v11, 0.0 }
 0x5a1   :  { %v3515_v15 = vmax.f32 %v3451_v12, 0.0 }
 0x5a2   :  { %v3556_v16 = vpack.c.bf16 %v3514_v13, %v3512_v53 }
 0x5a3   :  { %v3557_v17 = vpack.c.bf16 %v3515_v15, %v3513_v6  ;;  %v3346_v0 = vpop.f32.mrb[44].mxu1 }
 0x5a4   :  { %v3452_v19 = vadd.f32 %v7199_v14, %v3346_v0  ;;  %v3348_v20 = vpop.f32.mrb[45].mxu1 }
 0x5a5   :  { %v3453_v21 = vadd.f32 %v7202_v7, %v3348_v20  ;;  %v3350_v18 = vpop.f32.mrb[46].mxu1  ;;  %3906 = vmatprep.mubr.bf16.mxu0 %v3557_v17 }
 0x5a6   :  { %v3454_v1 = vadd.f32 %v7199_v14, %v3350_v18  ;;  %v3352_v57 = vpop.f32.mrb[47].mxu1  ;;  %3907 = vmatmul.mubr.bf16.gmra.mrb[232].mxu0 %v3556_v16  ;;  %v3516_v24 = vmax.f32 %v3452_v19, 0.0 }
 0x5a7   :  { %v3455_v22 = vadd.f32 %v7202_v7, %v3352_v57  ;;  %v3517_v58 = vmax.f32 %v3453_v21, 0.0 }
 0x5a8   :  { %v3518_v23 = vmax.f32 %v3454_v1, 0.0 }
 0x5a9   :  { %v3519_v43 = vmax.f32 %v3455_v22, 0.0 }
 0x5aa   :  { %v3558_v31 = vpack.c.bf16 %v3518_v23, %v3516_v24 }
 0x5ab   :  { %v3559_v32 = vpack.c.bf16 %v3519_v43, %v3517_v58  ;;  %v3356_v34 = vpop.f32.mrb[48].mxu1 }
 0x5ac   :  { %v3456_v55 = vadd.f32 %v7199_v14, %v3356_v34  ;;  %v3358_v35 = vpop.f32.mrb[49].mxu1  ;;  %v5958_v34 = vld [vmem:[%s7692_s4 + $0x8] sm:$0xff]  }
 0x5ad   :  { %v3457_v36 = vadd.f32 %v7202_v7, %v3358_v35  ;;  %v3360_v37 = vpop.f32.mrb[50].mxu1  ;;  %3916 = vmatprep.mubr.bf16.mxu0 %v3559_v32  ;;  %v5957_v32 = vld [vmem:[%s7692_s4 + $0x48] sm:$0xff]  }
 0x5ae   :  { %v3458_v39 = vadd.f32 %v7199_v14, %v3360_v37  ;;  %v3362_v40 = vpop.f32.mrb[51].mxu1  ;;  %3917 = vmatmul.mubr.bf16.gmra.mrb[236].mxu0 %v3558_v31  ;;  %v3520_v44 = vmax.f32 %v3456_v55, 0.0  ;;  %v5955_v31 = vld [vmem:[%s7692_s4 + $0x40] sm:$0xff]  }
 0x5af   :  { %v3459_v27 = vadd.f32 %v7202_v7, %v3362_v40  ;;  %v3521_v33 = vmax.f32 %v3457_v36, 0.0  ;;  %5378 = vmatprep.subr.bf16.mxu1 %v5955_v31 }
 0x5b0   :  { %v3522_v45 = vmax.f32 %v3458_v39, 0.0 }
 0x5b1   :  { %v3523_v46 = vmax.f32 %v3459_v27, 0.0 }
 0x5b2   :  { %v3560_v47 = vpack.c.bf16 %v3522_v45, %v3520_v44  ;;  %v5959_v44 = vld [vmem:[%s7692_s4 + $0x50] sm:$0xff]  }
 0x5b3   :  { %v3561_v49 = vpack.c.bf16 %v3523_v46, %v3521_v33  ;;  %v3366_v50 = vpop.f32.mrb[52].mxu1  ;;  %v5960_v45 = vld [vmem:[%s7692_s4 + $0x10] sm:$0xff]   ;;  %v5961_v33 = vld [vmem:[%s7692_s4 + $0x58] sm:$0xff]  }
 0x5b4   :  { %v3460_v48 = vadd.f32 %v7199_v14, %v3366_v50  ;;  %v3368_v51 = vpop.f32.mrb[53].mxu1 }
 0x5b5   :  { %v3461_v52 = vadd.f32 %v7202_v7, %v3368_v51  ;;  %v3370_v54 = vpop.f32.mrb[54].mxu1  ;;  %3926 = vmatprep.mubr.bf16.mxu0 %v3561_v49  ;;  %v5962_v51 = vld [vmem:[%s7692_s4 + $0x18] sm:$0xff]  }
 0x5b6   :  { %v3462_v59 = vadd.f32 %v7199_v14, %v3370_v54  ;;  %v3372_v62 = vpop.f32.mrb[55].mxu1  ;;  %3927 = vmatmul.mubr.bf16.gmra.mrb[240].mxu0 %v3560_v47  ;;  %v3524_v60 = vmax.f32 %v3460_v48, 0.0  ;;  %v5963_v54 = vld [vmem:[%s7692_s4 + $0x60] sm:$0xff]  }
 0x5b7   :  { %v3463_v56 = vadd.f32 %v7202_v7, %v3372_v62  ;;  %v3525_v29 = vmax.f32 %v3461_v52, 0.0 }
 0x5b8   :  { %v3526_v61 = vmax.f32 %v3462_v59, 0.0 }
 0x5b9   :  { %v3527_v2 = vmax.f32 %v3463_v56, 0.0 }
 0x5ba   :  { %v3562_v3 = vpack.c.bf16 %v3526_v61, %v3524_v60 }
 0x5bb   :  { %v3563_v4 = vpack.c.bf16 %v3527_v2, %v3525_v29  ;;  %v3376_v5 = vpop.f32.mrb[56].mxu1  ;;  %v5964_v2 = vld [vmem:[%s7692_s4 + $0x20] sm:$0xff]  }
 0x5bc   :  { %v3464_v8 = vadd.f32 %v7199_v14, %v3376_v5  ;;  %v3378_v9 = vpop.f32.mrb[57].mxu1  ;;  %v5965_v5 = vld [vmem:[%s7692_s4 + $0x68] sm:$0xff]  }
 0x5bd   :  { %v3465_v38 = vadd.f32 %v7202_v7, %v3378_v9  ;;  %v3380_v30 = vpop.f32.mrb[58].mxu1  ;;  %3936 = vmatprep.mubr.bf16.mxu0 %v3563_v4 }
 0x5be   :  { %v3466_v28 = vadd.f32 %v7199_v14, %v3380_v30  ;;  %v3382_v10 = vpop.f32.mrb[59].mxu1  ;;  %3937 = vmatmul.mubr.bf16.gmra.mrb[244].mxu0 %v3562_v3  ;;  %v3528_v63 = vmax.f32 %v3464_v8, 0.0 }
 0x5bf   :  { %v3467_v11 = vadd.f32 %v7202_v7, %v3382_v10  ;;  %v3529_v53 = vmax.f32 %v3465_v38, 0.0  ;;  %v5966_v10 = vld [vmem:[%s7692_s4 + $0x28] sm:$0xff]  }
 0x5c0   :  { %v3530_v12 = vmax.f32 %v3466_v28, 0.0 }
 0x5c1   :  { %v3531_v13 = vmax.f32 %v3467_v11, 0.0 }
 0x5c2   :  { %v3564_v6 = vpack.c.bf16 %v3530_v12, %v3528_v63  ;;  %v5967_v63 = vld [vmem:[%s7692_s4 + $0x70] sm:$0xff]  }
 0x5c3   :  { %v3565_v15 = vpack.c.bf16 %v3531_v13, %v3529_v53  ;;  %v3386_v16 = vpop.f32.mrb[60].mxu1 }
 0x5c4   :  { %v3468_v17 = vadd.f32 %v7199_v14, %v3386_v16  ;;  %v3388_v0 = vpop.f32.mrb[61].mxu1 }
 0x5c5   :  { %v3469_v19 = vadd.f32 %v7202_v7, %v3388_v0  ;;  %v3390_v20 = vpop.f32.mrb[62].mxu1  ;;  %3946 = vmatprep.mubr.bf16.mxu0 %v3565_v15 }
 0x5c6   :  { %v3470_v21 = vadd.f32 %v7199_v14, %v3390_v20  ;;  %v3392_v18 = vpop.f32.mrb[63].mxu1  ;;  %3947 = vmatmul.mubr.bf16.gmra.mrb[248].mxu0 %v3564_v6  ;;  %v3532_v57 = vmax.f32 %v3468_v17, 0.0  ;;  %v5956_v14 = vld [vmem:[%s7692_s4] sm:$0xff]   ;;  %v5968_v17 = vld [vmem:[%s7692_s4 + $0x30] sm:$0xff]   ;;  %v5969_v20 = vld [vmem:[%s7692_s4 + $0x78] sm:$0xff]  }
 0x5c7   :  { %v3471_v1 = vadd.f32 %v7202_v7, %v3392_v18  ;;  %v3533_v24 = vmax.f32 %v3469_v19, 0.0  ;;  %5379 = vmatpush3.bf16.msra.mxu1 %v5956_v14  ;;  %v5263_v7 = vld [vmem:[%s7691_s3 + $0x6] ss:$8 sm:$0x3] }
 0x5c8   :  { %v3534_v22 = vmax.f32 %v3470_v21, 0.0  ;;  %v7377_v55 = vrot.slane %v5263_v7, %v6328_v25  ;;  %5380 = vmatprep.subr.bf16.mxu1 %v5957_v32  ;;  %v7380_v35 = vrot.slane %v5263_v7, %v6334_v26 }
 0x5c9   :  { %v3535_v23 = vmax.f32 %v3471_v1, 0.0 }
 0x5ca   :  { %v3566_v58 = vpack.c.bf16 %v3534_v22, %v3532_v57 }
 0x5cb   :  { %v3567_v43 = vpack.c.bf16 %v3535_v23, %v3533_v24  ;;  %5381 = vmatpush3.bf16.msra.mxu1 %v5958_v34  ;;  %v5970_v24 = vld [vmem:[%s7692_s4 + $0x38] sm:$0xff]  }
 0x5cc   :  { %5382 = vmatprep.subr.bf16.mxu1 %v5959_v44 }
 0x5cd   :  { %3956 = vmatprep.mubr.bf16.mxu0 %v3567_v43 }
 0x5ce   :  { %3957 = vmatmul.mubr.bf16.gmra.mrb[252].mxu0 %v3566_v58 }
 0x5cf   :  { %5383 = vmatpush3.bf16.msra.mxu1 %v5960_v45 }
 0x5d0   :  { %5384 = vmatprep.subr.bf16.mxu1 %v5961_v33 }
 0x5d3   :  { %5385 = vmatpush3.bf16.msra.mxu1 %v5962_v51 }
 0x5d4   :  { %5386 = vmatprep.subr.bf16.mxu1 %v5963_v54 }
 0x5d7   :  { %5387 = vmatpush3.bf16.msra.mxu1 %v5964_v2 }
 0x5d8   :  { %5388 = vmatprep.subr.bf16.mxu1 %v5965_v5 }
 0x5db   :  { %5389 = vmatpush3.bf16.msra.mxu1 %v5966_v10 }
 0x5dc   :  { %5390 = vmatprep.subr.bf16.mxu1 %v5967_v63 }
 0x5df   :  { %5391 = vmatpush3.bf16.msra.mxu1 %v5968_v17 }
 0x5e0   :  { %5392 = vmatprep.subr.bf16.mxu1 %v5969_v20 }
 0x5e3   :  { %5393 = vmatpush3.bf16.msra.mxu1 %v5970_v24 }
 0x629   :  { %v3808_v36 = vpop.f32.mrb[192].mxu0 }
 0x62a   :  { %v3809_v37 = vadd.f32 %v3808_v36, %v7377_v55  ;;  %v3810_v39 = vpop.f32.mrb[193].mxu0 }
 0x62b   :  { %v3811_v40 = vadd.f32 %v3810_v39, %v7380_v35  ;;  %v3812_v41 = vpop.f32.mrb[194].mxu0 }
 0x62c   :  { %v3813_v27 = vadd.f32 %v3812_v41, %v7377_v55  ;;  %v3814_v42 = vpop.f32.mrb[195].mxu0  ;;  %v3967_v47 = vmax.f32 %v3809_v37, 0.0 }
 0x62d   :  { %v3815_v46 = vadd.f32 %v3814_v42, %v7380_v35  ;;  %v3968_v50 = vmax.f32 %v3811_v40, 0.0 }
 0x62e   :  { %v3969_v49 = vmax.f32 %v3813_v27, 0.0 }
 0x62f   :  { %v3970_v48 = vmax.f32 %v3815_v46, 0.0 }
 0x630   :  { %v4031_v52 = vpack.c.bf16 %v3969_v49, %v3967_v47 }
 0x631   :  { %v4032_v59 = vpack.c.bf16 %v3970_v48, %v3968_v50  ;;  %v3818_v62 = vpop.f32.mrb[196].mxu0 }
 0x632   :  { %v3819_v56 = vadd.f32 %v3818_v62, %v7377_v55  ;;  %v3820_v60 = vpop.f32.mrb[197].mxu0 }
 0x633   :  { %v3821_v61 = vadd.f32 %v3820_v60, %v7380_v35  ;;  %v3822_v29 = vpop.f32.mrb[198].mxu0  ;;  %4301 = vmatprep.mubr.bf16.mxu0 %v4032_v59 }
 0x634   :  { %v3823_v3 = vadd.f32 %v3822_v29, %v7377_v55  ;;  %v3824_v4 = vpop.f32.mrb[199].mxu0  ;;  %4302 = vmatmul.mubr.bf16.vlgmr.msra.gmra.mrb[0].mxu0 %v4031_v52  ;;  %v3971_v9 = vmax.f32 %v3819_v56, 0.0 }
 0x635   :  { %v3825_v8 = vadd.f32 %v3824_v4, %v7380_v35  ;;  %v3972_v30 = vmax.f32 %v3821_v61, 0.0 }
 0x636   :  { %v3973_v38 = vmax.f32 %v3823_v3, 0.0 }
 0x637   :  { %v3974_v28 = vmax.f32 %v3825_v8, 0.0 }
 0x638   :  { %v4033_v11 = vpack.c.bf16 %v3973_v38, %v3971_v9 }
 0x639   :  { %v4034_v12 = vpack.c.bf16 %v3974_v28, %v3972_v30  ;;  %v3828_v53 = vpop.f32.mrb[200].mxu0 }
 0x63a   :  { %v3829_v13 = vadd.f32 %v3828_v53, %v7377_v55  ;;  %v3830_v6 = vpop.f32.mrb[201].mxu0 }
 0x63b   :  { %v3831_v15 = vadd.f32 %v3830_v6, %v7380_v35  ;;  %v3832_v16 = vpop.f32.mrb[202].mxu0  ;;  %4311 = vmatprep.mubr.bf16.mxu0 %v4034_v12 }
 0x63c   :  { %v3833_v0 = vadd.f32 %v3832_v16, %v7377_v55  ;;  %v3834_v19 = vpop.f32.mrb[203].mxu0  ;;  %4312 = vmatmul.mubr.bf16.gmra.mrb[4].mxu0 %v4033_v11  ;;  %v3975_v18 = vmax.f32 %v3829_v13, 0.0 }
 0x63d   :  { %v3835_v21 = vadd.f32 %v3834_v19, %v7380_v35  ;;  %v3976_v57 = vmax.f32 %v3831_v15, 0.0 }
 0x63e   :  { %v3977_v1 = vmax.f32 %v3833_v0, 0.0 }
 0x63f   :  { %v3978_v22 = vmax.f32 %v3835_v21, 0.0 }
 0x640   :  { %v4035_v23 = vpack.c.bf16 %v3977_v1, %v3975_v18 }
 0x641   :  { %v4036_v58 = vpack.c.bf16 %v3978_v22, %v3976_v57  ;;  %v3838_v43 = vpop.f32.mrb[204].mxu0 }
 0x642   :  { %v3839_v31 = vadd.f32 %v3838_v43, %v7377_v55  ;;  %v3840_v14 = vpop.f32.mrb[205].mxu0 }
 0x643   :  { %v3841_v7 = vadd.f32 %v3840_v14, %v7380_v35  ;;  %v3842_v32 = vpop.f32.mrb[206].mxu0  ;;  %4321 = vmatprep.mubr.bf16.mxu0 %v4036_v58 }
 0x644   :  { %v3843_v34 = vadd.f32 %v3842_v32, %v7377_v55  ;;  %v3844_v36 = vpop.f32.mrb[207].mxu0  ;;  %4322 = vmatmul.mubr.bf16.gmra.mrb[8].mxu0 %v4035_v23  ;;  %v3979_v39 = vmax.f32 %v3839_v31, 0.0 }
 0x645   :  { %v3845_v37 = vadd.f32 %v3844_v36, %v7380_v35  ;;  %v3980_v41 = vmax.f32 %v3841_v7, 0.0 }
 0x646   :  { %v3981_v40 = vmax.f32 %v3843_v34, 0.0 }
 0x647   :  { %v3982_v27 = vmax.f32 %v3845_v37, 0.0 }
 0x648   :  { %v4037_v42 = vpack.c.bf16 %v3981_v40, %v3979_v39 }
 0x649   :  { %v4038_v44 = vpack.c.bf16 %v3982_v27, %v3980_v41  ;;  %v3848_v45 = vpop.f32.mrb[208].mxu0 }
 0x64a   :  { %v3849_v33 = vadd.f32 %v3848_v45, %v7377_v55  ;;  %v3850_v46 = vpop.f32.mrb[209].mxu0 }
 0x64b   :  { %v3851_v47 = vadd.f32 %v3850_v46, %v7380_v35  ;;  %v3852_v49 = vpop.f32.mrb[210].mxu0  ;;  %4331 = vmatprep.mubr.bf16.mxu0 %v4038_v44 }
 0x64c   :  { %v3853_v50 = vadd.f32 %v3852_v49, %v7377_v55  ;;  %v3854_v48 = vpop.f32.mrb[211].mxu0  ;;  %4332 = vmatmul.mubr.bf16.gmra.mrb[12].mxu0 %v4037_v42  ;;  %v3983_v52 = vmax.f32 %v3849_v33, 0.0 }
 0x64d   :  { %v3855_v51 = vadd.f32 %v3854_v48, %v7380_v35  ;;  %v3984_v59 = vmax.f32 %v3851_v47, 0.0 }
 0x64e   :  { %v3985_v54 = vmax.f32 %v3853_v50, 0.0 }
 0x64f   :  { %v3986_v62 = vmax.f32 %v3855_v51, 0.0 }
 0x650   :  { %v4039_v56 = vpack.c.bf16 %v3985_v54, %v3983_v52 }
 0x651   :  { %v4040_v60 = vpack.c.bf16 %v3986_v62, %v3984_v59  ;;  %v3858_v61 = vpop.f32.mrb[212].mxu0 }
 0x652   :  { %v3859_v29 = vadd.f32 %v3858_v61, %v7377_v55  ;;  %v3860_v2 = vpop.f32.mrb[213].mxu0 }
 0x653   :  { %v3861_v3 = vadd.f32 %v3860_v2, %v7380_v35  ;;  %v3862_v4 = vpop.f32.mrb[214].mxu0  ;;  %4341 = vmatprep.mubr.bf16.mxu0 %v4040_v60 }
 0x654   :  { %v3863_v5 = vadd.f32 %v3862_v4, %v7377_v55  ;;  %v3864_v8 = vpop.f32.mrb[215].mxu0  ;;  %4342 = vmatmul.mubr.bf16.gmra.mrb[16].mxu0 %v4039_v56  ;;  %v3987_v38 = vmax.f32 %v3859_v29, 0.0 }
 0x655   :  { %v3865_v9 = vadd.f32 %v3864_v8, %v7380_v35  ;;  %v3988_v28 = vmax.f32 %v3861_v3, 0.0 }
 0x656   :  { %v3989_v30 = vmax.f32 %v3863_v5, 0.0 }
 0x657   :  { %v3990_v10 = vmax.f32 %v3865_v9, 0.0 }
 0x658   :  { %v4041_v11 = vpack.c.bf16 %v3989_v30, %v3987_v38 }
 0x659   :  { %v4042_v63 = vpack.c.bf16 %v3990_v10, %v3988_v28  ;;  %v3868_v12 = vpop.f32.mrb[216].mxu0 }
 0x65a   :  { %v3869_v53 = vadd.f32 %v3868_v12, %v7377_v55  ;;  %v3870_v13 = vpop.f32.mrb[217].mxu0 }
 0x65b   :  { %v3871_v6 = vadd.f32 %v3870_v13, %v7380_v35  ;;  %v3872_v15 = vpop.f32.mrb[218].mxu0  ;;  %4351 = vmatprep.mubr.bf16.mxu0 %v4042_v63 }
 0x65c   :  { %v3873_v16 = vadd.f32 %v3872_v15, %v7377_v55  ;;  %v3874_v17 = vpop.f32.mrb[219].mxu0  ;;  %4352 = vmatmul.mubr.bf16.gmra.mrb[20].mxu0 %v4041_v11  ;;  %v3991_v19 = vmax.f32 %v3869_v53, 0.0 }
 0x65d   :  { %v3875_v0 = vadd.f32 %v3874_v17, %v7380_v35  ;;  %v3992_v21 = vmax.f32 %v3871_v6, 0.0 }
 0x65e   :  { %v3993_v20 = vmax.f32 %v3873_v16, 0.0 }
 0x65f   :  { %v3994_v18 = vmax.f32 %v3875_v0, 0.0 }
 0x660   :  { %v4043_v1 = vpack.c.bf16 %v3993_v20, %v3991_v19 }
 0x661   :  { %v4044_v57 = vpack.c.bf16 %v3994_v18, %v3992_v21  ;;  %v3878_v22 = vpop.f32.mrb[220].mxu0 }
 0x662   :  { %v3879_v24 = vadd.f32 %v3878_v22, %v7377_v55  ;;  %v3880_v23 = vpop.f32.mrb[221].mxu0 }
 0x663   :  { %v3881_v58 = vadd.f32 %v3880_v23, %v7380_v35  ;;  %v3882_v43 = vpop.f32.mrb[222].mxu0  ;;  %4361 = vmatprep.mubr.bf16.mxu0 %v4044_v57 }
 0x664   :  { %v3883_v31 = vadd.f32 %v3882_v43, %v7377_v55  ;;  %v3884_v14 = vpop.f32.mrb[223].mxu0  ;;  %4362 = vmatmul.mubr.bf16.gmra.mrb[24].mxu0 %v4043_v1  ;;  %v3995_v32 = vmax.f32 %v3879_v24, 0.0 }
 0x665   :  { %v3885_v7 = vadd.f32 %v3884_v14, %v7380_v35  ;;  %v3996_v36 = vmax.f32 %v3881_v58, 0.0 }
 0x666   :  { %v3997_v34 = vmax.f32 %v3883_v31, 0.0 }
 0x667   :  { %v3998_v37 = vmax.f32 %v3885_v7, 0.0 }
 0x668   :  { %v4045_v39 = vpack.c.bf16 %v3997_v34, %v3995_v32 }
 0x669   :  { %v4046_v40 = vpack.c.bf16 %v3998_v37, %v3996_v36  ;;  %v3888_v41 = vpop.f32.mrb[224].mxu0 }
 0x66a   :  { %v3889_v27 = vadd.f32 %v3888_v41, %v7377_v55  ;;  %v3890_v42 = vpop.f32.mrb[225].mxu0 }
 0x66b   :  { %v3891_v44 = vadd.f32 %v3890_v42, %v7380_v35  ;;  %v3892_v45 = vpop.f32.mrb[226].mxu0  ;;  %4371 = vmatprep.mubr.bf16.mxu0 %v4046_v40 }
 0x66c   :  { %v3893_v33 = vadd.f32 %v3892_v45, %v7377_v55  ;;  %v3894_v46 = vpop.f32.mrb[227].mxu0  ;;  %4372 = vmatmul.mubr.bf16.gmra.mrb[28].mxu0 %v4045_v39  ;;  %v3999_v49 = vmax.f32 %v3889_v27, 0.0 }
 0x66d   :  { %v3895_v47 = vadd.f32 %v3894_v46, %v7380_v35  ;;  %v4000_v48 = vmax.f32 %v3891_v44, 0.0 }
 0x66e   :  { %v4001_v50 = vmax.f32 %v3893_v33, 0.0 }
 0x66f   :  { %v4002_v51 = vmax.f32 %v3895_v47, 0.0 }
 0x670   :  { %v4047_v52 = vpack.c.bf16 %v4001_v50, %v3999_v49 }
 0x671   :  { %v4048_v54 = vpack.c.bf16 %v4002_v51, %v4000_v48  ;;  %v3898_v59 = vpop.f32.mrb[228].mxu0 }
 0x672   :  { %v3899_v62 = vadd.f32 %v3898_v59, %v7377_v55  ;;  %v3900_v56 = vpop.f32.mrb[229].mxu0 }
 0x673   :  { %v3901_v60 = vadd.f32 %v3900_v56, %v7380_v35  ;;  %v3902_v61 = vpop.f32.mrb[230].mxu0  ;;  %4381 = vmatprep.mubr.bf16.mxu0 %v4048_v54 }
 0x674   :  { %v3903_v29 = vadd.f32 %v3902_v61, %v7377_v55  ;;  %v3904_v2 = vpop.f32.mrb[231].mxu0  ;;  %4382 = vmatmul.mubr.bf16.gmra.mrb[32].mxu0 %v4047_v52  ;;  %v4003_v4 = vmax.f32 %v3899_v62, 0.0 }
 0x675   :  { %v3905_v3 = vadd.f32 %v3904_v2, %v7380_v35  ;;  %v4004_v8 = vmax.f32 %v3901_v60, 0.0 }
 0x676   :  { %v4005_v5 = vmax.f32 %v3903_v29, 0.0 }
 0x677   :  { %v4006_v9 = vmax.f32 %v3905_v3, 0.0 }
 0x678   :  { %v4049_v38 = vpack.c.bf16 %v4005_v5, %v4003_v4 }
 0x679   :  { %v4050_v30 = vpack.c.bf16 %v4006_v9, %v4004_v8  ;;  %v3908_v28 = vpop.f32.mrb[232].mxu0 }
 0x67a   :  { %v3909_v10 = vadd.f32 %v3908_v28, %v7377_v55  ;;  %v3910_v11 = vpop.f32.mrb[233].mxu0 }
 0x67b   :  { %v3911_v63 = vadd.f32 %v3910_v11, %v7380_v35  ;;  %v3912_v12 = vpop.f32.mrb[234].mxu0  ;;  %4391 = vmatprep.mubr.bf16.mxu0 %v4050_v30 }
 0x67c   :  { %v3913_v53 = vadd.f32 %v3912_v12, %v7377_v55  ;;  %v3914_v13 = vpop.f32.mrb[235].mxu0  ;;  %4392 = vmatmul.mubr.bf16.gmra.mrb[36].mxu0 %v4049_v38  ;;  %v4007_v15 = vmax.f32 %v3909_v10, 0.0 }
 0x67d   :  { %v3915_v6 = vadd.f32 %v3914_v13, %v7380_v35  ;;  %v4008_v17 = vmax.f32 %v3911_v63, 0.0 }
 0x67e   :  { %v4009_v16 = vmax.f32 %v3913_v53, 0.0 }
 0x67f   :  { %v4010_v0 = vmax.f32 %v3915_v6, 0.0 }
 0x680   :  { %v4051_v19 = vpack.c.bf16 %v4009_v16, %v4007_v15 }
 0x681   :  { %v4052_v20 = vpack.c.bf16 %v4010_v0, %v4008_v17  ;;  %v3918_v21 = vpop.f32.mrb[236].mxu0 }
 0x682   :  { %v3919_v18 = vadd.f32 %v3918_v21, %v7377_v55  ;;  %v3920_v1 = vpop.f32.mrb[237].mxu0 }
 0x683   :  { %v3921_v57 = vadd.f32 %v3920_v1, %v7380_v35  ;;  %v3922_v22 = vpop.f32.mrb[238].mxu0  ;;  %4401 = vmatprep.mubr.bf16.mxu0 %v4052_v20 }
 0x684   :  { %v3923_v24 = vadd.f32 %v3922_v22, %v7377_v55  ;;  %v3924_v23 = vpop.f32.mrb[239].mxu0  ;;  %4402 = vmatmul.mubr.bf16.gmra.mrb[40].mxu0 %v4051_v19  ;;  %v4011_v43 = vmax.f32 %v3919_v18, 0.0 }
 0x685   :  { %v3925_v58 = vadd.f32 %v3924_v23, %v7380_v35  ;;  %v4012_v14 = vmax.f32 %v3921_v57, 0.0 }
 0x686   :  { %v4013_v31 = vmax.f32 %v3923_v24, 0.0 }
 0x687   :  { %v4014_v7 = vmax.f32 %v3925_v58, 0.0 }
 0x688   :  { %v4053_v32 = vpack.c.bf16 %v4013_v31, %v4011_v43 }
 0x689   :  { %v4054_v34 = vpack.c.bf16 %v4014_v7, %v4012_v14  ;;  %v3928_v36 = vpop.f32.mrb[240].mxu0  ;;  %v5328_v14 = vld [vmem:[%s7691_s3 + $0x7] ss:$8 sm:$0x3] }
 0x68a   :  { %v3929_v37 = vadd.f32 %v3928_v36, %v7377_v55  ;;  %v3930_v39 = vpop.f32.mrb[241].mxu0  ;;  %v7486_v7 = vrot.slane %v5328_v14, %v6328_v25 }
 0x68b   :  { %v3931_v40 = vadd.f32 %v3930_v39, %v7380_v35  ;;  %v3932_v41 = vpop.f32.mrb[242].mxu0  ;;  %4411 = vmatprep.mubr.bf16.mxu0 %v4054_v34 }
 0x68c   :  { %v3933_v27 = vadd.f32 %v3932_v41, %v7377_v55  ;;  %v3934_v42 = vpop.f32.mrb[243].mxu0  ;;  %4412 = vmatmul.mubr.bf16.gmra.mrb[44].mxu0 %v4053_v32  ;;  %v4015_v45 = vmax.f32 %v3929_v37, 0.0 }
 0x68d   :  { %v3935_v44 = vadd.f32 %v3934_v42, %v7380_v35  ;;  %v4016_v46 = vmax.f32 %v3931_v40, 0.0 }
 0x68e   :  { %v4017_v33 = vmax.f32 %v3933_v27, 0.0 }
 0x68f   :  { %v4018_v47 = vmax.f32 %v3935_v44, 0.0 }
 0x690   :  { %v4055_v49 = vpack.c.bf16 %v4017_v33, %v4015_v45 }
 0x691   :  { %v4056_v50 = vpack.c.bf16 %v4018_v47, %v4016_v46  ;;  %v3938_v48 = vpop.f32.mrb[244].mxu0 }
 0x692   :  { %v3939_v51 = vadd.f32 %v3938_v48, %v7377_v55  ;;  %v3940_v52 = vpop.f32.mrb[245].mxu0 }
 0x693   :  { %v3941_v54 = vadd.f32 %v3940_v52, %v7380_v35  ;;  %v3942_v59 = vpop.f32.mrb[246].mxu0  ;;  %4421 = vmatprep.mubr.bf16.mxu0 %v4056_v50 }
 0x694   :  { %v3943_v62 = vadd.f32 %v3942_v59, %v7377_v55  ;;  %v3944_v56 = vpop.f32.mrb[247].mxu0  ;;  %4422 = vmatmul.mubr.bf16.gmra.mrb[48].mxu0 %v4055_v49  ;;  %v4019_v61 = vmax.f32 %v3939_v51, 0.0 }
 0x695   :  { %v3945_v60 = vadd.f32 %v3944_v56, %v7380_v35  ;;  %v4020_v2 = vmax.f32 %v3941_v54, 0.0 }
 0x696   :  { %v4021_v29 = vmax.f32 %v3943_v62, 0.0 }
 0x697   :  { %v4022_v3 = vmax.f32 %v3945_v60, 0.0 }
 0x698   :  { %v4057_v4 = vpack.c.bf16 %v4021_v29, %v4019_v61 }
 0x699   :  { %v4058_v5 = vpack.c.bf16 %v4022_v3, %v4020_v2  ;;  %v3948_v8 = vpop.f32.mrb[248].mxu0 }
 0x69a   :  { %v3949_v9 = vadd.f32 %v3948_v8, %v7377_v55  ;;  %v3950_v38 = vpop.f32.mrb[249].mxu0 }
 0x69b   :  { %v3951_v30 = vadd.f32 %v3950_v38, %v7380_v35  ;;  %v3952_v28 = vpop.f32.mrb[250].mxu0  ;;  %4431 = vmatprep.mubr.bf16.mxu0 %v4058_v5 }
 0x69c   :  { %v3953_v10 = vadd.f32 %v3952_v28, %v7377_v55  ;;  %v3954_v11 = vpop.f32.mrb[251].mxu0  ;;  %4432 = vmatmul.mubr.bf16.gmra.mrb[52].mxu0 %v4057_v4  ;;  %v4023_v12 = vmax.f32 %v3949_v9, 0.0 }
 0x69d   :  { %v3955_v63 = vadd.f32 %v3954_v11, %v7380_v35  ;;  %v4024_v13 = vmax.f32 %v3951_v30, 0.0 }
 0x69e   :  { %v4025_v53 = vmax.f32 %v3953_v10, 0.0 }
 0x69f   :  { %v4026_v6 = vmax.f32 %v3955_v63, 0.0 }
 0x6a0   :  { %v4059_v15 = vpack.c.bf16 %v4025_v53, %v4023_v12 }
 0x6a1   :  { %v4060_v16 = vpack.c.bf16 %v4026_v6, %v4024_v13  ;;  %v3958_v17 = vpop.f32.mrb[252].mxu0 }
 0x6a2   :  { %v3959_v0 = vadd.f32 %v3958_v17, %v7377_v55  ;;  %v3960_v19 = vpop.f32.mrb[253].mxu0 }
 0x6a3   :  { %v3961_v20 = vadd.f32 %v3960_v19, %v7380_v35  ;;  %v3962_v21 = vpop.f32.mrb[254].mxu0  ;;  %4441 = vmatprep.mubr.bf16.mxu0 %v4060_v16 }
 0x6a4   :  { %v3963_v18 = vadd.f32 %v3962_v21, %v7377_v55  ;;  %v3964_v1 = vpop.f32.mrb[255].mxu0  ;;  %4442 = vmatmul.mubr.bf16.gmra.mrb[56].mxu0 %v4059_v15  ;;  %v4027_v22 = vmax.f32 %v3959_v0, 0.0  ;;  %v7489_v55 = vrot.slane %v5328_v14, %v6334_v26 }
 0x6a5   :  { %v3965_v57 = vadd.f32 %v3964_v1, %v7380_v35  ;;  %v4028_v23 = vmax.f32 %v3961_v20, 0.0 }
 0x6a6   :  { %v4029_v24 = vmax.f32 %v3963_v18, 0.0 }
 0x6a7   :  { %v4030_v58 = vmax.f32 %v3965_v57, 0.0 }
 0x6a8   :  { %v4061_v43 = vpack.c.bf16 %v4029_v24, %v4027_v22 }
 0x6a9   :  { %v4062_v31 = vpack.c.bf16 %v4030_v58, %v4028_v23 }
 0x6ab   :  { %4451 = vmatprep.mubr.bf16.mxu0 %v4062_v31 }
 0x6ac   :  { %4452 = vmatmul.mubr.bf16.gmra.mrb[60].mxu0 %v4061_v43 }
 0x707   :  { %v4303_v32 = vpop.f32.mrb[0].mxu0 }
 0x708   :  { %v4304_v35 = vadd.f32 %v4303_v32, %v7486_v7  ;;  %v4305_v34 = vpop.f32.mrb[1].mxu0 }
 0x709   :  { %v4306_v36 = vadd.f32 %v4305_v34, %v7489_v55  ;;  %v4307_v37 = vpop.f32.mrb[2].mxu0 }
 0x70a   :  { %v4308_v39 = vadd.f32 %v4307_v37, %v7486_v7  ;;  %v4309_v40 = vpop.f32.mrb[3].mxu0  ;;  %v4462_v27 = vmax.f32 %v4304_v35, 0.0 }
 0x70b   :  { %v4310_v41 = vadd.f32 %v4309_v40, %v7489_v55  ;;  %v4463_v44 = vmax.f32 %v4306_v36, 0.0 }
 0x70c   :  { %v4464_v42 = vmax.f32 %v4308_v39, 0.0 }
 0x70d   :  { %v4465_v25 = vmax.f32 %v4310_v41, 0.0 }
 0x70e   :  { %v4526_v45 = vpack.c.bf16 %v4464_v42, %v4462_v27 }
 0x70f   :  { %v4527_v33 = vpack.c.bf16 %v4465_v25, %v4463_v44  ;;  %v4313_v26 = vpop.f32.mrb[4].mxu0 }
 0x710   :  { %v4314_v46 = vadd.f32 %v4313_v26, %v7486_v7  ;;  %v4315_v47 = vpop.f32.mrb[5].mxu0 }
 0x711   :  { %v4316_v49 = vadd.f32 %v4315_v47, %v7489_v55  ;;  %v4317_v50 = vpop.f32.mrb[6].mxu0  ;;  %4725 = vmatprep.mubr.bf16.mxu1 %v4527_v33 }
 0x712   :  { %v4318_v48 = vadd.f32 %v4317_v50, %v7486_v7  ;;  %v4319_v51 = vpop.f32.mrb[7].mxu0  ;;  %4726 = vmatmul.mubr.bf16.vlgmr.msra.gmra.mrb[192].mxu1 %v4526_v45  ;;  %v4466_v54 = vmax.f32 %v4314_v46, 0.0 }
 0x713   :  { %v4320_v52 = vadd.f32 %v4319_v51, %v7489_v55  ;;  %v4467_v62 = vmax.f32 %v4316_v49, 0.0 }
 0x714   :  { %v4468_v59 = vmax.f32 %v4318_v48, 0.0 }
 0x715   :  { %v4469_v56 = vmax.f32 %v4320_v52, 0.0 }
 0x716   :  { %v4528_v60 = vpack.c.bf16 %v4468_v59, %v4466_v54 }
 0x717   :  { %v4529_v61 = vpack.c.bf16 %v4469_v56, %v4467_v62  ;;  %v4323_v29 = vpop.f32.mrb[8].mxu0 }
 0x718   :  { %v4324_v2 = vadd.f32 %v4323_v29, %v7486_v7  ;;  %v4325_v3 = vpop.f32.mrb[9].mxu0 }
 0x719   :  { %v4326_v4 = vadd.f32 %v4325_v3, %v7489_v55  ;;  %v4327_v5 = vpop.f32.mrb[10].mxu0  ;;  %4733 = vmatprep.mubr.bf16.mxu1 %v4529_v61 }
 0x71a   :  { %v4328_v8 = vadd.f32 %v4327_v5, %v7486_v7  ;;  %v4329_v9 = vpop.f32.mrb[11].mxu0  ;;  %4734 = vmatmul.mubr.bf16.gmra.mrb[196].mxu1 %v4528_v60  ;;  %v4470_v30 = vmax.f32 %v4324_v2, 0.0 }
 0x71b   :  { %v4330_v38 = vadd.f32 %v4329_v9, %v7489_v55  ;;  %v4471_v10 = vmax.f32 %v4326_v4, 0.0 }
 0x71c   :  { %v4472_v28 = vmax.f32 %v4328_v8, 0.0 }
 0x71d   :  { %v4473_v11 = vmax.f32 %v4330_v38, 0.0 }
 0x71e   :  { %v4530_v63 = vpack.c.bf16 %v4472_v28, %v4470_v30 }
 0x71f   :  { %v4531_v12 = vpack.c.bf16 %v4473_v11, %v4471_v10  ;;  %v4333_v53 = vpop.f32.mrb[12].mxu0 }
 0x720   :  { %v4334_v13 = vadd.f32 %v4333_v53, %v7486_v7  ;;  %v4335_v6 = vpop.f32.mrb[13].mxu0 }
 0x721   :  { %v4336_v15 = vadd.f32 %v4335_v6, %v7489_v55  ;;  %v4337_v16 = vpop.f32.mrb[14].mxu0  ;;  %4741 = vmatprep.mubr.bf16.mxu1 %v4531_v12 }
 0x722   :  { %v4338_v17 = vadd.f32 %v4337_v16, %v7486_v7  ;;  %v4339_v0 = vpop.f32.mrb[15].mxu0  ;;  %4742 = vmatmul.mubr.bf16.gmra.mrb[200].mxu1 %v4530_v63  ;;  %v4474_v20 = vmax.f32 %v4334_v13, 0.0 }
 0x723   :  { %v4340_v19 = vadd.f32 %v4339_v0, %v7489_v55  ;;  %v4475_v18 = vmax.f32 %v4336_v15, 0.0 }
 0x724   :  { %v4476_v21 = vmax.f32 %v4338_v17, 0.0 }
 0x725   :  { %v4477_v1 = vmax.f32 %v4340_v19, 0.0 }
 0x726   :  { %v4532_v57 = vpack.c.bf16 %v4476_v21, %v4474_v20 }
 0x727   :  { %v4533_v22 = vpack.c.bf16 %v4477_v1, %v4475_v18  ;;  %v4343_v24 = vpop.f32.mrb[16].mxu0 }
 0x728   :  { %v4344_v23 = vadd.f32 %v4343_v24, %v7486_v7  ;;  %v4345_v58 = vpop.f32.mrb[17].mxu0 }
 0x729   :  { %v4346_v43 = vadd.f32 %v4345_v58, %v7489_v55  ;;  %v4347_v31 = vpop.f32.mrb[18].mxu0  ;;  %4749 = vmatprep.mubr.bf16.mxu1 %v4533_v22 }
 0x72a   :  { %v4348_v14 = vadd.f32 %v4347_v31, %v7486_v7  ;;  %v4349_v32 = vpop.f32.mrb[19].mxu0  ;;  %4750 = vmatmul.mubr.bf16.gmra.mrb[204].mxu1 %v4532_v57  ;;  %v4478_v34 = vmax.f32 %v4344_v23, 0.0 }
 0x72b   :  { %v4350_v35 = vadd.f32 %v4349_v32, %v7489_v55  ;;  %v4479_v37 = vmax.f32 %v4346_v43, 0.0 }
 0x72c   :  { %v4480_v36 = vmax.f32 %v4348_v14, 0.0 }
 0x72d   :  { %v4481_v39 = vmax.f32 %v4350_v35, 0.0 }
 0x72e   :  { %v4534_v40 = vpack.c.bf16 %v4480_v36, %v4478_v34 }
 0x72f   :  { %v4535_v41 = vpack.c.bf16 %v4481_v39, %v4479_v37  ;;  %v4353_v27 = vpop.f32.mrb[20].mxu0 }
 0x730   :  { %v4354_v42 = vadd.f32 %v4353_v27, %v7486_v7  ;;  %v4355_v44 = vpop.f32.mrb[21].mxu0 }
 0x731   :  { %v4356_v25 = vadd.f32 %v4355_v44, %v7489_v55  ;;  %v4357_v45 = vpop.f32.mrb[22].mxu0  ;;  %4757 = vmatprep.mubr.bf16.mxu1 %v4535_v41 }
 0x732   :  { %v4358_v33 = vadd.f32 %v4357_v45, %v7486_v7  ;;  %v4359_v26 = vpop.f32.mrb[23].mxu0  ;;  %4758 = vmatmul.mubr.bf16.gmra.mrb[208].mxu1 %v4534_v40  ;;  %v4482_v47 = vmax.f32 %v4354_v42, 0.0 }
 0x733   :  { %v4360_v46 = vadd.f32 %v4359_v26, %v7489_v55  ;;  %v4483_v50 = vmax.f32 %v4356_v25, 0.0 }
 0x734   :  { %v4484_v49 = vmax.f32 %v4358_v33, 0.0 }
 0x735   :  { %v4485_v48 = vmax.f32 %v4360_v46, 0.0 }
 0x736   :  { %v4536_v51 = vpack.c.bf16 %v4484_v49, %v4482_v47 }
 0x737   :  { %v4537_v52 = vpack.c.bf16 %v4485_v48, %v4483_v50  ;;  %v4363_v54 = vpop.f32.mrb[24].mxu0 }
 0x738   :  { %v4364_v59 = vadd.f32 %v4363_v54, %v7486_v7  ;;  %v4365_v62 = vpop.f32.mrb[25].mxu0 }
 0x739   :  { %v4366_v56 = vadd.f32 %v4365_v62, %v7489_v55  ;;  %v4367_v60 = vpop.f32.mrb[26].mxu0  ;;  %4765 = vmatprep.mubr.bf16.mxu1 %v4537_v52 }
 0x73a   :  { %v4368_v61 = vadd.f32 %v4367_v60, %v7486_v7  ;;  %v4369_v29 = vpop.f32.mrb[27].mxu0  ;;  %4766 = vmatmul.mubr.bf16.gmra.mrb[212].mxu1 %v4536_v51  ;;  %v4486_v3 = vmax.f32 %v4364_v59, 0.0 }
 0x73b   :  { %v4370_v2 = vadd.f32 %v4369_v29, %v7489_v55  ;;  %v4487_v5 = vmax.f32 %v4366_v56, 0.0 }
 0x73c   :  { %v4488_v4 = vmax.f32 %v4368_v61, 0.0 }
 0x73d   :  { %v4489_v8 = vmax.f32 %v4370_v2, 0.0 }
 0x73e   :  { %v4538_v9 = vpack.c.bf16 %v4488_v4, %v4486_v3 }
 0x73f   :  { %v4539_v38 = vpack.c.bf16 %v4489_v8, %v4487_v5  ;;  %v4373_v30 = vpop.f32.mrb[28].mxu0 }
 0x740   :  { %v4374_v28 = vadd.f32 %v4373_v30, %v7486_v7  ;;  %v4375_v10 = vpop.f32.mrb[29].mxu0 }
 0x741   :  { %v4376_v11 = vadd.f32 %v4375_v10, %v7489_v55  ;;  %v4377_v63 = vpop.f32.mrb[30].mxu0  ;;  %4773 = vmatprep.mubr.bf16.mxu1 %v4539_v38 }
 0x742   :  { %v4378_v12 = vadd.f32 %v4377_v63, %v7486_v7  ;;  %v4379_v53 = vpop.f32.mrb[31].mxu0  ;;  %4774 = vmatmul.mubr.bf16.gmra.mrb[216].mxu1 %v4538_v9  ;;  %v4490_v6 = vmax.f32 %v4374_v28, 0.0 }
 0x743   :  { %v4380_v13 = vadd.f32 %v4379_v53, %v7489_v55  ;;  %v4491_v16 = vmax.f32 %v4376_v11, 0.0 }
 0x744   :  { %v4492_v15 = vmax.f32 %v4378_v12, 0.0 }
 0x745   :  { %v4493_v17 = vmax.f32 %v4380_v13, 0.0 }
 0x746   :  { %v4540_v0 = vpack.c.bf16 %v4492_v15, %v4490_v6 }
 0x747   :  { %v4541_v19 = vpack.c.bf16 %v4493_v17, %v4491_v16  ;;  %v4383_v20 = vpop.f32.mrb[32].mxu0 }
 0x748   :  { %v4384_v21 = vadd.f32 %v4383_v20, %v7486_v7  ;;  %v4385_v18 = vpop.f32.mrb[33].mxu0 }
 0x749   :  { %v4386_v1 = vadd.f32 %v4385_v18, %v7489_v55  ;;  %v4387_v57 = vpop.f32.mrb[34].mxu0  ;;  %4781 = vmatprep.mubr.bf16.mxu1 %v4541_v19 }
 0x74a   :  { %v4388_v22 = vadd.f32 %v4387_v57, %v7486_v7  ;;  %v4389_v24 = vpop.f32.mrb[35].mxu0  ;;  %4782 = vmatmul.mubr.bf16.gmra.mrb[220].mxu1 %v4540_v0  ;;  %v4494_v58 = vmax.f32 %v4384_v21, 0.0 }
 0x74b   :  { %v4390_v23 = vadd.f32 %v4389_v24, %v7489_v55  ;;  %v4495_v31 = vmax.f32 %v4386_v1, 0.0 }
 0x74c   :  { %v4496_v43 = vmax.f32 %v4388_v22, 0.0 }
 0x74d   :  { %v4497_v14 = vmax.f32 %v4390_v23, 0.0 }
 0x74e   :  { %v4542_v32 = vpack.c.bf16 %v4496_v43, %v4494_v58 }
 0x74f   :  { %v4543_v35 = vpack.c.bf16 %v4497_v14, %v4495_v31  ;;  %v4393_v34 = vpop.f32.mrb[36].mxu0 }
 0x750   :  { %v4394_v36 = vadd.f32 %v4393_v34, %v7486_v7  ;;  %v4395_v37 = vpop.f32.mrb[37].mxu0 }
 0x751   :  { %v4396_v39 = vadd.f32 %v4395_v37, %v7489_v55  ;;  %v4397_v40 = vpop.f32.mrb[38].mxu0  ;;  %4789 = vmatprep.mubr.bf16.mxu1 %v4543_v35 }
 0x752   :  { %v4398_v41 = vadd.f32 %v4397_v40, %v7486_v7  ;;  %v4399_v27 = vpop.f32.mrb[39].mxu0  ;;  %4790 = vmatmul.mubr.bf16.gmra.mrb[224].mxu1 %v4542_v32  ;;  %v4498_v44 = vmax.f32 %v4394_v36, 0.0 }
 0x753   :  { %v4400_v42 = vadd.f32 %v4399_v27, %v7489_v55  ;;  %v4499_v45 = vmax.f32 %v4396_v39, 0.0 }
 0x754   :  { %v4500_v25 = vmax.f32 %v4398_v41, 0.0 }
 0x755   :  { %v4501_v33 = vmax.f32 %v4400_v42, 0.0 }
 0x756   :  { %v4544_v26 = vpack.c.bf16 %v4500_v25, %v4498_v44 }
 0x757   :  { %v4545_v46 = vpack.c.bf16 %v4501_v33, %v4499_v45  ;;  %v4403_v47 = vpop.f32.mrb[40].mxu0 }
 0x758   :  { %v4404_v49 = vadd.f32 %v4403_v47, %v7486_v7  ;;  %v4405_v50 = vpop.f32.mrb[41].mxu0 }
 0x759   :  { %v4406_v48 = vadd.f32 %v4405_v50, %v7489_v55  ;;  %v4407_v51 = vpop.f32.mrb[42].mxu0  ;;  %4797 = vmatprep.mubr.bf16.mxu1 %v4545_v46 }
 0x75a   :  { %v4408_v52 = vadd.f32 %v4407_v51, %v7486_v7  ;;  %v4409_v54 = vpop.f32.mrb[43].mxu0  ;;  %4798 = vmatmul.mubr.bf16.gmra.mrb[228].mxu1 %v4544_v26  ;;  %v4502_v62 = vmax.f32 %v4404_v49, 0.0 }
 0x75b   :  { %v4410_v59 = vadd.f32 %v4409_v54, %v7489_v55  ;;  %v4503_v60 = vmax.f32 %v4406_v48, 0.0 }
 0x75c   :  { %v4504_v56 = vmax.f32 %v4408_v52, 0.0 }
 0x75d   :  { %v4505_v61 = vmax.f32 %v4410_v59, 0.0 }
 0x75e   :  { %v4546_v29 = vpack.c.bf16 %v4504_v56, %v4502_v62 }
 0x75f   :  { %v4547_v2 = vpack.c.bf16 %v4505_v61, %v4503_v60  ;;  %v4413_v3 = vpop.f32.mrb[44].mxu0 }
 0x760   :  { %v4414_v4 = vadd.f32 %v4413_v3, %v7486_v7  ;;  %v4415_v5 = vpop.f32.mrb[45].mxu0 }
 0x761   :  { %v4416_v8 = vadd.f32 %v4415_v5, %v7489_v55  ;;  %v4417_v9 = vpop.f32.mrb[46].mxu0  ;;  %4805 = vmatprep.mubr.bf16.mxu1 %v4547_v2 }
 0x762   :  { %v4418_v38 = vadd.f32 %v4417_v9, %v7486_v7  ;;  %v4419_v30 = vpop.f32.mrb[47].mxu0  ;;  %4806 = vmatmul.mubr.bf16.gmra.mrb[232].mxu1 %v4546_v29  ;;  %v4506_v10 = vmax.f32 %v4414_v4, 0.0 }
 0x763   :  { %v4420_v28 = vadd.f32 %v4419_v30, %v7489_v55  ;;  %v4507_v63 = vmax.f32 %v4416_v8, 0.0 }
 0x764   :  { %v4508_v11 = vmax.f32 %v4418_v38, 0.0 }
 0x765   :  { %v4509_v12 = vmax.f32 %v4420_v28, 0.0 }
 0x766   :  { %v4548_v53 = vpack.c.bf16 %v4508_v11, %v4506_v10  ;;  %v7558_v11 = vld [vmem:[%s7693_s5] ss:$0 sm:$0xff] }
 0x767   :  { %v4549_v13 = vpack.c.bf16 %v4509_v12, %v4507_v63  ;;  %v4423_v6 = vpop.f32.mrb[48].mxu0 }
 0x768   :  { %v4424_v15 = vadd.f32 %v4423_v6, %v7486_v7  ;;  %v4425_v16 = vpop.f32.mrb[49].mxu0 }
 0x769   :  { %v4426_v17 = vadd.f32 %v4425_v16, %v7489_v55  ;;  %v4427_v0 = vpop.f32.mrb[50].mxu0  ;;  %4813 = vmatprep.mubr.bf16.mxu1 %v4549_v13 }
 0x76a   :  { %v4428_v19 = vadd.f32 %v4427_v0, %v7486_v7  ;;  %v4429_v20 = vpop.f32.mrb[51].mxu0  ;;  %4814 = vmatmul.mubr.bf16.gmra.mrb[236].mxu1 %v4548_v53  ;;  %v4510_v18 = vmax.f32 %v4424_v15, 0.0 }
 0x76b   :  { %v4430_v21 = vadd.f32 %v4429_v20, %v7489_v55  ;;  %v4511_v57 = vmax.f32 %v4426_v17, 0.0 }
 0x76c   :  { %v4512_v1 = vmax.f32 %v4428_v19, 0.0 }
 0x76d   :  { %v4513_v22 = vmax.f32 %v4430_v21, 0.0 }
 0x76e   :  { %v4550_v24 = vpack.c.bf16 %v4512_v1, %v4510_v18 }
 0x76f   :  { %v4551_v23 = vpack.c.bf16 %v4513_v22, %v4511_v57  ;;  %v4433_v58 = vpop.f32.mrb[52].mxu0 }
 0x770   :  { %v4434_v43 = vadd.f32 %v4433_v58, %v7486_v7  ;;  %v4435_v31 = vpop.f32.mrb[53].mxu0 }
 0x771   :  { %v4436_v14 = vadd.f32 %v4435_v31, %v7489_v55  ;;  %v4437_v32 = vpop.f32.mrb[54].mxu0  ;;  %4821 = vmatprep.mubr.bf16.mxu1 %v4551_v23 }
 0x772   :  { %v4438_v35 = vadd.f32 %v4437_v32, %v7486_v7  ;;  %v4439_v34 = vpop.f32.mrb[55].mxu0  ;;  %4822 = vmatmul.mubr.bf16.gmra.mrb[240].mxu1 %v4550_v24  ;;  %v4514_v37 = vmax.f32 %v4434_v43, 0.0 }
 0x773   :  { %v4440_v36 = vadd.f32 %v4439_v34, %v7489_v55  ;;  %v4515_v40 = vmax.f32 %v4436_v14, 0.0 }
 0x774   :  { %v4516_v39 = vmax.f32 %v4438_v35, 0.0 }
 0x775   :  { %v4517_v41 = vmax.f32 %v4440_v36, 0.0 }
 0x776   :  { %v4552_v27 = vpack.c.bf16 %v4516_v39, %v4514_v37 }
 0x777   :  { %v4553_v42 = vpack.c.bf16 %v4517_v41, %v4515_v40  ;;  %v4443_v44 = vpop.f32.mrb[56].mxu0 }
 0x778   :  { %v4444_v25 = vadd.f32 %v4443_v44, %v7486_v7  ;;  %v4445_v45 = vpop.f32.mrb[57].mxu0 }
 0x779   :  { %v4446_v33 = vadd.f32 %v4445_v45, %v7489_v55  ;;  %v4447_v26 = vpop.f32.mrb[58].mxu0  ;;  %4829 = vmatprep.mubr.bf16.mxu1 %v4553_v42 }
 0x77a   :  { %v4448_v46 = vadd.f32 %v4447_v26, %v7486_v7  ;;  %v4449_v47 = vpop.f32.mrb[59].mxu0  ;;  %4830 = vmatmul.mubr.bf16.gmra.mrb[244].mxu1 %v4552_v27  ;;  %v4518_v50 = vmax.f32 %v4444_v25, 0.0 }
 0x77b   :  { %v4450_v49 = vadd.f32 %v4449_v47, %v7489_v55  ;;  %v4519_v51 = vmax.f32 %v4446_v33, 0.0 }
 0x77c   :  { %v4520_v48 = vmax.f32 %v4448_v46, 0.0 }
 0x77d   :  { %v4521_v52 = vmax.f32 %v4450_v49, 0.0 }
 0x77e   :  { %v4554_v54 = vpack.c.bf16 %v4520_v48, %v4518_v50 }
 0x77f   :  { %v4555_v59 = vpack.c.bf16 %v4521_v52, %v4519_v51  ;;  %v4453_v62 = vpop.f32.mrb[60].mxu0 }
 0x780   :  { %v4454_v56 = vadd.f32 %v4453_v62, %v7486_v7  ;;  %v4455_v60 = vpop.f32.mrb[61].mxu0 }
 0x781   :  { %v4456_v61 = vadd.f32 %v4455_v60, %v7489_v55  ;;  %v4457_v29 = vpop.f32.mrb[62].mxu0  ;;  %4837 = vmatprep.mubr.bf16.mxu1 %v4555_v59 }
 0x782   :  { %v4458_v2 = vadd.f32 %v4457_v29, %v7486_v7  ;;  %v4459_v3 = vpop.f32.mrb[63].mxu0  ;;  %4838 = vmatmul.mubr.bf16.gmra.mrb[248].mxu1 %v4554_v54  ;;  %v4522_v5 = vmax.f32 %v4454_v56, 0.0 }
 0x783   :  { %v4460_v4 = vadd.f32 %v4459_v3, %v7489_v55  ;;  %v4523_v9 = vmax.f32 %v4456_v61, 0.0 }
 0x784   :  { %v4524_v8 = vmax.f32 %v4458_v2, 0.0 }
 0x785   :  { %v4525_v38 = vmax.f32 %v4460_v4, 0.0 }
 0x786   :  { %v4556_v30 = vpack.c.bf16 %v4524_v8, %v4522_v5 }
 0x787   :  { %v4557_v28 = vpack.c.bf16 %v4525_v38, %v4523_v9 }
 0x789   :  { %4845 = vmatprep.mubr.bf16.mxu1 %v4557_v28 }
 0x78a   :  { %4846 = vmatmul.mubr.bf16.gmra.mrb[252].mxu1 %v4556_v30 }
 0x7e5   :  { %v5394_v10 = vpop.f32.mrb[192].mxu1 }
 0x7e6   :  { %v5395_v63 = vpop.f32.mrb[193].mxu1 }
 0x7e7   :  { %v5396_v7 = vadd.f32 %v5395_v63, %v5394_v10  ;;  %v5397_v12 = vpop.f32.mrb[194].mxu1 }
 0x7e8   :  { %v5398_v53 = vpop.f32.mrb[195].mxu1 }
 0x7e9   :  { %v4728_v55 = vadd.f32 %v5396_v7, %v7558_v11  ;;  %v5399_v13 = vadd.f32 %v5398_v53, %v5397_v12 }
 0x7eb   :  { %4854 = vst [vmem:[%s7694_s6] sm:$0xff] %v4728_v55  ;;  %v4731_v6 = vadd.f32 %v5399_v13, %v7558_v11 }
 0x7ed   :  { %4855 = vst [vmem:[%s7694_s6 + $0x8] sm:$0xff] %v4731_v6  ;;  %v5400_v15 = vpop.f32.mrb[196].mxu1 }
 0x7ee   :  { %v5401_v16 = vpop.f32.mrb[197].mxu1 }
 0x7ef   :  { %v5402_v17 = vadd.f32 %v5401_v16, %v5400_v15  ;;  %v5403_v0 = vpop.f32.mrb[198].mxu1 }
 0x7f0   :  { %v5404_v19 = vpop.f32.mrb[199].mxu1 }
 0x7f1   :  { %v4736_v20 = vadd.f32 %v5402_v17, %v7558_v11  ;;  %v5405_v21 = vadd.f32 %v5404_v19, %v5403_v0 }
 0x7f3   :  { %4856 = vst [vmem:[%s7694_s6 + $0x10] sm:$0xff] %v4736_v20  ;;  %v4739_v18 = vadd.f32 %v5405_v21, %v7558_v11 }
 0x7f5   :  { %4857 = vst [vmem:[%s7694_s6 + $0x18] sm:$0xff] %v4739_v18  ;;  %v5406_v1 = vpop.f32.mrb[200].mxu1 }
 0x7f6   :  { %v5407_v57 = vpop.f32.mrb[201].mxu1 }
 0x7f7   :  { %v5408_v22 = vadd.f32 %v5407_v57, %v5406_v1  ;;  %v5409_v24 = vpop.f32.mrb[202].mxu1 }
 0x7f8   :  { %v5410_v23 = vpop.f32.mrb[203].mxu1 }
 0x7f9   :  { %v4744_v58 = vadd.f32 %v5408_v22, %v7558_v11  ;;  %v5411_v43 = vadd.f32 %v5410_v23, %v5409_v24 }
 0x7fb   :  { %4858 = vst [vmem:[%s7694_s6 + $0x20] sm:$0xff] %v4744_v58  ;;  %v4747_v31 = vadd.f32 %v5411_v43, %v7558_v11 }
 0x7fd   :  { %4859 = vst [vmem:[%s7694_s6 + $0x28] sm:$0xff] %v4747_v31  ;;  %v5412_v14 = vpop.f32.mrb[204].mxu1 }
 0x7fe   :  { %v5413_v32 = vpop.f32.mrb[205].mxu1 }
 0x7ff   :  { %v5414_v35 = vadd.f32 %v5413_v32, %v5412_v14  ;;  %v5415_v34 = vpop.f32.mrb[206].mxu1 }
 0x800   :  { %v5416_v36 = vpop.f32.mrb[207].mxu1 }
 0x801   :  { %v4752_v37 = vadd.f32 %v5414_v35, %v7558_v11  ;;  %v5417_v39 = vadd.f32 %v5416_v36, %v5415_v34 }
 0x803   :  { %4860 = vst [vmem:[%s7694_s6 + $0x30] sm:$0xff] %v4752_v37  ;;  %v4755_v40 = vadd.f32 %v5417_v39, %v7558_v11 }
 0x805   :  { %4861 = vst [vmem:[%s7694_s6 + $0x38] sm:$0xff] %v4755_v40  ;;  %v5418_v41 = vpop.f32.mrb[208].mxu1 }
 0x806   :  { %v5419_v27 = vpop.f32.mrb[209].mxu1 }
 0x807   :  { %v5420_v42 = vadd.f32 %v5419_v27, %v5418_v41  ;;  %v5421_v44 = vpop.f32.mrb[210].mxu1 }
 0x808   :  { %v5422_v25 = vpop.f32.mrb[211].mxu1 }
 0x809   :  { %v4760_v45 = vadd.f32 %v5420_v42, %v7558_v11  ;;  %v5423_v33 = vadd.f32 %v5422_v25, %v5421_v44 }
 0x80b   :  { %4862 = vst [vmem:[%s7694_s6 + $0x40] sm:$0xff] %v4760_v45  ;;  %v4763_v26 = vadd.f32 %v5423_v33, %v7558_v11 }
 0x80d   :  { %4863 = vst [vmem:[%s7694_s6 + $0x48] sm:$0xff] %v4763_v26  ;;  %v5424_v46 = vpop.f32.mrb[212].mxu1 }
 0x80e   :  { %v5425_v47 = vpop.f32.mrb[213].mxu1 }
 0x80f   :  { %v5426_v49 = vadd.f32 %v5425_v47, %v5424_v46  ;;  %v5427_v50 = vpop.f32.mrb[214].mxu1 }
 0x810   :  { %v5428_v48 = vpop.f32.mrb[215].mxu1 }
 0x811   :  { %v4768_v51 = vadd.f32 %v5426_v49, %v7558_v11  ;;  %v5429_v52 = vadd.f32 %v5428_v48, %v5427_v50 }
 0x813   :  { %4864 = vst [vmem:[%s7694_s6 + $0x50] sm:$0xff] %v4768_v51  ;;  %v4771_v54 = vadd.f32 %v5429_v52, %v7558_v11 }
 0x815   :  { %4865 = vst [vmem:[%s7694_s6 + $0x58] sm:$0xff] %v4771_v54  ;;  %v5430_v59 = vpop.f32.mrb[216].mxu1 }
 0x816   :  { %v5431_v62 = vpop.f32.mrb[217].mxu1 }
 0x817   :  { %v5432_v56 = vadd.f32 %v5431_v62, %v5430_v59  ;;  %v5433_v60 = vpop.f32.mrb[218].mxu1 }
 0x818   :  { %v5434_v61 = vpop.f32.mrb[219].mxu1 }
 0x819   :  { %v4776_v29 = vadd.f32 %v5432_v56, %v7558_v11  ;;  %v5435_v2 = vadd.f32 %v5434_v61, %v5433_v60 }
 0x81b   :  { %4866 = vst [vmem:[%s7694_s6 + $0x60] sm:$0xff] %v4776_v29  ;;  %v4779_v3 = vadd.f32 %v5435_v2, %v7558_v11 }
 0x81d   :  { %4867 = vst [vmem:[%s7694_s6 + $0x68] sm:$0xff] %v4779_v3  ;;  %v5436_v4 = vpop.f32.mrb[220].mxu1 }
 0x81e   :  { %v5437_v5 = vpop.f32.mrb[221].mxu1 }
 0x81f   :  { %v5438_v8 = vadd.f32 %v5437_v5, %v5436_v4  ;;  %v5439_v9 = vpop.f32.mrb[222].mxu1 }
 0x820   :  { %v5440_v38 = vpop.f32.mrb[223].mxu1 }
 0x821   :  { %v4784_v30 = vadd.f32 %v5438_v8, %v7558_v11  ;;  %v5441_v28 = vadd.f32 %v5440_v38, %v5439_v9 }
 0x823   :  { %4868 = vst [vmem:[%s7694_s6 + $0x70] sm:$0xff] %v4784_v30  ;;  %v4787_v10 = vadd.f32 %v5441_v28, %v7558_v11 }
 0x825   :  { %4869 = vst [vmem:[%s7694_s6 + $0x78] sm:$0xff] %v4787_v10  ;;  %v5442_v63 = vpop.f32.mrb[224].mxu1 }
 0x826   :  { %v5443_v7 = vpop.f32.mrb[225].mxu1 }
 0x827   :  { %v5444_v12 = vadd.f32 %v5443_v7, %v5442_v63  ;;  %v5445_v53 = vpop.f32.mrb[226].mxu1 }
 0x828   :  { %v5446_v55 = vpop.f32.mrb[227].mxu1 }
 0x829   :  { %v4792_v13 = vadd.f32 %v5444_v12, %v7558_v11  ;;  %v5447_v6 = vadd.f32 %v5446_v55, %v5445_v53 }
 0x82b   :  { %4870 = vst [vmem:[%s7694_s6 + $0x80] sm:$0xff] %v4792_v13  ;;  %v4795_v15 = vadd.f32 %v5447_v6, %v7558_v11 }
 0x82d   :  { %4871 = vst [vmem:[%s7694_s6 + $0x88] sm:$0xff] %v4795_v15  ;;  %v5448_v16 = vpop.f32.mrb[228].mxu1 }
 0x82e   :  { %v5449_v17 = vpop.f32.mrb[229].mxu1 }
 0x82f   :  { %v5450_v0 = vadd.f32 %v5449_v17, %v5448_v16  ;;  %v5451_v19 = vpop.f32.mrb[230].mxu1 }
 0x830   :  { %v5452_v20 = vpop.f32.mrb[231].mxu1 }
 0x831   :  { %v4800_v21 = vadd.f32 %v5450_v0, %v7558_v11  ;;  %v5453_v18 = vadd.f32 %v5452_v20, %v5451_v19 }
 0x833   :  { %4872 = vst [vmem:[%s7694_s6 + $0x90] sm:$0xff] %v4800_v21  ;;  %v4803_v1 = vadd.f32 %v5453_v18, %v7558_v11 }
 0x835   :  { %4873 = vst [vmem:[%s7694_s6 + $0x98] sm:$0xff] %v4803_v1  ;;  %v5454_v57 = vpop.f32.mrb[232].mxu1 }
 0x836   :  { %v5455_v22 = vpop.f32.mrb[233].mxu1 }
 0x837   :  { %v5456_v24 = vadd.f32 %v5455_v22, %v5454_v57  ;;  %v5457_v23 = vpop.f32.mrb[234].mxu1 }
 0x838   :  { %v5458_v58 = vpop.f32.mrb[235].mxu1 }
 0x839   :  { %v4808_v43 = vadd.f32 %v5456_v24, %v7558_v11  ;;  %v5459_v31 = vadd.f32 %v5458_v58, %v5457_v23 }
 0x83b   :  { %4874 = vst [vmem:[%s7694_s6 + $0xa0] sm:$0xff] %v4808_v43  ;;  %v4811_v14 = vadd.f32 %v5459_v31, %v7558_v11 }
 0x83d   :  { %4875 = vst [vmem:[%s7694_s6 + $0xa8] sm:$0xff] %v4811_v14  ;;  %v5460_v32 = vpop.f32.mrb[236].mxu1 }
 0x83e   :  { %v5461_v35 = vpop.f32.mrb[237].mxu1 }
 0x83f   :  { %v5462_v34 = vadd.f32 %v5461_v35, %v5460_v32  ;;  %v5463_v36 = vpop.f32.mrb[238].mxu1 }
 0x840   :  { %v5464_v37 = vpop.f32.mrb[239].mxu1 }
 0x841   :  { %v4816_v39 = vadd.f32 %v5462_v34, %v7558_v11  ;;  %v5465_v40 = vadd.f32 %v5464_v37, %v5463_v36 }
 0x843   :  { %4876 = vst [vmem:[%s7694_s6 + $0xb0] sm:$0xff] %v4816_v39  ;;  %v4819_v41 = vadd.f32 %v5465_v40, %v7558_v11 }
 0x845   :  { %4877 = vst [vmem:[%s7694_s6 + $0xb8] sm:$0xff] %v4819_v41  ;;  %v5466_v27 = vpop.f32.mrb[240].mxu1 }
 0x846   :  { %v5467_v42 = vpop.f32.mrb[241].mxu1 }
 0x847   :  { %v5468_v44 = vadd.f32 %v5467_v42, %v5466_v27  ;;  %v5469_v25 = vpop.f32.mrb[242].mxu1 }
 0x848   :  { %v5470_v45 = vpop.f32.mrb[243].mxu1 }
 0x849   :  { %v4824_v33 = vadd.f32 %v5468_v44, %v7558_v11  ;;  %v5471_v26 = vadd.f32 %v5470_v45, %v5469_v25 }
 0x84b   :  { %4878 = vst [vmem:[%s7694_s6 + $0xc0] sm:$0xff] %v4824_v33  ;;  %v4827_v46 = vadd.f32 %v5471_v26, %v7558_v11 }
 0x84d   :  { %4879 = vst [vmem:[%s7694_s6 + $0xc8] sm:$0xff] %v4827_v46  ;;  %v5472_v47 = vpop.f32.mrb[244].mxu1 }
 0x84e   :  { %v5473_v49 = vpop.f32.mrb[245].mxu1 }
 0x84f   :  { %v5474_v50 = vadd.f32 %v5473_v49, %v5472_v47  ;;  %v5475_v48 = vpop.f32.mrb[246].mxu1 }
 0x850   :  { %v5476_v51 = vpop.f32.mrb[247].mxu1 }
 0x851   :  { %v4832_v52 = vadd.f32 %v5474_v50, %v7558_v11  ;;  %v5477_v54 = vadd.f32 %v5476_v51, %v5475_v48 }
 0x853   :  { %4880 = vst [vmem:[%s7694_s6 + $0xd0] sm:$0xff] %v4832_v52  ;;  %v4835_v59 = vadd.f32 %v5477_v54, %v7558_v11 }
 0x855   :  { %4881 = vst [vmem:[%s7694_s6 + $0xd8] sm:$0xff] %v4835_v59  ;;  %v5478_v62 = vpop.f32.mrb[248].mxu1 }
 0x856   :  { %v5479_v56 = vpop.f32.mrb[249].mxu1 }
 0x857   :  { %v5480_v60 = vadd.f32 %v5479_v56, %v5478_v62  ;;  %v5481_v61 = vpop.f32.mrb[250].mxu1 }
 0x858   :  { %v5482_v29 = vpop.f32.mrb[251].mxu1 }
 0x859   :  { %v4840_v2 = vadd.f32 %v5480_v60, %v7558_v11  ;;  %v5483_v3 = vadd.f32 %v5482_v29, %v5481_v61 }
 0x85b   :  { %4882 = vst [vmem:[%s7694_s6 + $0xe0] sm:$0xff] %v4840_v2  ;;  %v4843_v4 = vadd.f32 %v5483_v3, %v7558_v11 }
 0x85d   :  { %4883 = vst [vmem:[%s7694_s6 + $0xe8] sm:$0xff] %v4843_v4  ;;  %v5484_v5 = vpop.f32.mrb[252].mxu1 }
 0x85e   :  { %v5485_v8 = vpop.f32.mrb[253].mxu1 }
 0x85f   :  { %v5486_v9 = vadd.f32 %v5485_v8, %v5484_v5  ;;  %v5487_v38 = vpop.f32.mrb[254].mxu1 }
 0x860   :  { %v5488_v30 = vpop.f32.mrb[255].mxu1 }
 0x861   :  { %v4848_v28 = vadd.f32 %v5486_v9, %v7558_v11  ;;  %v5489_v10 = vadd.f32 %v5488_v30, %v5487_v38 }
 0x863   :  { %4884 = vst [vmem:[%s7694_s6 + $0xf0] sm:$0xff] %v4848_v28  ;;  %v4851_v63 = vadd.f32 %v5489_v10, %v7558_v11 }
 0x865   :  { %4885 = vst [vmem:[%s7694_s6 + $0xf8] sm:$0xff] %v4851_v63 }

</bundles_post_ra>
